<compile_context>
chip_gen: v6e
topology: v6e:2x2x1
jax: 0.10.0
libtpu: 0.0.40
codegen_flags: <defaults>
</compile_context>

<pallas_src>
import functools

import jax
import jax.numpy as jnp
from jax import lax
from jax.experimental import pallas as pl
from jax.experimental.pallas import tpu as pltpu


def _conv_kernel(w_ref, b_ref, x_ref, o_ref, *, C, H, W, KH, KW, OC, nb_sub, n_sub):
    """Direct KHxKW VALID conv on flattened-spatial, lane-dense tiles.

    w_ref: SMEM (OC*C*KH*KW,) flat OIHW weights
    b_ref: SMEM (OC,)         bias
    x_ref: VMEM (NB, C*H*W)   NB = nb_sub * n_sub batch rows, lane-dense
    o_ref: VMEM (NB, OC*H*W)  full-plane outputs; positions with oh>=OH or
                              ow>=OW are don't-care and stripped in the wrapper.
    """
    HW = H * W

    def sub_block(k, carry):
        r0 = pl.multiple_of(k * nb_sub, nb_sub)
        rows = pl.ds(r0, nb_sub)

        # Taps-outer / OC-inner: only OC accumulators + one tap live (~16 vregs).
        acc = [jnp.full((nb_sub, HW), b_ref[oc], dtype=jnp.float32)
               for oc in range(OC)]

        for c in range(C):
            # One dense load per input channel (lane offset c*HW is 128-aligned).
            seg = x_ref[rows, pl.ds(c * HW, HW)].astype(jnp.float32)
            for i in range(KH):
                for j in range(KW):
                    s = i * W + j
                    # tap[:, p] == seg[:, p + s] for every *valid* output position p
                    # (valid p never wraps around); circular shift runs on the XLU.
                    tap = seg if s == 0 else pltpu.roll(seg, shift=HW - s, axis=1)
                    for oc in range(OC):
                        w = w_ref[((oc * C + c) * KH + i) * KW + j]   # SMEM scalar
                        acc[oc] = acc[oc] + w * tap                   # VPU MAC, f32

        for oc in range(OC):
            # Lane-dense, unmasked store (lane offset oc*HW is 128-aligned).
            o_ref[rows, pl.ds(oc * HW, HW)] = acc[oc].astype(o_ref.dtype)
        return carry

    lax.fori_loop(0, n_sub, sub_block, 0, unroll=n_sub <= 8)


def _pick_batch_block(n):
    """Batch rows per grid step: full batch if tiny, otherwise a multiple of 8
    that keeps >= 2 grid steps (megacore / v7x 2 TCs) and <= 256 rows/step."""
    if n <= 8:
        return n
    target = min(256, -(-n // 2))
    return max(8, (target // 8) * 8)


def freedom_forward(x, weight, bias):
    """x: (N, 3, H, W) f32; weight: (6, 3, 3, 3) OIHW; bias: (6,).
    Returns (N, 6, H-2, W-2), identical to PyTorch Conv2d(3, 6, 3, stride=1, padding=0)."""
    N, C, H, W = x.shape
    OC, _, KH, KW = weight.shape
    OH, OW = H - KH + 1, W - KW + 1
    HW = H * W
    row_in, row_out = C * HW, OC * HW

    NB = _pick_batch_block(N)
    grid_n = -(-N // NB)
    n_pad = grid_n * NB
    nb_sub = min(8, NB)
    n_sub = NB // nb_sub

    # Free for contiguous NCHW: lane-dense (N, C*H*W) rows -> one contiguous DMA/step.
    x_flat = x.reshape(N, row_in)
    if n_pad != N:
        x_flat = jnp.pad(x_flat, ((0, n_pad - N), (0, 0)))

    kernel = functools.partial(
        _conv_kernel, C=C, H=H, W=W, KH=KH, KW=KW, OC=OC,
        nb_sub=nb_sub, n_sub=n_sub)

    out_flat = pl.pallas_call(
        kernel,
        out_shape=jax.ShapeDtypeStruct((n_pad, row_out), x.dtype),
        grid=(grid_n,),
        in_specs=[
            pl.BlockSpec(memory_space=pltpu.MemorySpace.SMEM),   # weights (scalars)
            pl.BlockSpec(memory_space=pltpu.MemorySpace.SMEM),   # bias (scalars)
            pl.BlockSpec((NB, row_in), lambda n: (n, 0)),        # NB batch rows
        ],
        out_specs=pl.BlockSpec((NB, row_out), lambda n: (n, 0)),
        compiler_params=pltpu.CompilerParams(
            dimension_semantics=("parallel",)),
        cost_estimate=pl.CostEstimate(
            flops=2 * N * OC * C * KH * KW * OH * OW,
            transcendentals=0,
            bytes_accessed=(x.size + weight.size + bias.size
                            + N * OC * OH * OW) * x.dtype.itemsize),
    )(weight.reshape(-1), bias, x_flat)

    # TODO(synk): for very large H*W, additionally tile the grid over output rows
    # with a +2-row halo in the index_map to bound per-step VMEM (v7x: 64 MiB).
    # Layout plumbing only: reshape is free (contiguous); slice strips the
    # don't-care right/bottom border that was computed for lane density.
    out = out_flat[:N].reshape(N, OC, H, W)[:, :, :OH, :OW]
    return out


if __name__ == "__main__":
    key = jax.random.PRNGKey(0)
    kx, kw, kb = jax.random.split(key, 3)

    # Conv2d(3, 6, kernel_size=3) parameters, deterministic init.
    C_in, C_out, K = 3, 6, 3
    fan_in = C_in * K * K
    bound = 1.0 / jnp.sqrt(jnp.float32(fan_in))
    weight = jax.random.uniform(kw, (C_out, C_in, K, K), jnp.float32, -bound, bound)
    bias = jax.random.uniform(kb, (C_out,), jnp.float32, -bound, bound)

    # Small NCHW input consistent with the module: (batch=2, channels=3, 16x16).
    x = jax.random.normal(kx, (2, 3, 16, 16), jnp.float32)

    out = freedom_forward(x, weight, bias)
    out = jax.block_until_ready(out)
    assert out.shape == (2, 6, 14, 14), out.shape

    # Cross-check against XLA's native conv.
    ref = jax.lax.conv_general_dilated(
        x, weight, window_strides=(1, 1), padding="VALID",
        dimension_numbers=("NCHW", "OIHW", "NCHW")) + bias.reshape(1, C_out, 1, 1)
    assert jnp.allclose(out, ref, atol=1e-5, rtol=1e-5)

    print("KERNEL_OK")
</pallas_src>

<mosaic_0001>
module attributes {stable_mosaic.version = 11 : i64} {
  func.func @_conv_kernel(%arg0: i32, %arg1: memref<162xf32, #tpu.memory_space<smem>>, %arg2: memref<6xf32, #tpu.memory_space<smem>>, %arg3: memref<2x768xf32, #tpu.memory_space<vmem>>, %arg4: memref<2x1536xf32, #tpu.memory_space<vmem>>) attributes {dimension_semantics = [#tpu.dimension_semantics<parallel>], iteration_bounds = array<i64: 1>, scalar_prefetch = 0 : i64, scratch_operands = 0 : i64, tpu.core_type = #tpu.core_type<tc>, window_params = [{transform_indices = @transform_0, window_bounds = array<i64: 162>}, {transform_indices = @transform_1, window_bounds = array<i64: 6>}, {transform_indices = @transform_2, window_bounds = array<i64: 2, 768>}, {transform_indices = @transform_3, window_bounds = array<i64: 2, 1536>}]} {
    %c0_i32 = arith.constant 0 : i32
    %c2_i32 = arith.constant 2 : i32
    %0 = arith.muli %c0_i32, %c2_i32 : i32
    %1 = tpu.assume_multiple %0, 2 : i32
    %c0 = arith.constant 0 : index
    %2 = memref.load %arg2[%c0] : memref<6xf32, #tpu.memory_space<smem>>
    %3 = vector.broadcast %2 : f32 to vector<2x256xf32>
    %c1 = arith.constant 1 : index
    %4 = memref.load %arg2[%c1] : memref<6xf32, #tpu.memory_space<smem>>
    %5 = vector.broadcast %4 : f32 to vector<2x256xf32>
    %c2 = arith.constant 2 : index
    %6 = memref.load %arg2[%c2] : memref<6xf32, #tpu.memory_space<smem>>
    %7 = vector.broadcast %6 : f32 to vector<2x256xf32>
    %c3 = arith.constant 3 : index
    %8 = memref.load %arg2[%c3] : memref<6xf32, #tpu.memory_space<smem>>
    %9 = vector.broadcast %8 : f32 to vector<2x256xf32>
    %c4 = arith.constant 4 : index
    %10 = memref.load %arg2[%c4] : memref<6xf32, #tpu.memory_space<smem>>
    %11 = vector.broadcast %10 : f32 to vector<2x256xf32>
    %c5 = arith.constant 5 : index
    %12 = memref.load %arg2[%c5] : memref<6xf32, #tpu.memory_space<smem>>
    %13 = vector.broadcast %12 : f32 to vector<2x256xf32>
    %14 = arith.index_cast %1 : i32 to index
    %c0_0 = arith.constant 0 : index
    %15 = vector.load %arg3[%14, %c0_0] : memref<2x768xf32, #tpu.memory_space<vmem>>, vector<2x256xf32>
    %c0_1 = arith.constant 0 : index
    %16 = memref.load %arg1[%c0_1] : memref<162xf32, #tpu.memory_space<smem>>
    %17 = vector.broadcast %16 : f32 to vector<2x256xf32>
    %18 = arith.mulf %17, %15 : vector<2x256xf32>
    %19 = arith.addf %3, %18 : vector<2x256xf32>
    %c27 = arith.constant 27 : index
    %20 = memref.load %arg1[%c27] : memref<162xf32, #tpu.memory_space<smem>>
    %21 = vector.broadcast %20 : f32 to vector<2x256xf32>
    %22 = arith.mulf %21, %15 : vector<2x256xf32>
    %23 = arith.addf %5, %22 : vector<2x256xf32>
    %c54 = arith.constant 54 : index
    %24 = memref.load %arg1[%c54] : memref<162xf32, #tpu.memory_space<smem>>
    %25 = vector.broadcast %24 : f32 to vector<2x256xf32>
    %26 = arith.mulf %25, %15 : vector<2x256xf32>
    %27 = arith.addf %7, %26 : vector<2x256xf32>
    %c81 = arith.constant 81 : index
    %28 = memref.load %arg1[%c81] : memref<162xf32, #tpu.memory_space<smem>>
    %29 = vector.broadcast %28 : f32 to vector<2x256xf32>
    %30 = arith.mulf %29, %15 : vector<2x256xf32>
    %31 = arith.addf %9, %30 : vector<2x256xf32>
    %c108 = arith.constant 108 : index
    %32 = memref.load %arg1[%c108] : memref<162xf32, #tpu.memory_space<smem>>
    %33 = vector.broadcast %32 : f32 to vector<2x256xf32>
    %34 = arith.mulf %33, %15 : vector<2x256xf32>
    %35 = arith.addf %11, %34 : vector<2x256xf32>
    %c135 = arith.constant 135 : index
    %36 = memref.load %arg1[%c135] : memref<162xf32, #tpu.memory_space<smem>>
    %37 = vector.broadcast %36 : f32 to vector<2x256xf32>
    %38 = arith.mulf %37, %15 : vector<2x256xf32>
    %39 = arith.addf %13, %38 : vector<2x256xf32>
    %c255_i32 = arith.constant 255 : i32
    %40 = tpu.dynamic_rotate %15 by %c255_i32 dim 1 : vector<2x256xf32>, i32 -> vector<2x256xf32>
    %c1_2 = arith.constant 1 : index
    %41 = memref.load %arg1[%c1_2] : memref<162xf32, #tpu.memory_space<smem>>
    %42 = vector.broadcast %41 : f32 to vector<2x256xf32>
    %43 = arith.mulf %42, %40 : vector<2x256xf32>
    %44 = arith.addf %19, %43 : vector<2x256xf32>
    %c28 = arith.constant 28 : index
    %45 = memref.load %arg1[%c28] : memref<162xf32, #tpu.memory_space<smem>>
    %46 = vector.broadcast %45 : f32 to vector<2x256xf32>
    %47 = arith.mulf %46, %40 : vector<2x256xf32>
    %48 = arith.addf %23, %47 : vector<2x256xf32>
    %c55 = arith.constant 55 : index
    %49 = memref.load %arg1[%c55] : memref<162xf32, #tpu.memory_space<smem>>
    %50 = vector.broadcast %49 : f32 to vector<2x256xf32>
    %51 = arith.mulf %50, %40 : vector<2x256xf32>
    %52 = arith.addf %27, %51 : vector<2x256xf32>
    %c82 = arith.constant 82 : index
    %53 = memref.load %arg1[%c82] : memref<162xf32, #tpu.memory_space<smem>>
    %54 = vector.broadcast %53 : f32 to vector<2x256xf32>
    %55 = arith.mulf %54, %40 : vector<2x256xf32>
    %56 = arith.addf %31, %55 : vector<2x256xf32>
    %c109 = arith.constant 109 : index
    %57 = memref.load %arg1[%c109] : memref<162xf32, #tpu.memory_space<smem>>
    %58 = vector.broadcast %57 : f32 to vector<2x256xf32>
    %59 = arith.mulf %58, %40 : vector<2x256xf32>
    %60 = arith.addf %35, %59 : vector<2x256xf32>
    %c136 = arith.constant 136 : index
    %61 = memref.load %arg1[%c136] : memref<162xf32, #tpu.memory_space<smem>>
    %62 = vector.broadcast %61 : f32 to vector<2x256xf32>
    %63 = arith.mulf %62, %40 : vector<2x256xf32>
    %64 = arith.addf %39, %63 : vector<2x256xf32>
    %c254_i32 = arith.constant 254 : i32
    %65 = tpu.dynamic_rotate %15 by %c254_i32 dim 1 : vector<2x256xf32>, i32 -> vector<2x256xf32>
    %c2_3 = arith.constant 2 : index
    %66 = memref.load %arg1[%c2_3] : memref<162xf32, #tpu.memory_space<smem>>
    %67 = vector.broadcast %66 : f32 to vector<2x256xf32>
    %68 = arith.mulf %67, %65 : vector<2x256xf32>
    %69 = arith.addf %44, %68 : vector<2x256xf32>
    %c29 = arith.constant 29 : index
    %70 = memref.load %arg1[%c29] : memref<162xf32, #tpu.memory_space<smem>>
    %71 = vector.broadcast %70 : f32 to vector<2x256xf32>
    %72 = arith.mulf %71, %65 : vector<2x256xf32>
    %73 = arith.addf %48, %72 : vector<2x256xf32>
    %c56 = arith.constant 56 : index
    %74 = memref.load %arg1[%c56] : memref<162xf32, #tpu.memory_space<smem>>
    %75 = vector.broadcast %74 : f32 to vector<2x256xf32>
    %76 = arith.mulf %75, %65 : vector<2x256xf32>
    %77 = arith.addf %52, %76 : vector<2x256xf32>
    %c83 = arith.constant 83 : index
    %78 = memref.load %arg1[%c83] : memref<162xf32, #tpu.memory_space<smem>>
    %79 = vector.broadcast %78 : f32 to vector<2x256xf32>
    %80 = arith.mulf %79, %65 : vector<2x256xf32>
    %81 = arith.addf %56, %80 : vector<2x256xf32>
    %c110 = arith.constant 110 : index
    %82 = memref.load %arg1[%c110] : memref<162xf32, #tpu.memory_space<smem>>
    %83 = vector.broadcast %82 : f32 to vector<2x256xf32>
    %84 = arith.mulf %83, %65 : vector<2x256xf32>
    %85 = arith.addf %60, %84 : vector<2x256xf32>
    %c137 = arith.constant 137 : index
    %86 = memref.load %arg1[%c137] : memref<162xf32, #tpu.memory_space<smem>>
    %87 = vector.broadcast %86 : f32 to vector<2x256xf32>
    %88 = arith.mulf %87, %65 : vector<2x256xf32>
    %89 = arith.addf %64, %88 : vector<2x256xf32>
    %c240_i32 = arith.constant 240 : i32
    %90 = tpu.dynamic_rotate %15 by %c240_i32 dim 1 : vector<2x256xf32>, i32 -> vector<2x256xf32>
    %c3_4 = arith.constant 3 : index
    %91 = memref.load %arg1[%c3_4] : memref<162xf32, #tpu.memory_space<smem>>
    %92 = vector.broadcast %91 : f32 to vector<2x256xf32>
    %93 = arith.mulf %92, %90 : vector<2x256xf32>
    %94 = arith.addf %69, %93 : vector<2x256xf32>
    %c30 = arith.constant 30 : index
    %95 = memref.load %arg1[%c30] : memref<162xf32, #tpu.memory_space<smem>>
    %96 = vector.broadcast %95 : f32 to vector<2x256xf32>
    %97 = arith.mulf %96, %90 : vector<2x256xf32>
    %98 = arith.addf %73, %97 : vector<2x256xf32>
    %c57 = arith.constant 57 : index
    %99 = memref.load %arg1[%c57] : memref<162xf32, #tpu.memory_space<smem>>
    %100 = vector.broadcast %99 : f32 to vector<2x256xf32>
    %101 = arith.mulf %100, %90 : vector<2x256xf32>
    %102 = arith.addf %77, %101 : vector<2x256xf32>
    %c84 = arith.constant 84 : index
    %103 = memref.load %arg1[%c84] : memref<162xf32, #tpu.memory_space<smem>>
    %104 = vector.broadcast %103 : f32 to vector<2x256xf32>
    %105 = arith.mulf %104, %90 : vector<2x256xf32>
    %106 = arith.addf %81, %105 : vector<2x256xf32>
    %c111 = arith.constant 111 : index
    %107 = memref.load %arg1[%c111] : memref<162xf32, #tpu.memory_space<smem>>
    %108 = vector.broadcast %107 : f32 to vector<2x256xf32>
    %109 = arith.mulf %108, %90 : vector<2x256xf32>
    %110 = arith.addf %85, %109 : vector<2x256xf32>
    %c138 = arith.constant 138 : index
    %111 = memref.load %arg1[%c138] : memref<162xf32, #tpu.memory_space<smem>>
    %112 = vector.broadcast %111 : f32 to vector<2x256xf32>
    %113 = arith.mulf %112, %90 : vector<2x256xf32>
    %114 = arith.addf %89, %113 : vector<2x256xf32>
    %c239_i32 = arith.constant 239 : i32
    %115 = tpu.dynamic_rotate %15 by %c239_i32 dim 1 : vector<2x256xf32>, i32 -> vector<2x256xf32>
    %c4_5 = arith.constant 4 : index
    %116 = memref.load %arg1[%c4_5] : memref<162xf32, #tpu.memory_space<smem>>
    %117 = vector.broadcast %116 : f32 to vector<2x256xf32>
    %118 = arith.mulf %117, %115 : vector<2x256xf32>
    %119 = arith.addf %94, %118 : vector<2x256xf32>
    %c31 = arith.constant 31 : index
    %120 = memref.load %arg1[%c31] : memref<162xf32, #tpu.memory_space<smem>>
    %121 = vector.broadcast %120 : f32 to vector<2x256xf32>
    %122 = arith.mulf %121, %115 : vector<2x256xf32>
    %123 = arith.addf %98, %122 : vector<2x256xf32>
    %c58 = arith.constant 58 : index
    %124 = memref.load %arg1[%c58] : memref<162xf32, #tpu.memory_space<smem>>
    %125 = vector.broadcast %124 : f32 to vector<2x256xf32>
    %126 = arith.mulf %125, %115 : vector<2x256xf32>
    %127 = arith.addf %102, %126 : vector<2x256xf32>
    %c85 = arith.constant 85 : index
    %128 = memref.load %arg1[%c85] : memref<162xf32, #tpu.memory_space<smem>>
    %129 = vector.broadcast %128 : f32 to vector<2x256xf32>
    %130 = arith.mulf %129, %115 : vector<2x256xf32>
    %131 = arith.addf %106, %130 : vector<2x256xf32>
    %c112 = arith.constant 112 : index
    %132 = memref.load %arg1[%c112] : memref<162xf32, #tpu.memory_space<smem>>
    %133 = vector.broadcast %132 : f32 to vector<2x256xf32>
    %134 = arith.mulf %133, %115 : vector<2x256xf32>
    %135 = arith.addf %110, %134 : vector<2x256xf32>
    %c139 = arith.constant 139 : index
    %136 = memref.load %arg1[%c139] : memref<162xf32, #tpu.memory_space<smem>>
    %137 = vector.broadcast %136 : f32 to vector<2x256xf32>
    %138 = arith.mulf %137, %115 : vector<2x256xf32>
    %139 = arith.addf %114, %138 : vector<2x256xf32>
    %c238_i32 = arith.constant 238 : i32
    %140 = tpu.dynamic_rotate %15 by %c238_i32 dim 1 : vector<2x256xf32>, i32 -> vector<2x256xf32>
    %c5_6 = arith.constant 5 : index
    %141 = memref.load %arg1[%c5_6] : memref<162xf32, #tpu.memory_space<smem>>
    %142 = vector.broadcast %141 : f32 to vector<2x256xf32>
    %143 = arith.mulf %142, %140 : vector<2x256xf32>
    %144 = arith.addf %119, %143 : vector<2x256xf32>
    %c32 = arith.constant 32 : index
    %145 = memref.load %arg1[%c32] : memref<162xf32, #tpu.memory_space<smem>>
    %146 = vector.broadcast %145 : f32 to vector<2x256xf32>
    %147 = arith.mulf %146, %140 : vector<2x256xf32>
    %148 = arith.addf %123, %147 : vector<2x256xf32>
    %c59 = arith.constant 59 : index
    %149 = memref.load %arg1[%c59] : memref<162xf32, #tpu.memory_space<smem>>
    %150 = vector.broadcast %149 : f32 to vector<2x256xf32>
    %151 = arith.mulf %150, %140 : vector<2x256xf32>
    %152 = arith.addf %127, %151 : vector<2x256xf32>
    %c86 = arith.constant 86 : index
    %153 = memref.load %arg1[%c86] : memref<162xf32, #tpu.memory_space<smem>>
    %154 = vector.broadcast %153 : f32 to vector<2x256xf32>
    %155 = arith.mulf %154, %140 : vector<2x256xf32>
    %156 = arith.addf %131, %155 : vector<2x256xf32>
    %c113 = arith.constant 113 : index
    %157 = memref.load %arg1[%c113] : memref<162xf32, #tpu.memory_space<smem>>
    %158 = vector.broadcast %157 : f32 to vector<2x256xf32>
    %159 = arith.mulf %158, %140 : vector<2x256xf32>
    %160 = arith.addf %135, %159 : vector<2x256xf32>
    %c140 = arith.constant 140 : index
    %161 = memref.load %arg1[%c140] : memref<162xf32, #tpu.memory_space<smem>>
    %162 = vector.broadcast %161 : f32 to vector<2x256xf32>
    %163 = arith.mulf %162, %140 : vector<2x256xf32>
    %164 = arith.addf %139, %163 : vector<2x256xf32>
    %c224_i32 = arith.constant 224 : i32
    %165 = tpu.dynamic_rotate %15 by %c224_i32 dim 1 : vector<2x256xf32>, i32 -> vector<2x256xf32>
    %c6 = arith.constant 6 : index
    %166 = memref.load %arg1[%c6] : memref<162xf32, #tpu.memory_space<smem>>
    %167 = vector.broadcast %166 : f32 to vector<2x256xf32>
    %168 = arith.mulf %167, %165 : vector<2x256xf32>
    %169 = arith.addf %144, %168 : vector<2x256xf32>
    %c33 = arith.constant 33 : index
    %170 = memref.load %arg1[%c33] : memref<162xf32, #tpu.memory_space<smem>>
    %171 = vector.broadcast %170 : f32 to vector<2x256xf32>
    %172 = arith.mulf %171, %165 : vector<2x256xf32>
    %173 = arith.addf %148, %172 : vector<2x256xf32>
    %c60 = arith.constant 60 : index
    %174 = memref.load %arg1[%c60] : memref<162xf32, #tpu.memory_space<smem>>
    %175 = vector.broadcast %174 : f32 to vector<2x256xf32>
    %176 = arith.mulf %175, %165 : vector<2x256xf32>
    %177 = arith.addf %152, %176 : vector<2x256xf32>
    %c87 = arith.constant 87 : index
    %178 = memref.load %arg1[%c87] : memref<162xf32, #tpu.memory_space<smem>>
    %179 = vector.broadcast %178 : f32 to vector<2x256xf32>
    %180 = arith.mulf %179, %165 : vector<2x256xf32>
    %181 = arith.addf %156, %180 : vector<2x256xf32>
    %c114 = arith.constant 114 : index
    %182 = memref.load %arg1[%c114] : memref<162xf32, #tpu.memory_space<smem>>
    %183 = vector.broadcast %182 : f32 to vector<2x256xf32>
    %184 = arith.mulf %183, %165 : vector<2x256xf32>
    %185 = arith.addf %160, %184 : vector<2x256xf32>
    %c141 = arith.constant 141 : index
    %186 = memref.load %arg1[%c141] : memref<162xf32, #tpu.memory_space<smem>>
    %187 = vector.broadcast %186 : f32 to vector<2x256xf32>
    %188 = arith.mulf %187, %165 : vector<2x256xf32>
    %189 = arith.addf %164, %188 : vector<2x256xf32>
    %c223_i32 = arith.constant 223 : i32
    %190 = tpu.dynamic_rotate %15 by %c223_i32 dim 1 : vector<2x256xf32>, i32 -> vector<2x256xf32>
    %c7 = arith.constant 7 : index
    %191 = memref.load %arg1[%c7] : memref<162xf32, #tpu.memory_space<smem>>
    %192 = vector.broadcast %191 : f32 to vector<2x256xf32>
    %193 = arith.mulf %192, %190 : vector<2x256xf32>
    %194 = arith.addf %169, %193 : vector<2x256xf32>
    %c34 = arith.constant 34 : index
    %195 = memref.load %arg1[%c34] : memref<162xf32, #tpu.memory_space<smem>>
    %196 = vector.broadcast %195 : f32 to vector<2x256xf32>
    %197 = arith.mulf %196, %190 : vector<2x256xf32>
    %198 = arith.addf %173, %197 : vector<2x256xf32>
    %c61 = arith.constant 61 : index
    %199 = memref.load %arg1[%c61] : memref<162xf32, #tpu.memory_space<smem>>
    %200 = vector.broadcast %199 : f32 to vector<2x256xf32>
    %201 = arith.mulf %200, %190 : vector<2x256xf32>
    %202 = arith.addf %177, %201 : vector<2x256xf32>
    %c88 = arith.constant 88 : index
    %203 = memref.load %arg1[%c88] : memref<162xf32, #tpu.memory_space<smem>>
    %204 = vector.broadcast %203 : f32 to vector<2x256xf32>
    %205 = arith.mulf %204, %190 : vector<2x256xf32>
    %206 = arith.addf %181, %205 : vector<2x256xf32>
    %c115 = arith.constant 115 : index
    %207 = memref.load %arg1[%c115] : memref<162xf32, #tpu.memory_space<smem>>
    %208 = vector.broadcast %207 : f32 to vector<2x256xf32>
    %209 = arith.mulf %208, %190 : vector<2x256xf32>
    %210 = arith.addf %185, %209 : vector<2x256xf32>
    %c142 = arith.constant 142 : index
    %211 = memref.load %arg1[%c142] : memref<162xf32, #tpu.memory_space<smem>>
    %212 = vector.broadcast %211 : f32 to vector<2x256xf32>
    %213 = arith.mulf %212, %190 : vector<2x256xf32>
    %214 = arith.addf %189, %213 : vector<2x256xf32>
    %c222_i32 = arith.constant 222 : i32
    %215 = tpu.dynamic_rotate %15 by %c222_i32 dim 1 : vector<2x256xf32>, i32 -> vector<2x256xf32>
    %c8 = arith.constant 8 : index
    %216 = memref.load %arg1[%c8] : memref<162xf32, #tpu.memory_space<smem>>
    %217 = vector.broadcast %216 : f32 to vector<2x256xf32>
    %218 = arith.mulf %217, %215 : vector<2x256xf32>
    %219 = arith.addf %194, %218 : vector<2x256xf32>
    %c35 = arith.constant 35 : index
    %220 = memref.load %arg1[%c35] : memref<162xf32, #tpu.memory_space<smem>>
    %221 = vector.broadcast %220 : f32 to vector<2x256xf32>
    %222 = arith.mulf %221, %215 : vector<2x256xf32>
    %223 = arith.addf %198, %222 : vector<2x256xf32>
    %c62 = arith.constant 62 : index
    %224 = memref.load %arg1[%c62] : memref<162xf32, #tpu.memory_space<smem>>
    %225 = vector.broadcast %224 : f32 to vector<2x256xf32>
    %226 = arith.mulf %225, %215 : vector<2x256xf32>
    %227 = arith.addf %202, %226 : vector<2x256xf32>
    %c89 = arith.constant 89 : index
    %228 = memref.load %arg1[%c89] : memref<162xf32, #tpu.memory_space<smem>>
    %229 = vector.broadcast %228 : f32 to vector<2x256xf32>
    %230 = arith.mulf %229, %215 : vector<2x256xf32>
    %231 = arith.addf %206, %230 : vector<2x256xf32>
    %c116 = arith.constant 116 : index
    %232 = memref.load %arg1[%c116] : memref<162xf32, #tpu.memory_space<smem>>
    %233 = vector.broadcast %232 : f32 to vector<2x256xf32>
    %234 = arith.mulf %233, %215 : vector<2x256xf32>
    %235 = arith.addf %210, %234 : vector<2x256xf32>
    %c143 = arith.constant 143 : index
    %236 = memref.load %arg1[%c143] : memref<162xf32, #tpu.memory_space<smem>>
    %237 = vector.broadcast %236 : f32 to vector<2x256xf32>
    %238 = arith.mulf %237, %215 : vector<2x256xf32>
    %239 = arith.addf %214, %238 : vector<2x256xf32>
    %240 = arith.index_cast %1 : i32 to index
    %c256 = arith.constant 256 : index
    %241 = vector.load %arg3[%240, %c256] : memref<2x768xf32, #tpu.memory_space<vmem>>, vector<2x256xf32>
    %c9 = arith.constant 9 : index
    %242 = memref.load %arg1[%c9] : memref<162xf32, #tpu.memory_space<smem>>
    %243 = vector.broadcast %242 : f32 to vector<2x256xf32>
    %244 = arith.mulf %243, %241 : vector<2x256xf32>
    %245 = arith.addf %219, %244 : vector<2x256xf32>
    %c36 = arith.constant 36 : index
    %246 = memref.load %arg1[%c36] : memref<162xf32, #tpu.memory_space<smem>>
    %247 = vector.broadcast %246 : f32 to vector<2x256xf32>
    %248 = arith.mulf %247, %241 : vector<2x256xf32>
    %249 = arith.addf %223, %248 : vector<2x256xf32>
    %c63 = arith.constant 63 : index
    %250 = memref.load %arg1[%c63] : memref<162xf32, #tpu.memory_space<smem>>
    %251 = vector.broadcast %250 : f32 to vector<2x256xf32>
    %252 = arith.mulf %251, %241 : vector<2x256xf32>
    %253 = arith.addf %227, %252 : vector<2x256xf32>
    %c90 = arith.constant 90 : index
    %254 = memref.load %arg1[%c90] : memref<162xf32, #tpu.memory_space<smem>>
    %255 = vector.broadcast %254 : f32 to vector<2x256xf32>
    %256 = arith.mulf %255, %241 : vector<2x256xf32>
    %257 = arith.addf %231, %256 : vector<2x256xf32>
    %c117 = arith.constant 117 : index
    %258 = memref.load %arg1[%c117] : memref<162xf32, #tpu.memory_space<smem>>
    %259 = vector.broadcast %258 : f32 to vector<2x256xf32>
    %260 = arith.mulf %259, %241 : vector<2x256xf32>
    %261 = arith.addf %235, %260 : vector<2x256xf32>
    %c144 = arith.constant 144 : index
    %262 = memref.load %arg1[%c144] : memref<162xf32, #tpu.memory_space<smem>>
    %263 = vector.broadcast %262 : f32 to vector<2x256xf32>
    %264 = arith.mulf %263, %241 : vector<2x256xf32>
    %265 = arith.addf %239, %264 : vector<2x256xf32>
    %c255_i32_7 = arith.constant 255 : i32
    %266 = tpu.dynamic_rotate %241 by %c255_i32_7 dim 1 : vector<2x256xf32>, i32 -> vector<2x256xf32>
    %c10 = arith.constant 10 : index
    %267 = memref.load %arg1[%c10] : memref<162xf32, #tpu.memory_space<smem>>
    %268 = vector.broadcast %267 : f32 to vector<2x256xf32>
    %269 = arith.mulf %268, %266 : vector<2x256xf32>
    %270 = arith.addf %245, %269 : vector<2x256xf32>
    %c37 = arith.constant 37 : index
    %271 = memref.load %arg1[%c37] : memref<162xf32, #tpu.memory_space<smem>>
    %272 = vector.broadcast %271 : f32 to vector<2x256xf32>
    %273 = arith.mulf %272, %266 : vector<2x256xf32>
    %274 = arith.addf %249, %273 : vector<2x256xf32>
    %c64 = arith.constant 64 : index
    %275 = memref.load %arg1[%c64] : memref<162xf32, #tpu.memory_space<smem>>
    %276 = vector.broadcast %275 : f32 to vector<2x256xf32>
    %277 = arith.mulf %276, %266 : vector<2x256xf32>
    %278 = arith.addf %253, %277 : vector<2x256xf32>
    %c91 = arith.constant 91 : index
    %279 = memref.load %arg1[%c91] : memref<162xf32, #tpu.memory_space<smem>>
    %280 = vector.broadcast %279 : f32 to vector<2x256xf32>
    %281 = arith.mulf %280, %266 : vector<2x256xf32>
    %282 = arith.addf %257, %281 : vector<2x256xf32>
    %c118 = arith.constant 118 : index
    %283 = memref.load %arg1[%c118] : memref<162xf32, #tpu.memory_space<smem>>
    %284 = vector.broadcast %283 : f32 to vector<2x256xf32>
    %285 = arith.mulf %284, %266 : vector<2x256xf32>
    %286 = arith.addf %261, %285 : vector<2x256xf32>
    %c145 = arith.constant 145 : index
    %287 = memref.load %arg1[%c145] : memref<162xf32, #tpu.memory_space<smem>>
    %288 = vector.broadcast %287 : f32 to vector<2x256xf32>
    %289 = arith.mulf %288, %266 : vector<2x256xf32>
    %290 = arith.addf %265, %289 : vector<2x256xf32>
    %c254_i32_8 = arith.constant 254 : i32
    %291 = tpu.dynamic_rotate %241 by %c254_i32_8 dim 1 : vector<2x256xf32>, i32 -> vector<2x256xf32>
    %c11 = arith.constant 11 : index
    %292 = memref.load %arg1[%c11] : memref<162xf32, #tpu.memory_space<smem>>
    %293 = vector.broadcast %292 : f32 to vector<2x256xf32>
    %294 = arith.mulf %293, %291 : vector<2x256xf32>
    %295 = arith.addf %270, %294 : vector<2x256xf32>
    %c38 = arith.constant 38 : index
    %296 = memref.load %arg1[%c38] : memref<162xf32, #tpu.memory_space<smem>>
    %297 = vector.broadcast %296 : f32 to vector<2x256xf32>
    %298 = arith.mulf %297, %291 : vector<2x256xf32>
    %299 = arith.addf %274, %298 : vector<2x256xf32>
    %c65 = arith.constant 65 : index
    %300 = memref.load %arg1[%c65] : memref<162xf32, #tpu.memory_space<smem>>
    %301 = vector.broadcast %300 : f32 to vector<2x256xf32>
    %302 = arith.mulf %301, %291 : vector<2x256xf32>
    %303 = arith.addf %278, %302 : vector<2x256xf32>
    %c92 = arith.constant 92 : index
    %304 = memref.load %arg1[%c92] : memref<162xf32, #tpu.memory_space<smem>>
    %305 = vector.broadcast %304 : f32 to vector<2x256xf32>
    %306 = arith.mulf %305, %291 : vector<2x256xf32>
    %307 = arith.addf %282, %306 : vector<2x256xf32>
    %c119 = arith.constant 119 : index
    %308 = memref.load %arg1[%c119] : memref<162xf32, #tpu.memory_space<smem>>
    %309 = vector.broadcast %308 : f32 to vector<2x256xf32>
    %310 = arith.mulf %309, %291 : vector<2x256xf32>
    %311 = arith.addf %286, %310 : vector<2x256xf32>
    %c146 = arith.constant 146 : index
    %312 = memref.load %arg1[%c146] : memref<162xf32, #tpu.memory_space<smem>>
    %313 = vector.broadcast %312 : f32 to vector<2x256xf32>
    %314 = arith.mulf %313, %291 : vector<2x256xf32>
    %315 = arith.addf %290, %314 : vector<2x256xf32>
    %c240_i32_9 = arith.constant 240 : i32
    %316 = tpu.dynamic_rotate %241 by %c240_i32_9 dim 1 : vector<2x256xf32>, i32 -> vector<2x256xf32>
    %c12 = arith.constant 12 : index
    %317 = memref.load %arg1[%c12] : memref<162xf32, #tpu.memory_space<smem>>
    %318 = vector.broadcast %317 : f32 to vector<2x256xf32>
    %319 = arith.mulf %318, %316 : vector<2x256xf32>
    %320 = arith.addf %295, %319 : vector<2x256xf32>
    %c39 = arith.constant 39 : index
    %321 = memref.load %arg1[%c39] : memref<162xf32, #tpu.memory_space<smem>>
    %322 = vector.broadcast %321 : f32 to vector<2x256xf32>
    %323 = arith.mulf %322, %316 : vector<2x256xf32>
    %324 = arith.addf %299, %323 : vector<2x256xf32>
    %c66 = arith.constant 66 : index
    %325 = memref.load %arg1[%c66] : memref<162xf32, #tpu.memory_space<smem>>
    %326 = vector.broadcast %325 : f32 to vector<2x256xf32>
    %327 = arith.mulf %326, %316 : vector<2x256xf32>
    %328 = arith.addf %303, %327 : vector<2x256xf32>
    %c93 = arith.constant 93 : index
    %329 = memref.load %arg1[%c93] : memref<162xf32, #tpu.memory_space<smem>>
    %330 = vector.broadcast %329 : f32 to vector<2x256xf32>
    %331 = arith.mulf %330, %316 : vector<2x256xf32>
    %332 = arith.addf %307, %331 : vector<2x256xf32>
    %c120 = arith.constant 120 : index
    %333 = memref.load %arg1[%c120] : memref<162xf32, #tpu.memory_space<smem>>
    %334 = vector.broadcast %333 : f32 to vector<2x256xf32>
    %335 = arith.mulf %334, %316 : vector<2x256xf32>
    %336 = arith.addf %311, %335 : vector<2x256xf32>
    %c147 = arith.constant 147 : index
    %337 = memref.load %arg1[%c147] : memref<162xf32, #tpu.memory_space<smem>>
    %338 = vector.broadcast %337 : f32 to vector<2x256xf32>
    %339 = arith.mulf %338, %316 : vector<2x256xf32>
    %340 = arith.addf %315, %339 : vector<2x256xf32>
    %c239_i32_10 = arith.constant 239 : i32
    %341 = tpu.dynamic_rotate %241 by %c239_i32_10 dim 1 : vector<2x256xf32>, i32 -> vector<2x256xf32>
    %c13 = arith.constant 13 : index
    %342 = memref.load %arg1[%c13] : memref<162xf32, #tpu.memory_space<smem>>
    %343 = vector.broadcast %342 : f32 to vector<2x256xf32>
    %344 = arith.mulf %343, %341 : vector<2x256xf32>
    %345 = arith.addf %320, %344 : vector<2x256xf32>
    %c40 = arith.constant 40 : index
    %346 = memref.load %arg1[%c40] : memref<162xf32, #tpu.memory_space<smem>>
    %347 = vector.broadcast %346 : f32 to vector<2x256xf32>
    %348 = arith.mulf %347, %341 : vector<2x256xf32>
    %349 = arith.addf %324, %348 : vector<2x256xf32>
    %c67 = arith.constant 67 : index
    %350 = memref.load %arg1[%c67] : memref<162xf32, #tpu.memory_space<smem>>
    %351 = vector.broadcast %350 : f32 to vector<2x256xf32>
    %352 = arith.mulf %351, %341 : vector<2x256xf32>
    %353 = arith.addf %328, %352 : vector<2x256xf32>
    %c94 = arith.constant 94 : index
    %354 = memref.load %arg1[%c94] : memref<162xf32, #tpu.memory_space<smem>>
    %355 = vector.broadcast %354 : f32 to vector<2x256xf32>
    %356 = arith.mulf %355, %341 : vector<2x256xf32>
    %357 = arith.addf %332, %356 : vector<2x256xf32>
    %c121 = arith.constant 121 : index
    %358 = memref.load %arg1[%c121] : memref<162xf32, #tpu.memory_space<smem>>
    %359 = vector.broadcast %358 : f32 to vector<2x256xf32>
    %360 = arith.mulf %359, %341 : vector<2x256xf32>
    %361 = arith.addf %336, %360 : vector<2x256xf32>
    %c148 = arith.constant 148 : index
    %362 = memref.load %arg1[%c148] : memref<162xf32, #tpu.memory_space<smem>>
    %363 = vector.broadcast %362 : f32 to vector<2x256xf32>
    %364 = arith.mulf %363, %341 : vector<2x256xf32>
    %365 = arith.addf %340, %364 : vector<2x256xf32>
    %c238_i32_11 = arith.constant 238 : i32
    %366 = tpu.dynamic_rotate %241 by %c238_i32_11 dim 1 : vector<2x256xf32>, i32 -> vector<2x256xf32>
    %c14 = arith.constant 14 : index
    %367 = memref.load %arg1[%c14] : memref<162xf32, #tpu.memory_space<smem>>
    %368 = vector.broadcast %367 : f32 to vector<2x256xf32>
    %369 = arith.mulf %368, %366 : vector<2x256xf32>
    %370 = arith.addf %345, %369 : vector<2x256xf32>
    %c41 = arith.constant 41 : index
    %371 = memref.load %arg1[%c41] : memref<162xf32, #tpu.memory_space<smem>>
    %372 = vector.broadcast %371 : f32 to vector<2x256xf32>
    %373 = arith.mulf %372, %366 : vector<2x256xf32>
    %374 = arith.addf %349, %373 : vector<2x256xf32>
    %c68 = arith.constant 68 : index
    %375 = memref.load %arg1[%c68] : memref<162xf32, #tpu.memory_space<smem>>
    %376 = vector.broadcast %375 : f32 to vector<2x256xf32>
    %377 = arith.mulf %376, %366 : vector<2x256xf32>
    %378 = arith.addf %353, %377 : vector<2x256xf32>
    %c95 = arith.constant 95 : index
    %379 = memref.load %arg1[%c95] : memref<162xf32, #tpu.memory_space<smem>>
    %380 = vector.broadcast %379 : f32 to vector<2x256xf32>
    %381 = arith.mulf %380, %366 : vector<2x256xf32>
    %382 = arith.addf %357, %381 : vector<2x256xf32>
    %c122 = arith.constant 122 : index
    %383 = memref.load %arg1[%c122] : memref<162xf32, #tpu.memory_space<smem>>
    %384 = vector.broadcast %383 : f32 to vector<2x256xf32>
    %385 = arith.mulf %384, %366 : vector<2x256xf32>
    %386 = arith.addf %361, %385 : vector<2x256xf32>
    %c149 = arith.constant 149 : index
    %387 = memref.load %arg1[%c149] : memref<162xf32, #tpu.memory_space<smem>>
    %388 = vector.broadcast %387 : f32 to vector<2x256xf32>
    %389 = arith.mulf %388, %366 : vector<2x256xf32>
    %390 = arith.addf %365, %389 : vector<2x256xf32>
    %c224_i32_12 = arith.constant 224 : i32
    %391 = tpu.dynamic_rotate %241 by %c224_i32_12 dim 1 : vector<2x256xf32>, i32 -> vector<2x256xf32>
    %c15 = arith.constant 15 : index
    %392 = memref.load %arg1[%c15] : memref<162xf32, #tpu.memory_space<smem>>
    %393 = vector.broadcast %392 : f32 to vector<2x256xf32>
    %394 = arith.mulf %393, %391 : vector<2x256xf32>
    %395 = arith.addf %370, %394 : vector<2x256xf32>
    %c42 = arith.constant 42 : index
    %396 = memref.load %arg1[%c42] : memref<162xf32, #tpu.memory_space<smem>>
    %397 = vector.broadcast %396 : f32 to vector<2x256xf32>
    %398 = arith.mulf %397, %391 : vector<2x256xf32>
    %399 = arith.addf %374, %398 : vector<2x256xf32>
    %c69 = arith.constant 69 : index
    %400 = memref.load %arg1[%c69] : memref<162xf32, #tpu.memory_space<smem>>
    %401 = vector.broadcast %400 : f32 to vector<2x256xf32>
    %402 = arith.mulf %401, %391 : vector<2x256xf32>
    %403 = arith.addf %378, %402 : vector<2x256xf32>
    %c96 = arith.constant 96 : index
    %404 = memref.load %arg1[%c96] : memref<162xf32, #tpu.memory_space<smem>>
    %405 = vector.broadcast %404 : f32 to vector<2x256xf32>
    %406 = arith.mulf %405, %391 : vector<2x256xf32>
    %407 = arith.addf %382, %406 : vector<2x256xf32>
    %c123 = arith.constant 123 : index
    %408 = memref.load %arg1[%c123] : memref<162xf32, #tpu.memory_space<smem>>
    %409 = vector.broadcast %408 : f32 to vector<2x256xf32>
    %410 = arith.mulf %409, %391 : vector<2x256xf32>
    %411 = arith.addf %386, %410 : vector<2x256xf32>
    %c150 = arith.constant 150 : index
    %412 = memref.load %arg1[%c150] : memref<162xf32, #tpu.memory_space<smem>>
    %413 = vector.broadcast %412 : f32 to vector<2x256xf32>
    %414 = arith.mulf %413, %391 : vector<2x256xf32>
    %415 = arith.addf %390, %414 : vector<2x256xf32>
    %c223_i32_13 = arith.constant 223 : i32
    %416 = tpu.dynamic_rotate %241 by %c223_i32_13 dim 1 : vector<2x256xf32>, i32 -> vector<2x256xf32>
    %c16 = arith.constant 16 : index
    %417 = memref.load %arg1[%c16] : memref<162xf32, #tpu.memory_space<smem>>
    %418 = vector.broadcast %417 : f32 to vector<2x256xf32>
    %419 = arith.mulf %418, %416 : vector<2x256xf32>
    %420 = arith.addf %395, %419 : vector<2x256xf32>
    %c43 = arith.constant 43 : index
    %421 = memref.load %arg1[%c43] : memref<162xf32, #tpu.memory_space<smem>>
    %422 = vector.broadcast %421 : f32 to vector<2x256xf32>
    %423 = arith.mulf %422, %416 : vector<2x256xf32>
    %424 = arith.addf %399, %423 : vector<2x256xf32>
    %c70 = arith.constant 70 : index
    %425 = memref.load %arg1[%c70] : memref<162xf32, #tpu.memory_space<smem>>
    %426 = vector.broadcast %425 : f32 to vector<2x256xf32>
    %427 = arith.mulf %426, %416 : vector<2x256xf32>
    %428 = arith.addf %403, %427 : vector<2x256xf32>
    %c97 = arith.constant 97 : index
    %429 = memref.load %arg1[%c97] : memref<162xf32, #tpu.memory_space<smem>>
    %430 = vector.broadcast %429 : f32 to vector<2x256xf32>
    %431 = arith.mulf %430, %416 : vector<2x256xf32>
    %432 = arith.addf %407, %431 : vector<2x256xf32>
    %c124 = arith.constant 124 : index
    %433 = memref.load %arg1[%c124] : memref<162xf32, #tpu.memory_space<smem>>
    %434 = vector.broadcast %433 : f32 to vector<2x256xf32>
    %435 = arith.mulf %434, %416 : vector<2x256xf32>
    %436 = arith.addf %411, %435 : vector<2x256xf32>
    %c151 = arith.constant 151 : index
    %437 = memref.load %arg1[%c151] : memref<162xf32, #tpu.memory_space<smem>>
    %438 = vector.broadcast %437 : f32 to vector<2x256xf32>
    %439 = arith.mulf %438, %416 : vector<2x256xf32>
    %440 = arith.addf %415, %439 : vector<2x256xf32>
    %c222_i32_14 = arith.constant 222 : i32
    %441 = tpu.dynamic_rotate %241 by %c222_i32_14 dim 1 : vector<2x256xf32>, i32 -> vector<2x256xf32>
    %c17 = arith.constant 17 : index
    %442 = memref.load %arg1[%c17] : memref<162xf32, #tpu.memory_space<smem>>
    %443 = vector.broadcast %442 : f32 to vector<2x256xf32>
    %444 = arith.mulf %443, %441 : vector<2x256xf32>
    %445 = arith.addf %420, %444 : vector<2x256xf32>
    %c44 = arith.constant 44 : index
    %446 = memref.load %arg1[%c44] : memref<162xf32, #tpu.memory_space<smem>>
    %447 = vector.broadcast %446 : f32 to vector<2x256xf32>
    %448 = arith.mulf %447, %441 : vector<2x256xf32>
    %449 = arith.addf %424, %448 : vector<2x256xf32>
    %c71 = arith.constant 71 : index
    %450 = memref.load %arg1[%c71] : memref<162xf32, #tpu.memory_space<smem>>
    %451 = vector.broadcast %450 : f32 to vector<2x256xf32>
    %452 = arith.mulf %451, %441 : vector<2x256xf32>
    %453 = arith.addf %428, %452 : vector<2x256xf32>
    %c98 = arith.constant 98 : index
    %454 = memref.load %arg1[%c98] : memref<162xf32, #tpu.memory_space<smem>>
    %455 = vector.broadcast %454 : f32 to vector<2x256xf32>
    %456 = arith.mulf %455, %441 : vector<2x256xf32>
    %457 = arith.addf %432, %456 : vector<2x256xf32>
    %c125 = arith.constant 125 : index
    %458 = memref.load %arg1[%c125] : memref<162xf32, #tpu.memory_space<smem>>
    %459 = vector.broadcast %458 : f32 to vector<2x256xf32>
    %460 = arith.mulf %459, %441 : vector<2x256xf32>
    %461 = arith.addf %436, %460 : vector<2x256xf32>
    %c152 = arith.constant 152 : index
    %462 = memref.load %arg1[%c152] : memref<162xf32, #tpu.memory_space<smem>>
    %463 = vector.broadcast %462 : f32 to vector<2x256xf32>
    %464 = arith.mulf %463, %441 : vector<2x256xf32>
    %465 = arith.addf %440, %464 : vector<2x256xf32>
    %466 = arith.index_cast %1 : i32 to index
    %c512 = arith.constant 512 : index
    %467 = vector.load %arg3[%466, %c512] : memref<2x768xf32, #tpu.memory_space<vmem>>, vector<2x256xf32>
    %c18 = arith.constant 18 : index
    %468 = memref.load %arg1[%c18] : memref<162xf32, #tpu.memory_space<smem>>
    %469 = vector.broadcast %468 : f32 to vector<2x256xf32>
    %470 = arith.mulf %469, %467 : vector<2x256xf32>
    %471 = arith.addf %445, %470 : vector<2x256xf32>
    %c45 = arith.constant 45 : index
    %472 = memref.load %arg1[%c45] : memref<162xf32, #tpu.memory_space<smem>>
    %473 = vector.broadcast %472 : f32 to vector<2x256xf32>
    %474 = arith.mulf %473, %467 : vector<2x256xf32>
    %475 = arith.addf %449, %474 : vector<2x256xf32>
    %c72 = arith.constant 72 : index
    %476 = memref.load %arg1[%c72] : memref<162xf32, #tpu.memory_space<smem>>
    %477 = vector.broadcast %476 : f32 to vector<2x256xf32>
    %478 = arith.mulf %477, %467 : vector<2x256xf32>
    %479 = arith.addf %453, %478 : vector<2x256xf32>
    %c99 = arith.constant 99 : index
    %480 = memref.load %arg1[%c99] : memref<162xf32, #tpu.memory_space<smem>>
    %481 = vector.broadcast %480 : f32 to vector<2x256xf32>
    %482 = arith.mulf %481, %467 : vector<2x256xf32>
    %483 = arith.addf %457, %482 : vector<2x256xf32>
    %c126 = arith.constant 126 : index
    %484 = memref.load %arg1[%c126] : memref<162xf32, #tpu.memory_space<smem>>
    %485 = vector.broadcast %484 : f32 to vector<2x256xf32>
    %486 = arith.mulf %485, %467 : vector<2x256xf32>
    %487 = arith.addf %461, %486 : vector<2x256xf32>
    %c153 = arith.constant 153 : index
    %488 = memref.load %arg1[%c153] : memref<162xf32, #tpu.memory_space<smem>>
    %489 = vector.broadcast %488 : f32 to vector<2x256xf32>
    %490 = arith.mulf %489, %467 : vector<2x256xf32>
    %491 = arith.addf %465, %490 : vector<2x256xf32>
    %c255_i32_15 = arith.constant 255 : i32
    %492 = tpu.dynamic_rotate %467 by %c255_i32_15 dim 1 : vector<2x256xf32>, i32 -> vector<2x256xf32>
    %c19 = arith.constant 19 : index
    %493 = memref.load %arg1[%c19] : memref<162xf32, #tpu.memory_space<smem>>
    %494 = vector.broadcast %493 : f32 to vector<2x256xf32>
    %495 = arith.mulf %494, %492 : vector<2x256xf32>
    %496 = arith.addf %471, %495 : vector<2x256xf32>
    %c46 = arith.constant 46 : index
    %497 = memref.load %arg1[%c46] : memref<162xf32, #tpu.memory_space<smem>>
    %498 = vector.broadcast %497 : f32 to vector<2x256xf32>
    %499 = arith.mulf %498, %492 : vector<2x256xf32>
    %500 = arith.addf %475, %499 : vector<2x256xf32>
    %c73 = arith.constant 73 : index
    %501 = memref.load %arg1[%c73] : memref<162xf32, #tpu.memory_space<smem>>
    %502 = vector.broadcast %501 : f32 to vector<2x256xf32>
    %503 = arith.mulf %502, %492 : vector<2x256xf32>
    %504 = arith.addf %479, %503 : vector<2x256xf32>
    %c100 = arith.constant 100 : index
    %505 = memref.load %arg1[%c100] : memref<162xf32, #tpu.memory_space<smem>>
    %506 = vector.broadcast %505 : f32 to vector<2x256xf32>
    %507 = arith.mulf %506, %492 : vector<2x256xf32>
    %508 = arith.addf %483, %507 : vector<2x256xf32>
    %c127 = arith.constant 127 : index
    %509 = memref.load %arg1[%c127] : memref<162xf32, #tpu.memory_space<smem>>
    %510 = vector.broadcast %509 : f32 to vector<2x256xf32>
    %511 = arith.mulf %510, %492 : vector<2x256xf32>
    %512 = arith.addf %487, %511 : vector<2x256xf32>
    %c154 = arith.constant 154 : index
    %513 = memref.load %arg1[%c154] : memref<162xf32, #tpu.memory_space<smem>>
    %514 = vector.broadcast %513 : f32 to vector<2x256xf32>
    %515 = arith.mulf %514, %492 : vector<2x256xf32>
    %516 = arith.addf %491, %515 : vector<2x256xf32>
    %c254_i32_16 = arith.constant 254 : i32
    %517 = tpu.dynamic_rotate %467 by %c254_i32_16 dim 1 : vector<2x256xf32>, i32 -> vector<2x256xf32>
    %c20 = arith.constant 20 : index
    %518 = memref.load %arg1[%c20] : memref<162xf32, #tpu.memory_space<smem>>
    %519 = vector.broadcast %518 : f32 to vector<2x256xf32>
    %520 = arith.mulf %519, %517 : vector<2x256xf32>
    %521 = arith.addf %496, %520 : vector<2x256xf32>
    %c47 = arith.constant 47 : index
    %522 = memref.load %arg1[%c47] : memref<162xf32, #tpu.memory_space<smem>>
    %523 = vector.broadcast %522 : f32 to vector<2x256xf32>
    %524 = arith.mulf %523, %517 : vector<2x256xf32>
    %525 = arith.addf %500, %524 : vector<2x256xf32>
    %c74 = arith.constant 74 : index
    %526 = memref.load %arg1[%c74] : memref<162xf32, #tpu.memory_space<smem>>
    %527 = vector.broadcast %526 : f32 to vector<2x256xf32>
    %528 = arith.mulf %527, %517 : vector<2x256xf32>
    %529 = arith.addf %504, %528 : vector<2x256xf32>
    %c101 = arith.constant 101 : index
    %530 = memref.load %arg1[%c101] : memref<162xf32, #tpu.memory_space<smem>>
    %531 = vector.broadcast %530 : f32 to vector<2x256xf32>
    %532 = arith.mulf %531, %517 : vector<2x256xf32>
    %533 = arith.addf %508, %532 : vector<2x256xf32>
    %c128 = arith.constant 128 : index
    %534 = memref.load %arg1[%c128] : memref<162xf32, #tpu.memory_space<smem>>
    %535 = vector.broadcast %534 : f32 to vector<2x256xf32>
    %536 = arith.mulf %535, %517 : vector<2x256xf32>
    %537 = arith.addf %512, %536 : vector<2x256xf32>
    %c155 = arith.constant 155 : index
    %538 = memref.load %arg1[%c155] : memref<162xf32, #tpu.memory_space<smem>>
    %539 = vector.broadcast %538 : f32 to vector<2x256xf32>
    %540 = arith.mulf %539, %517 : vector<2x256xf32>
    %541 = arith.addf %516, %540 : vector<2x256xf32>
    %c240_i32_17 = arith.constant 240 : i32
    %542 = tpu.dynamic_rotate %467 by %c240_i32_17 dim 1 : vector<2x256xf32>, i32 -> vector<2x256xf32>
    %c21 = arith.constant 21 : index
    %543 = memref.load %arg1[%c21] : memref<162xf32, #tpu.memory_space<smem>>
    %544 = vector.broadcast %543 : f32 to vector<2x256xf32>
    %545 = arith.mulf %544, %542 : vector<2x256xf32>
    %546 = arith.addf %521, %545 : vector<2x256xf32>
    %c48 = arith.constant 48 : index
    %547 = memref.load %arg1[%c48] : memref<162xf32, #tpu.memory_space<smem>>
    %548 = vector.broadcast %547 : f32 to vector<2x256xf32>
    %549 = arith.mulf %548, %542 : vector<2x256xf32>
    %550 = arith.addf %525, %549 : vector<2x256xf32>
    %c75 = arith.constant 75 : index
    %551 = memref.load %arg1[%c75] : memref<162xf32, #tpu.memory_space<smem>>
    %552 = vector.broadcast %551 : f32 to vector<2x256xf32>
    %553 = arith.mulf %552, %542 : vector<2x256xf32>
    %554 = arith.addf %529, %553 : vector<2x256xf32>
    %c102 = arith.constant 102 : index
    %555 = memref.load %arg1[%c102] : memref<162xf32, #tpu.memory_space<smem>>
    %556 = vector.broadcast %555 : f32 to vector<2x256xf32>
    %557 = arith.mulf %556, %542 : vector<2x256xf32>
    %558 = arith.addf %533, %557 : vector<2x256xf32>
    %c129 = arith.constant 129 : index
    %559 = memref.load %arg1[%c129] : memref<162xf32, #tpu.memory_space<smem>>
    %560 = vector.broadcast %559 : f32 to vector<2x256xf32>
    %561 = arith.mulf %560, %542 : vector<2x256xf32>
    %562 = arith.addf %537, %561 : vector<2x256xf32>
    %c156 = arith.constant 156 : index
    %563 = memref.load %arg1[%c156] : memref<162xf32, #tpu.memory_space<smem>>
    %564 = vector.broadcast %563 : f32 to vector<2x256xf32>
    %565 = arith.mulf %564, %542 : vector<2x256xf32>
    %566 = arith.addf %541, %565 : vector<2x256xf32>
    %c239_i32_18 = arith.constant 239 : i32
    %567 = tpu.dynamic_rotate %467 by %c239_i32_18 dim 1 : vector<2x256xf32>, i32 -> vector<2x256xf32>
    %c22 = arith.constant 22 : index
    %568 = memref.load %arg1[%c22] : memref<162xf32, #tpu.memory_space<smem>>
    %569 = vector.broadcast %568 : f32 to vector<2x256xf32>
    %570 = arith.mulf %569, %567 : vector<2x256xf32>
    %571 = arith.addf %546, %570 : vector<2x256xf32>
    %c49 = arith.constant 49 : index
    %572 = memref.load %arg1[%c49] : memref<162xf32, #tpu.memory_space<smem>>
    %573 = vector.broadcast %572 : f32 to vector<2x256xf32>
    %574 = arith.mulf %573, %567 : vector<2x256xf32>
    %575 = arith.addf %550, %574 : vector<2x256xf32>
    %c76 = arith.constant 76 : index
    %576 = memref.load %arg1[%c76] : memref<162xf32, #tpu.memory_space<smem>>
    %577 = vector.broadcast %576 : f32 to vector<2x256xf32>
    %578 = arith.mulf %577, %567 : vector<2x256xf32>
    %579 = arith.addf %554, %578 : vector<2x256xf32>
    %c103 = arith.constant 103 : index
    %580 = memref.load %arg1[%c103] : memref<162xf32, #tpu.memory_space<smem>>
    %581 = vector.broadcast %580 : f32 to vector<2x256xf32>
    %582 = arith.mulf %581, %567 : vector<2x256xf32>
    %583 = arith.addf %558, %582 : vector<2x256xf32>
    %c130 = arith.constant 130 : index
    %584 = memref.load %arg1[%c130] : memref<162xf32, #tpu.memory_space<smem>>
    %585 = vector.broadcast %584 : f32 to vector<2x256xf32>
    %586 = arith.mulf %585, %567 : vector<2x256xf32>
    %587 = arith.addf %562, %586 : vector<2x256xf32>
    %c157 = arith.constant 157 : index
    %588 = memref.load %arg1[%c157] : memref<162xf32, #tpu.memory_space<smem>>
    %589 = vector.broadcast %588 : f32 to vector<2x256xf32>
    %590 = arith.mulf %589, %567 : vector<2x256xf32>
    %591 = arith.addf %566, %590 : vector<2x256xf32>
    %c238_i32_19 = arith.constant 238 : i32
    %592 = tpu.dynamic_rotate %467 by %c238_i32_19 dim 1 : vector<2x256xf32>, i32 -> vector<2x256xf32>
    %c23 = arith.constant 23 : index
    %593 = memref.load %arg1[%c23] : memref<162xf32, #tpu.memory_space<smem>>
    %594 = vector.broadcast %593 : f32 to vector<2x256xf32>
    %595 = arith.mulf %594, %592 : vector<2x256xf32>
    %596 = arith.addf %571, %595 : vector<2x256xf32>
    %c50 = arith.constant 50 : index
    %597 = memref.load %arg1[%c50] : memref<162xf32, #tpu.memory_space<smem>>
    %598 = vector.broadcast %597 : f32 to vector<2x256xf32>
    %599 = arith.mulf %598, %592 : vector<2x256xf32>
    %600 = arith.addf %575, %599 : vector<2x256xf32>
    %c77 = arith.constant 77 : index
    %601 = memref.load %arg1[%c77] : memref<162xf32, #tpu.memory_space<smem>>
    %602 = vector.broadcast %601 : f32 to vector<2x256xf32>
    %603 = arith.mulf %602, %592 : vector<2x256xf32>
    %604 = arith.addf %579, %603 : vector<2x256xf32>
    %c104 = arith.constant 104 : index
    %605 = memref.load %arg1[%c104] : memref<162xf32, #tpu.memory_space<smem>>
    %606 = vector.broadcast %605 : f32 to vector<2x256xf32>
    %607 = arith.mulf %606, %592 : vector<2x256xf32>
    %608 = arith.addf %583, %607 : vector<2x256xf32>
    %c131 = arith.constant 131 : index
    %609 = memref.load %arg1[%c131] : memref<162xf32, #tpu.memory_space<smem>>
    %610 = vector.broadcast %609 : f32 to vector<2x256xf32>
    %611 = arith.mulf %610, %592 : vector<2x256xf32>
    %612 = arith.addf %587, %611 : vector<2x256xf32>
    %c158 = arith.constant 158 : index
    %613 = memref.load %arg1[%c158] : memref<162xf32, #tpu.memory_space<smem>>
    %614 = vector.broadcast %613 : f32 to vector<2x256xf32>
    %615 = arith.mulf %614, %592 : vector<2x256xf32>
    %616 = arith.addf %591, %615 : vector<2x256xf32>
    %c224_i32_20 = arith.constant 224 : i32
    %617 = tpu.dynamic_rotate %467 by %c224_i32_20 dim 1 : vector<2x256xf32>, i32 -> vector<2x256xf32>
    %c24 = arith.constant 24 : index
    %618 = memref.load %arg1[%c24] : memref<162xf32, #tpu.memory_space<smem>>
    %619 = vector.broadcast %618 : f32 to vector<2x256xf32>
    %620 = arith.mulf %619, %617 : vector<2x256xf32>
    %621 = arith.addf %596, %620 : vector<2x256xf32>
    %c51 = arith.constant 51 : index
    %622 = memref.load %arg1[%c51] : memref<162xf32, #tpu.memory_space<smem>>
    %623 = vector.broadcast %622 : f32 to vector<2x256xf32>
    %624 = arith.mulf %623, %617 : vector<2x256xf32>
    %625 = arith.addf %600, %624 : vector<2x256xf32>
    %c78 = arith.constant 78 : index
    %626 = memref.load %arg1[%c78] : memref<162xf32, #tpu.memory_space<smem>>
    %627 = vector.broadcast %626 : f32 to vector<2x256xf32>
    %628 = arith.mulf %627, %617 : vector<2x256xf32>
    %629 = arith.addf %604, %628 : vector<2x256xf32>
    %c105 = arith.constant 105 : index
    %630 = memref.load %arg1[%c105] : memref<162xf32, #tpu.memory_space<smem>>
    %631 = vector.broadcast %630 : f32 to vector<2x256xf32>
    %632 = arith.mulf %631, %617 : vector<2x256xf32>
    %633 = arith.addf %608, %632 : vector<2x256xf32>
    %c132 = arith.constant 132 : index
    %634 = memref.load %arg1[%c132] : memref<162xf32, #tpu.memory_space<smem>>
    %635 = vector.broadcast %634 : f32 to vector<2x256xf32>
    %636 = arith.mulf %635, %617 : vector<2x256xf32>
    %637 = arith.addf %612, %636 : vector<2x256xf32>
    %c159 = arith.constant 159 : index
    %638 = memref.load %arg1[%c159] : memref<162xf32, #tpu.memory_space<smem>>
    %639 = vector.broadcast %638 : f32 to vector<2x256xf32>
    %640 = arith.mulf %639, %617 : vector<2x256xf32>
    %641 = arith.addf %616, %640 : vector<2x256xf32>
    %c223_i32_21 = arith.constant 223 : i32
    %642 = tpu.dynamic_rotate %467 by %c223_i32_21 dim 1 : vector<2x256xf32>, i32 -> vector<2x256xf32>
    %c25 = arith.constant 25 : index
    %643 = memref.load %arg1[%c25] : memref<162xf32, #tpu.memory_space<smem>>
    %644 = vector.broadcast %643 : f32 to vector<2x256xf32>
    %645 = arith.mulf %644, %642 : vector<2x256xf32>
    %646 = arith.addf %621, %645 : vector<2x256xf32>
    %c52 = arith.constant 52 : index
    %647 = memref.load %arg1[%c52] : memref<162xf32, #tpu.memory_space<smem>>
    %648 = vector.broadcast %647 : f32 to vector<2x256xf32>
    %649 = arith.mulf %648, %642 : vector<2x256xf32>
    %650 = arith.addf %625, %649 : vector<2x256xf32>
    %c79 = arith.constant 79 : index
    %651 = memref.load %arg1[%c79] : memref<162xf32, #tpu.memory_space<smem>>
    %652 = vector.broadcast %651 : f32 to vector<2x256xf32>
    %653 = arith.mulf %652, %642 : vector<2x256xf32>
    %654 = arith.addf %629, %653 : vector<2x256xf32>
    %c106 = arith.constant 106 : index
    %655 = memref.load %arg1[%c106] : memref<162xf32, #tpu.memory_space<smem>>
    %656 = vector.broadcast %655 : f32 to vector<2x256xf32>
    %657 = arith.mulf %656, %642 : vector<2x256xf32>
    %658 = arith.addf %633, %657 : vector<2x256xf32>
    %c133 = arith.constant 133 : index
    %659 = memref.load %arg1[%c133] : memref<162xf32, #tpu.memory_space<smem>>
    %660 = vector.broadcast %659 : f32 to vector<2x256xf32>
    %661 = arith.mulf %660, %642 : vector<2x256xf32>
    %662 = arith.addf %637, %661 : vector<2x256xf32>
    %c160 = arith.constant 160 : index
    %663 = memref.load %arg1[%c160] : memref<162xf32, #tpu.memory_space<smem>>
    %664 = vector.broadcast %663 : f32 to vector<2x256xf32>
    %665 = arith.mulf %664, %642 : vector<2x256xf32>
    %666 = arith.addf %641, %665 : vector<2x256xf32>
    %c222_i32_22 = arith.constant 222 : i32
    %667 = tpu.dynamic_rotate %467 by %c222_i32_22 dim 1 : vector<2x256xf32>, i32 -> vector<2x256xf32>
    %c26 = arith.constant 26 : index
    %668 = memref.load %arg1[%c26] : memref<162xf32, #tpu.memory_space<smem>>
    %669 = vector.broadcast %668 : f32 to vector<2x256xf32>
    %670 = arith.mulf %669, %667 : vector<2x256xf32>
    %671 = arith.addf %646, %670 : vector<2x256xf32>
    %c53 = arith.constant 53 : index
    %672 = memref.load %arg1[%c53] : memref<162xf32, #tpu.memory_space<smem>>
    %673 = vector.broadcast %672 : f32 to vector<2x256xf32>
    %674 = arith.mulf %673, %667 : vector<2x256xf32>
    %675 = arith.addf %650, %674 : vector<2x256xf32>
    %c80 = arith.constant 80 : index
    %676 = memref.load %arg1[%c80] : memref<162xf32, #tpu.memory_space<smem>>
    %677 = vector.broadcast %676 : f32 to vector<2x256xf32>
    %678 = arith.mulf %677, %667 : vector<2x256xf32>
    %679 = arith.addf %654, %678 : vector<2x256xf32>
    %c107 = arith.constant 107 : index
    %680 = memref.load %arg1[%c107] : memref<162xf32, #tpu.memory_space<smem>>
    %681 = vector.broadcast %680 : f32 to vector<2x256xf32>
    %682 = arith.mulf %681, %667 : vector<2x256xf32>
    %683 = arith.addf %658, %682 : vector<2x256xf32>
    %c134 = arith.constant 134 : index
    %684 = memref.load %arg1[%c134] : memref<162xf32, #tpu.memory_space<smem>>
    %685 = vector.broadcast %684 : f32 to vector<2x256xf32>
    %686 = arith.mulf %685, %667 : vector<2x256xf32>
    %687 = arith.addf %662, %686 : vector<2x256xf32>
    %c161 = arith.constant 161 : index
    %688 = memref.load %arg1[%c161] : memref<162xf32, #tpu.memory_space<smem>>
    %689 = vector.broadcast %688 : f32 to vector<2x256xf32>
    %690 = arith.mulf %689, %667 : vector<2x256xf32>
    %691 = arith.addf %666, %690 : vector<2x256xf32>
    %692 = arith.index_cast %1 : i32 to index
    %c0_23 = arith.constant 0 : index
    %693 = vector.load %arg4[%692, %c0_23] : memref<2x1536xf32, #tpu.memory_space<vmem>>, vector<2x256xf32>
    tpu.vector_store %arg4[%692, %c0_23], %671 {strides = array<i32>} : memref<2x1536xf32, #tpu.memory_space<vmem>>, vector<2x256xf32>,
    %694 = arith.index_cast %1 : i32 to index
    %c256_24 = arith.constant 256 : index
    %695 = vector.load %arg4[%694, %c256_24] : memref<2x1536xf32, #tpu.memory_space<vmem>>, vector<2x256xf32>
    tpu.vector_store %arg4[%694, %c256_24], %675 {strides = array<i32>} : memref<2x1536xf32, #tpu.memory_space<vmem>>, vector<2x256xf32>,
    %696 = arith.index_cast %1 : i32 to index
    %c512_25 = arith.constant 512 : index
    %697 = vector.load %arg4[%696, %c512_25] : memref<2x1536xf32, #tpu.memory_space<vmem>>, vector<2x256xf32>
    tpu.vector_store %arg4[%696, %c512_25], %679 {strides = array<i32>} : memref<2x1536xf32, #tpu.memory_space<vmem>>, vector<2x256xf32>,
    %698 = arith.index_cast %1 : i32 to index
    %c768 = arith.constant 768 : index
    %699 = vector.load %arg4[%698, %c768] : memref<2x1536xf32, #tpu.memory_space<vmem>>, vector<2x256xf32>
    tpu.vector_store %arg4[%698, %c768], %683 {strides = array<i32>} : memref<2x1536xf32, #tpu.memory_space<vmem>>, vector<2x256xf32>,
    %700 = arith.index_cast %1 : i32 to index
    %c1024 = arith.constant 1024 : index
    %701 = vector.load %arg4[%700, %c1024] : memref<2x1536xf32, #tpu.memory_space<vmem>>, vector<2x256xf32>
    tpu.vector_store %arg4[%700, %c1024], %687 {strides = array<i32>} : memref<2x1536xf32, #tpu.memory_space<vmem>>, vector<2x256xf32>,
    %702 = arith.index_cast %1 : i32 to index
    %c1280 = arith.constant 1280 : index
    %703 = vector.load %arg4[%702, %c1280] : memref<2x1536xf32, #tpu.memory_space<vmem>>, vector<2x256xf32>
    tpu.vector_store %arg4[%702, %c1280], %691 {strides = array<i32>} : memref<2x1536xf32, #tpu.memory_space<vmem>>, vector<2x256xf32>,
    %c1_i32 = arith.constant 1 : i32
    return
  }
  func.func @transform_0(%arg0: i32) -> i32 {
    %c0_i32 = arith.constant 0 : i32
    %c0_i32_0 = arith.constant 0 : i32
    return %c0_i32 : i32
  }
  func.func @transform_1(%arg0: i32) -> i32 {
    %c0_i32 = arith.constant 0 : i32
    %c0_i32_0 = arith.constant 0 : i32
    return %c0_i32 : i32
  }
  func.func @transform_2(%arg0: i32) -> (i32, i32) {
    %c0_i32 = arith.constant 0 : i32
    %c0_i32_0 = arith.constant 0 : i32
    return %arg0, %c0_i32 : i32, i32
  }
  func.func @transform_3(%arg0: i32) -> (i32, i32) {
    %c0_i32 = arith.constant 0 : i32
    %c0_i32_0 = arith.constant 0 : i32
    return %arg0, %c0_i32 : i32, i32
  }
}

</mosaic_0001>

<bundles_post_ra>
// kernel: tpu_custom_call.1
= control target key start
LH: loop header
LB: loop body
LE: loop exit
PB: predicated region body
PF: predicated region fallthrough
CT: control target
= control target key end

     0   :  { %s4274_s0 = inlined_call_operand.hbm [shape: f32[162], index: 0, kind: input, shape index: {}]   ;;  %s4275_s1 = inlined_call_operand.vmem [shape: f32[6], index: 1, kind: input, shape index: {}]   ;;  %s4276_s2 = inlined_call_operand.hbm [shape: f32[2,768], index: 2, kind: input, shape index: {}]   ;;  %s4277_s3 = inlined_call_operand.hbm [shape: f32[2,1536], index: 3, kind: output, shape index: {}]  }
   0x1   :  { %4402 = sst [smem:[#allocation101_spill]] %s4277_s3 }
   0x2   :  { %8 = vsyncpa [#allocation5], 0 }
   0x3   :  { %9 = vsyncpa [#allocation6], 0 }
   0x4   :  { %10 = vsyncpa [#allocation3], 0 }
   0x5   :  { %11 = vsyncpa [#allocation4], 0  ;;  %s26_s14 = sshll.u32 %s4275_s1, 4  ;;  %s2906_s15 = smov [#allocation2]   ;;  %s27_s14 = int_to_ptr.vmem [resolvable:$true] %s26_s14 }
   0x6   :  { %19 = dma.hbm_to_smem %s4274_s0, 32, %s2906_s15, [#allocation5]  }
   0x7   :  { %s2846_s18 = scalar_lea.vmem %s27_s14, 16  ;;  %p2851_p1 = scmp.lt.s32.totalorder %s27_s14, %s27_s14 }
   0x8   :  { %p2847_p0 = scmp.ne.s32.totalorder %s27_s14, %s2846_s18  ;;  %p2852_p2 = scmp.lt.s32.totalorder %s2846_s18, %s2846_s18 }
   0xa   :  { %p2853_p3 = por %p2852_p2, %p2851_p1 }
   0xc   :  { %p2854_p4 = pnand %p2853_p3, %p2847_p0 }
   0xe   :  { %2857 = shalt.err (!%p2854_p4)
}
   0xf   :  { %s2907_s19 = smov [#allocation7]   ;;  %s2908_s20 = smov [#allocation8]  }
  0x10   :  { %29 = dma.vmem_to_smem %s27_s14, 16, %s2907_s19, [#allocation6]  }
  0x11   :  { %s36_s21 = sshll.u32 %s2908_s20, 4  ;;  %s37_s21 = int_to_ptr.vmem [resolvable:$true] %s36_s21 }
  0x12   :  { %s2866_s22 = scalar_lea.vmem %s37_s21, 192  ;;  %p2871_p6 = scmp.lt.s32.totalorder %s37_s21, %s37_s21 }
  0x13   :  { %p2867_p5 = scmp.ne.s32.totalorder %s37_s21, %s2866_s22  ;;  %p2872_p7 = scmp.lt.s32.totalorder %s2866_s22, %s2866_s22 }
  0x15   :  { %p2873_p8 = por %p2872_p7, %p2871_p6 }
  0x17   :  { %p2874_p9 = pnand %p2873_p8, %p2867_p5 }
  0x19   :  { %2877 = shalt.err (!%p2874_p9)
}
  0x1a   :  { %39 = dma.hbm_to_vmem [thread:$0]  %s4276_s2, 192, %s37_s21, [#allocation3]  }
  0x1b   :  { %2898 = dma.done.wait [#allocation5], 32  }
  0x1c   :  { %2899 = vsyncadd [#allocation5], 4294967264 }
  0x1d   :  { %2900 = dma.done.wait [#allocation6], 16  }
  0x1e   :  { %2901 = vsyncadd [#allocation6], 4294967280 }
  0x1f   :  { %2902 = dma.done.wait [#allocation3], 192  }
  0x20   :  { %2903 = vsyncadd [#allocation3], 4294967104 }
  0x21   :  { %49 = sfence }
  0x22   :  { %v94_v0 = vlaneseq  ;;  %v2909_v1 = vmov 1983009808   ;;  %v2949_v5 = vld [vmem:[#allocation8] sm:$0xf]  ;;  %s2955_s2 = sld [smem:[#allocation2 + $0x2]]  ;;  %s4284_s24 = smov 126  }
  0x23   :  { %v92_v2 = vunpack.c.l.s4 %v2909_v1  ;;  %s2957_s23 = sld [smem:[#allocation2 + $0x1d]]  ;;  %s4288_s25 = smov 127   ;;  %v3013_v9 = vld [vmem:[#allocation8 + $0x4] sm:$0xf] }
  0x24   :  { %v95_v3 = vshrl.u32 %v94_v0, 7  ;;  %s2961_s26 = sld [smem:[#allocation2 + $0x38]]  ;;  %s4282_s30 = smov 112   ;;  %v3214_v22 = vand.u32 127, %v94_v0 }
  0x25   :  { %v93_v4 = vunpack.c.0.s8 %v92_v2  ;;  %s2963_s27 = sld [smem:[#allocation2 + $0x53]]  ;;  %s4280_s12 = smov 111   ;;  %v3097_v12 = vld.sshfl [vmem:[#allocation8 + $0x8] sm:$0x33 pattern:$0x76325410] }
  0x26   :  { %s2965_s28 = sld [smem:[#allocation2 + $0x6e]]  ;;  %s4278_s17 = smov 110   ;;  %v3119_v13 = vcombine.high %v3097_v12, %v3097_v12  ;;  %vm210_vm0 = vcmp.lt.s32.totalorder %v3214_v22, 126  ;;  %vm313_vm1 = vcmp.lt.s32.totalorder %v3214_v22, 112  ;;  %vm107_vm2 = vcmp.lt.s32.totalorder %v3214_v22, 127 }
  0x27   :  { %v2951_v6 = vsub.s32 %v93_v4, %v95_v3  ;;  %s2967_s29 = sld [smem:[#allocation2 + $0x89]]  ;;  %s4286_s22 = smov 96   ;;  %vm416_vm3 = vcmp.lt.s32.totalorder %v3214_v22, 111  ;;  %vm519_vm4 = vcmp.lt.s32.totalorder %v3214_v22, 110  ;;  %vm622_vm5 = vcmp.lt.s32.totalorder %v3214_v22, 96 }
  0x28   :  { %4403 = sst [smem:[#allocation14_spill]] %s2955_s2  ;;  %v214_v14 = vstv %s2955_s2  ;;  %vm725_vm6 = vcmp.lt.s32.totalorder %v3214_v22, 95  ;;  %vm828_vm7 = vcmp.lt.s32.totalorder %v3214_v22, 94 }
  0x29   :  { %v97_v7 = vrot.slane %v2949_v5, %v2951_v6  ;;  %4404 = sst [smem:[#allocation15_spill]] %s2957_s23  ;;  %v959_v10 = vrot.slane %v3013_v9, %v2951_v6  ;;  %v230_v15 = vstv %s2957_s23 }
  0x2a   :  { %4405 = sst [smem:[#allocation16_spill]] %s2961_s26  ;;  %v246_v16 = vstv %s2961_s26 }
  0x2b   :  { %206 = vrot.lane.b32.xlu1 %v97_v7, %s4284_s24  ;;  %101 = vrot.lane.b32.xlu0 %v97_v7, %s4288_s25  ;;  %v98_v8 = vcombine.high %v97_v7, %v97_v7  ;;  %4406 = sst [smem:[#allocation17_spill]] %s2963_s27  ;;  %v960_v11 = vcombine.high %v959_v10, %v959_v10  ;;  %v262_v17 = vstv %s2963_s27 }
  0x2c   :  { %4407 = sst [smem:[#allocation18_spill]] %s2965_s28  ;;  %v278_v18 = vstv %s2965_s28 }
  0x2d   :  { %4408 = sst [smem:[#allocation19_spill]] %s2967_s29  ;;  %v294_v19 = vstv %s2967_s29 }
  0x2e   :  { %s2971_s4 = sld [smem:[#allocation2 + $0x3]] }
  0x2f   :  { %309 = vrot.lane.b32.xlu0 %v97_v7, %s4282_s30  ;;  %208 = vrot.lane.b32.xlu1 %v98_v8, %s4284_s24  ;;  %s2973_s5 = sld [smem:[#allocation2 + $0x1e]] }
  0x30   :  { %s2975_s6 = sld [smem:[#allocation2 + $0x39]] }
  0x31   :  { %s2977_s7 = sld [smem:[#allocation2 + $0x54]] }
  0x32   :  { %s2981_s8 = sld [smem:[#allocation2 + $0x6f]] }
  0x33   :  { %311 = vrot.lane.b32.xlu1 %v98_v8, %s4282_s30  ;;  %103 = vrot.lane.b32.xlu0 %v98_v8, %s4288_s25  ;;  %s2983_s9 = sld [smem:[#allocation2 + $0x8a]]  ;;  %s4292_s30 = smov 95  }
  0x34   :  { %4409 = sst [smem:[#allocation20_spill]] %s2971_s4  ;;  %v317_v25 = vstv %s2971_s4 }
  0x35   :  { %4410 = sst [smem:[#allocation21_spill]] %s2973_s5  ;;  %v333_v26 = vstv %s2973_s5 }
  0x36   :  { %4411 = sst [smem:[#allocation22_spill]] %s2975_s6  ;;  %v349_v29 = vstv %s2975_s6 }
  0x37   :  { %4412 = sst [smem:[#allocation23_spill]] %s2977_s7  ;;  %414 = vrot.lane.b32.xlu1 %v98_v8, %s4280_s12  ;;  %412 = vrot.lane.b32.xlu0 %v97_v7, %s4280_s12  ;;  %v365_v30 = vstv %s2977_s7 }
  0x38   :  { %4413 = sst [smem:[#allocation24_spill]] %s2981_s8 }
  0x39   :  { %4414 = sst [smem:[#allocation25_spill]] %s2983_s9  ;;  %s4456_s9 = smov 96  }
  0x3a   :  { %s2985_s10 = sld [smem:[#allocation2]] }
  0x3b   :  { %s2987_s11 = sld [smem:[#allocation2 + $0x1b]]  ;;  %517 = vrot.lane.b32.xlu1 %v98_v8, %s4278_s17  ;;  %515 = vrot.lane.b32.xlu0 %v97_v7, %s4278_s17 }
  0x3c   :  { %s2991_s13 = sld [smem:[#allocation2 + $0x36]] }
  0x3d   :  { %s2993_s14 = sld [smem:[#allocation2 + $0x51]] }
  0x3e   :  { %s2995_s15 = sld [smem:[#allocation2 + $0x6c]] }
  0x3f   :  { %s2997_s16 = sld [smem:[#allocation2 + $0x87]]  ;;  %620 = vrot.lane.b32.xlu1 %v98_v8, %s4286_s22  ;;  %618 = vrot.lane.b32.xlu0 %v97_v7, %s4286_s22 }
  0x40   :  { %s3001_s18 = sld [smem:[#allocation2 + $0x1]]  ;;  %v67_v20 = vstv %s2985_s10 }
  0x41   :  { %s3003_s19 = sld [smem:[#allocation2 + $0x1c]]  ;;  %v71_v21 = vstv %s2987_s11  ;;  %v68_v33 = vmul.f32 %v67_v20, %v2949_v5 }
  0x42   :  { %s3005_s20 = sld [smem:[#allocation2 + $0x37]]  ;;  %v75_v23 = vstv %s2991_s13  ;;  %v72_v34 = vmul.f32 %v71_v21, %v2949_v5 }
  0x43   :  { %s3007_s21 = sld [smem:[#allocation2 + $0x52]]  ;;  %723 = vrot.lane.b32.xlu1 %v98_v8, %s4292_s30  ;;  %721 = vrot.lane.b32.xlu0 %v97_v7, %s4292_s30  ;;  %v79_v24 = vstv %s2993_s14  ;;  %v76_v35 = vmul.f32 %v75_v23, %v2949_v5 }
  0x44   :  { %s3011_s0 = sld [smem:[#allocation2 + $0x6d]]  ;;  %v83_v27 = vstv %s2995_s15  ;;  %v80_v36 = vmul.f32 %v79_v24, %v2949_v5 }
  0x45   :  { %s3015_s1 = sld [smem:[#allocation2 + $0x88]]  ;;  %v87_v28 = vstv %s2997_s16  ;;  %v84_v39 = vmul.f32 %v83_v27, %v2949_v5 }
  0x46   :  { %4415 = sst [smem:[#allocation26_spill]] %s3001_s18  ;;  %v88_v40 = vmul.f32 %v87_v28, %v2949_v5 }
  0x47   :  { %4416 = sst [smem:[#allocation27_spill]] %s3003_s19  ;;  %s4431_s19 = smov 127  }
  0x48   :  { %4417 = sst [smem:[#allocation28_spill]] %s3005_s20 }
  0x49   :  { %4418 = sst [smem:[#allocation29_spill]] %s3007_s21 }
  0x4a   :  { %4419 = sst [smem:[#allocation30_spill]] %s3011_s0 }
  0x4b   :  { %4420 = sst [smem:[#allocation31_spill]] %s3015_s1  ;;  %s4298_s1 = smov 94  }
  0x4c   :  { %s3017_s17 = sld [smem:[#allocation7]]  ;;  %826 = vrot.lane.b32.xlu1 %v98_v8, %s4298_s1  ;;  %824 = vrot.lane.b32.xlu0 %v97_v7, %s4298_s1 }
  0x4d   :  { %s3019_s12 = sld [smem:[#allocation7 + $0x1]] }
  0x4e   :  { %s3025_s24 = sld [smem:[#allocation7 + $0x2]] }
  0x4f   :  { %s3027_s22 = sld [smem:[#allocation7 + $0x3]] }
  0x50   :  { %s3029_s25 = sld [smem:[#allocation7 + $0x4]]  ;;  %965 = vrot.lane.b32.xlu1 %v960_v11, %s4431_s19  ;;  %963 = vrot.lane.b32.xlu0 %v959_v10, %s4431_s19 }
  0x51   :  { %s3031_s3 = sld [smem:[#allocation7 + $0x5]] }
  0x52   :  { %4421 = sst [smem:[#allocation32_spill]] %s3017_s17  ;;  %s4451_s17 = smov 110  }
  0x53   :  { %4422 = sst [smem:[#allocation33_spill]] %s3019_s12  ;;  %s4446_s12 = smov 111  }
  0x54   :  { %4423 = sst [smem:[#allocation34_spill]] %s3025_s24  ;;  %s4441_s24 = smov 112  }
  0x55   :  { %4424 = sst [smem:[#allocation35_spill]] %s3027_s22  ;;  %s4436_s22 = smov 126  }
  0x56   :  { %4425 = sst [smem:[#allocation36_spill]] %s3029_s25  ;;  %1067 = vrot.lane.b32.xlu1 %v960_v11, %s4436_s22  ;;  %1065 = vrot.lane.b32.xlu0 %v959_v10, %s4436_s22 }
  0x57   :  { %4426 = sst [smem:[#allocation37_spill]] %s3031_s3 }
  0x58   :  { %s3035_s0 = sld [smem:[#allocation2 + $0x4]] }
  0x59   :  { %s3037_s30 = sld [smem:[#allocation2 + $0x1f]] }
  0x5a   :  { %s3039_s21 = sld [smem:[#allocation2 + $0x3a]]  ;;  %1169 = vrot.lane.b32.xlu1 %v960_v11, %s4441_s24  ;;  %1167 = vrot.lane.b32.xlu0 %v959_v10, %s4441_s24 }
  0x5b   :  { %s3041_s20 = sld [smem:[#allocation2 + $0x55]] }
  0x5c   :  { %s3045_s18 = sld [smem:[#allocation2 + $0x70]] }
  0x5d   :  { %s3047_s3 = sld [smem:[#allocation2 + $0x8b]] }
  0x5e   :  { %4427 = sst [smem:[#allocation38_spill]] %s3035_s0  ;;  %1271 = vrot.lane.b32.xlu1 %v960_v11, %s4446_s12  ;;  %1269 = vrot.lane.b32.xlu0 %v959_v10, %s4446_s12 }
  0x5f   :  { %4428 = sst [smem:[#allocation39_spill]] %s3037_s30 }
  0x60   :  { %4429 = sst [smem:[#allocation40_spill]] %s3039_s21 }
  0x61   :  { %4430 = sst [smem:[#allocation41_spill]] %s3041_s20 }
  0x62   :  { %4432 = sst [smem:[#allocation42_spill]] %s3045_s18  ;;  %1373 = vrot.lane.b32.xlu1 %v960_v11, %s4451_s17  ;;  %1371 = vrot.lane.b32.xlu0 %v959_v10, %s4451_s17 }
  0x63   :  { %4433 = sst [smem:[#allocation43_spill]] %s3047_s3 }
  0x64   :  { %s3049_s25 = sld [smem:[#allocation2 + $0x5]] }
  0x65   :  { %s3051_s1 = sld [smem:[#allocation2 + $0x20]] }
  0x66   :  { %s3055_s30 = sld [smem:[#allocation2 + $0x3b]]  ;;  %1475 = vrot.lane.b32.xlu1 %v960_v11, %s4456_s9  ;;  %1473 = vrot.lane.b32.xlu0 %v959_v10, %s4456_s9 }
  0x67   :  { %s3057_s21 = sld [smem:[#allocation2 + $0x56]] }
  0x68   :  { %s3059_s20 = sld [smem:[#allocation2 + $0x71]] }
  0x69   :  { %s3061_s0 = sld [smem:[#allocation2 + $0x8c]] }
  0x6a   :  { %4434 = sst [smem:[#allocation44_spill]] %s3049_s25 }
  0x6b   :  { %4435 = sst [smem:[#allocation45_spill]] %s3051_s1 }
  0x6c   :  { %4437 = sst [smem:[#allocation46_spill]] %s3055_s30 }
  0x6d   :  { %4438 = sst [smem:[#allocation47_spill]] %s3057_s21 }
  0x6e   :  { %4439 = sst [smem:[#allocation48_spill]] %s3059_s20 }
  0x6f   :  { %4440 = sst [smem:[#allocation49_spill]] %s3061_s0 }
  0x70   :  { %s3065_s3 = sld [smem:[#allocation2 + $0x6]] }
  0x71   :  { %s3067_s25 = sld [smem:[#allocation2 + $0x21]] }
  0x72   :  { %s3069_s1 = sld [smem:[#allocation2 + $0x3c]] }
  0x73   :  { %s3071_s18 = sld [smem:[#allocation2 + $0x57]] }
  0x74   :  { %s3075_s21 = sld [smem:[#allocation2 + $0x72]] }
  0x75   :  { %s3077_s20 = sld [smem:[#allocation2 + $0x8d]] }
  0x76   :  { %4442 = sst [smem:[#allocation50_spill]] %s3065_s3 }
  0x77   :  { %4443 = sst [smem:[#allocation51_spill]] %s3067_s25 }
  0x78   :  { %4444 = sst [smem:[#allocation52_spill]] %s3069_s1 }
  0x79   :  { %4445 = sst [smem:[#allocation53_spill]] %s3071_s18 }
  0x7a   :  { %4447 = sst [smem:[#allocation54_spill]] %s3075_s21 }
  0x7b   :  { %4448 = sst [smem:[#allocation55_spill]] %s3077_s20 }
  0x7c   :  { %s3079_s0 = sld [smem:[#allocation2 + $0x7]] }
  0x7d   :  { %s3081_s30 = sld [smem:[#allocation2 + $0x22]] }
  0x7e   :  { %s3085_s25 = sld [smem:[#allocation2 + $0x3d]] }
  0x7f   :  { %s3087_s1 = sld [smem:[#allocation2 + $0x58]] }
  0x80   :  { %s3089_s18 = sld [smem:[#allocation2 + $0x73]] }
  0x81   :  { %s3091_s3 = sld [smem:[#allocation2 + $0x8e]] }
  0x82   :  { %4449 = sst [smem:[#allocation56_spill]] %s3079_s0 }
  0x83   :  { %4450 = sst [smem:[#allocation57_spill]] %s3081_s30 }
  0x84   :  { %4452 = sst [smem:[#allocation58_spill]] %s3085_s25  ;;  %s4461_s25 = smov 95  }
  0x85   :  { %4453 = sst [smem:[#allocation59_spill]] %s3087_s1  ;;  %1577 = vrot.lane.b32.xlu1 %v960_v11, %s4461_s25  ;;  %1575 = vrot.lane.b32.xlu0 %v959_v10, %s4461_s25 }
  0x86   :  { %4454 = sst [smem:[#allocation60_spill]] %s3089_s18 }
  0x87   :  { %4455 = sst [smem:[#allocation61_spill]] %s3091_s3 }
  0x88   :  { %s3095_s20 = sld [smem:[#allocation2 + $0x8]] }
  0x89   :  { %s3099_s30 = sld [smem:[#allocation2 + $0x23]] }
  0x8a   :  { %s3101_s0 = sld [smem:[#allocation2 + $0x3e]] }
  0x8b   :  { %s3103_s21 = sld [smem:[#allocation2 + $0x59]] }
  0x8c   :  { %s3107_s18 = sld [smem:[#allocation2 + $0x74]] }
  0x8d   :  { %s3109_s3 = sld [smem:[#allocation2 + $0x8f]] }
  0x8e   :  { %4457 = sst [smem:[#allocation62_spill]] %s3095_s20  ;;  %s4466_s20 = smov 94  }
  0x8f   :  { %4458 = sst [smem:[#allocation63_spill]] %s3099_s30  ;;  %1679 = vrot.lane.b32.xlu1 %v960_v11, %s4466_s20  ;;  %1677 = vrot.lane.b32.xlu0 %v959_v10, %s4466_s20 }
  0x90   :  { %4459 = sst [smem:[#allocation64_spill]] %s3101_s0 }
  0x91   :  { %4460 = sst [smem:[#allocation65_spill]] %s3103_s21 }
  0x92   :  { %4462 = sst [smem:[#allocation66_spill]] %s3107_s18 }
  0x93   :  { %4463 = sst [smem:[#allocation67_spill]] %s3109_s3  ;;  %1817 = vrot.lane.b32.xlu1 %v3119_v13, %s4431_s19  ;;  %1815 = vrot.lane.b32.xlu0 %v3097_v12, %s4431_s19 }
  0x94   :  { %s3111_s1 = sld [smem:[#allocation2 + $0x9]] }
  0x95   :  { %s3113_s8 = sld [smem:[#allocation2 + $0x24]] }
  0x96   :  { %s3121_s21 = sld [smem:[#allocation2 + $0x3f]] }
  0x97   :  { %s3123_s0 = sld [smem:[#allocation2 + $0x5a]]  ;;  %1919 = vrot.lane.b32.xlu1 %v3119_v13, %s4436_s22  ;;  %1917 = vrot.lane.b32.xlu0 %v3097_v12, %s4436_s22 }
  0x98   :  { %s3125_s30 = sld [smem:[#allocation2 + $0x75]] }
  0x99   :  { %s3127_s18 = sld [smem:[#allocation2 + $0x90]] }
  0x9a   :  { %4464 = sst [smem:[#allocation68_spill]] %s3111_s1 }
  0x9b   :  { %4465 = sst [smem:[#allocation69_spill]] %s3113_s8  ;;  %2021 = vrot.lane.b32.xlu1 %v3119_v13, %s4441_s24  ;;  %2019 = vrot.lane.b32.xlu0 %v3097_v12, %s4441_s24 }
  0x9c   :  { %s3133_s3 = sld [smem:[#allocation2 + $0xa]] }
  0x9d   :  { %4467 = sst [smem:[#allocation70_spill]] %s3123_s0  ;;  %v207_v27 = vpop.permute.xlu1 %206  ;;  %v3394_v24 = vpop.permute.xlu0 %101 }
  0x9e   :  { %4468 = sst [smem:[#allocation71_spill]] %s3125_s30 }
  0x9f   :  { %4469 = sst [smem:[#allocation72_spill]] %s3127_s18  ;;  %2123 = vrot.lane.b32.xlu1 %v3119_v13, %s4446_s12  ;;  %2121 = vrot.lane.b32.xlu0 %v3097_v12, %s4446_s12 }
  0xa0   :  { %s3135_s8 = sld [smem:[#allocation2 + $0x25]] }
  0xa1   :  { %s3137_s1 = sld [smem:[#allocation2 + $0x40]] }
  0xa2   :  { %4470 = sst [smem:[#allocation73_spill]] %s3133_s3 }
  0xa3   :  { %s3139_s20 = sld [smem:[#allocation2 + $0x5b]]  ;;  %2225 = vrot.lane.b32.xlu1 %v3119_v13, %s4451_s17  ;;  %2223 = vrot.lane.b32.xlu0 %v3097_v12, %s4451_s17 }
  0xa4   :  { %s3145_s18 = sld [smem:[#allocation2 + $0x76]] }
  0xa5   :  { %s3147_s30 = sld [smem:[#allocation2 + $0x91]] }
  0xa6   :  { %4471 = sst [smem:[#allocation74_spill]] %s3135_s8 }
  0xa7   :  { %4472 = sst [smem:[#allocation75_spill]] %s3137_s1  ;;  %2327 = vrot.lane.b32.xlu1 %v3119_v13, %s4456_s9  ;;  %2325 = vrot.lane.b32.xlu0 %v3097_v12, %s4456_s9 }
  0xa8   :  { %s3149_s0 = sld [smem:[#allocation2 + $0xb]] }
  0xa9   :  { %4473 = sst [smem:[#allocation76_spill]] %s3139_s20 }
  0xaa   :  { %4474 = sst [smem:[#allocation77_spill]] %s3145_s18 }
  0xab   :  { %4475 = sst [smem:[#allocation78_spill]] %s3147_s30  ;;  %2429 = vrot.lane.b32.xlu1 %v3119_v13, %s4461_s25  ;;  %2427 = vrot.lane.b32.xlu0 %v3097_v12, %s4461_s25 }
  0xac   :  { %s3151_s19 = sld [smem:[#allocation2 + $0x26]] }
  0xad   :  { %s3157_s20 = sld [smem:[#allocation2 + $0x41]] }
  0xae   :  { %4476 = sst [smem:[#allocation79_spill]] %s3149_s0 }
  0xaf   :  { %s3159_s1 = sld [smem:[#allocation2 + $0x5c]] }
  0xb0   :  { %s3161_s8 = sld [smem:[#allocation2 + $0x77]] }
  0xb1   :  { %s3163_s22 = sld [smem:[#allocation2 + $0x92]] }
  0xb2   :  { %4477 = sst [smem:[#allocation80_spill]] %s3151_s19 }
  0xb3   :  { %4478 = sst [smem:[#allocation81_spill]] %s3157_s20 }
  0xb4   :  { %s3169_s19 = sld [smem:[#allocation2 + $0xc]] }
  0xb5   :  { %4479 = sst [smem:[#allocation82_spill]] %s3159_s1 }
  0xb6   :  { %4480 = sst [smem:[#allocation83_spill]] %s3161_s8 }
  0xb7   :  { %4481 = sst [smem:[#allocation84_spill]] %s3163_s22 }
  0xb8   :  { %s3171_s24 = sld [smem:[#allocation2 + $0x27]] }
  0xb9   :  { %s3173_s20 = sld [smem:[#allocation2 + $0x42]] }
  0xba   :  { %4482 = sst [smem:[#allocation85_spill]] %s3169_s19 }
  0xbb   :  { %s3175_s1 = sld [smem:[#allocation2 + $0x5d]] }
  0xbc   :  { %s3181_s12 = sld [smem:[#allocation2 + $0x78]] }
  0xbd   :  { %s3183_s19 = sld [smem:[#allocation2 + $0x93]] }
  0xbe   :  { %4483 = sst [smem:[#allocation86_spill]] %s3171_s24 }
  0xbf   :  { %4484 = sst [smem:[#allocation87_spill]] %s3173_s20 }
  0xc0   :  { %s3185_s24 = sld [smem:[#allocation2 + $0xd]] }
  0xc1   :  { %4485 = sst [smem:[#allocation88_spill]] %s3175_s1 }
  0xc2   :  { %s3187_s22 = sld [smem:[#allocation2 + $0x28]] }
  0xc3   :  { %4486 = sst [smem:[#allocation89_spill]] %s3183_s19 }
  0xc4   :  { %s3193_s1 = sld [smem:[#allocation2 + $0x43]] }
  0xc5   :  { %s3195_s17 = sld [smem:[#allocation2 + $0x5e]] }
  0xc6   :  { %4487 = sst [smem:[#allocation90_spill]] %s3185_s24 }
  0xc7   :  { %s4492_s9 = sld [smem:[#allocation24_spill]] }
  0xc8   :  { %4488 = sst [smem:[#allocation91_spill]] %s3187_s22 }
  0xc9   :  { %s3201_s22 = sld [smem:[#allocation2 + $0x79]] }
  0xca   :  { %4489 = sst [smem:[#allocation92_spill]] %s3193_s1 }
  0xcb   :  { %4490 = sst [smem:[#allocation93_spill]] %s3195_s17 }
  0xcc   :  { %s4493_s1 = sld [smem:[#allocation25_spill]] }
  0xcd   :  { %s3207_s24 = sld [smem:[#allocation2 + $0x94]]  ;;  %v381_v31 = vstv %s4492_s9  ;;  %s4508_s9 = smov 94  }
  0xce   :  { %s3218_s28 = sld [smem:[#allocation2 + $0xe]]  ;;  %2531 = vrot.lane.b32.xlu1 %v3119_v13, %s4508_s9  ;;  %2529 = vrot.lane.b32.xlu0 %v3097_v12, %s4508_s9 }
  0xcf   :  { %4491 = sst [smem:[#allocation94_spill]] %s3201_s22 }
  0xd0   :  { %s4496_s10 = sld [smem:[#allocation32_spill]] }
  0xd1   :  { %s4497_s11 = sld [smem:[#allocation33_spill]] }
  0xd2   :  { %s3224_s29 = sld [smem:[#allocation2 + $0x29]]  ;;  %v397_v32 = vstv %s4493_s1 }
  0xd3   :  { %4494 = sst [smem:[#allocation95_spill]] %s3207_s24 }
  0xd4   :  { %4495 = sst [smem:[#allocation96_spill]] %s3218_s28 }
  0xd5   :  { %s4499_s27 = sld [smem:[#allocation34_spill]] }
  0xd6   :  { %s4500_s25 = sld [smem:[#allocation35_spill]]  ;;  %v51_v37 = vstv %s4496_s10 }
  0xd7   :  { %s4501_s26 = sld [smem:[#allocation36_spill]]  ;;  %v53_v38 = vstv %s4497_s11  ;;  %v3262_v51 = vadd.f32 %v68_v33, %v51_v37 }
  0xd8   :  { %4498 = sst [smem:[#allocation32_spill]] %s3224_s29  ;;  %v3264_v52 = vadd.f32 %v72_v34, %v53_v38  ;;  %v937_v34 = vstv %s3121_s21 }
  0xd9   :  { %s3230_s23 = sld [smem:[#allocation2 + $0x44]] }
  0xda   :  { %s4503_s13 = sld [smem:[#allocation37_spill]] }
  0xdb   :  { %s4504_s14 = sld [smem:[#allocation26_spill]]  ;;  %v55_v41 = vstv %s4499_s27 }
  0xdc   :  { %s4505_s15 = sld [smem:[#allocation27_spill]]  ;;  %v57_v42 = vstv %s4500_s25  ;;  %v3268_v53 = vadd.f32 %v76_v35, %v55_v41 }
  0xdd   :  { %s4506_s16 = sld [smem:[#allocation28_spill]]  ;;  %v59_v43 = vstv %s4501_s26  ;;  %v3270_v54 = vadd.f32 %v80_v36, %v57_v42  ;;  %v3339_v36 = vmul.f32 %v937_v34, %v3013_v9 }
  0xde   :  { %s3236_s7 = sld [smem:[#allocation2 + $0x5f]]  ;;  %v3272_v55 = vadd.f32 %v84_v39, %v59_v43 }
  0xdf   :  { %4502 = sst [smem:[#allocation33_spill]] %s3230_s23 }
  0xe0   :  { %s4509_s1 = sld [smem:[#allocation29_spill]]  ;;  %v61_v44 = vstv %s4503_s13 }
  0xe1   :  { %s4510_s6 = sld [smem:[#allocation30_spill]]  ;;  %v111_v45 = vstv %s4504_s14  ;;  %v3274_v56 = vadd.f32 %v88_v40, %v61_v44 }
  0xe2   :  { %s4511_s5 = sld [smem:[#allocation31_spill]]  ;;  %v127_v46 = vstv %s4505_s15 }
  0xe3   :  { %s3246_s4 = sld [smem:[#allocation2 + $0x7a]]  ;;  %v143_v47 = vstv %s4506_s16 }
  0xe4   :  { %4507 = sst [smem:[#allocation34_spill]] %s3236_s7 }
  0xe5   :  { %s3252_s2 = sld [smem:[#allocation2 + $0x95]] }
  0xe6   :  { %s4514_s7 = sld [smem:[#allocation38_spill]]  ;;  %v159_v48 = vstv %s4509_s1 }
  0xe7   :  { %s4515_s23 = sld [smem:[#allocation39_spill]]  ;;  %v175_v49 = vstv %s4510_s6 }
  0xe8   :  { %s4516_s9 = sld [smem:[#allocation40_spill]]  ;;  %v191_v50 = vstv %s4511_s5 }
  0xe9   :  { %4512 = sst [smem:[#allocation35_spill]] %s3246_s4 }
  0xea   :  { %s4517_s10 = sld [smem:[#allocation41_spill]] }
  0xeb   :  { %4513 = sst [smem:[#allocation36_spill]] %s3252_s2 }
  0xec   :  { %s3258_s11 = sld [smem:[#allocation2 + $0xf]]  ;;  %v420_v57 = vstv %s4514_s7 }
  0xed   :  { %s4519_s29 = sld [smem:[#allocation42_spill]]  ;;  %v436_v58 = vstv %s4515_s23 }
  0xee   :  { %s4520_s28 = sld [smem:[#allocation43_spill]]  ;;  %v452_v59 = vstv %s4516_s9 }
  0xef   :  { %s4521_s27 = sld [smem:[#allocation44_spill]] }
  0xf0   :  { %s4522_s26 = sld [smem:[#allocation45_spill]]  ;;  %v468_v60 = vstv %s4517_s10 }
  0xf1   :  { %s3266_s25 = sld [smem:[#allocation2 + $0x2a]] }
  0xf2   :  { %4518 = sst [smem:[#allocation37_spill]] %s3258_s11 }
  0xf3   :  { %s4524_s13 = sld [smem:[#allocation46_spill]]  ;;  %v484_v61 = vstv %s4519_s29 }
  0xf4   :  { %s4525_s16 = sld [smem:[#allocation47_spill]]  ;;  %v500_v62 = vstv %s4520_s28 }
  0xf5   :  { %s4526_s1 = sld [smem:[#allocation48_spill]]  ;;  %v523_v63 = vstv %s4521_s27 }
  0xf6   :  { %s4527_s6 = sld [smem:[#allocation49_spill]]  ;;  %v539_v0 = vstv %s4522_s26 }
  0xf7   :  { %4523 = sst [smem:[#allocation97_spill]] %s3266_s25 }
  0xf8   :  { %s3276_s5 = sld [smem:[#allocation2 + $0x45]] }
  0xf9   :  { %s4529_s15 = sld [smem:[#allocation50_spill]]  ;;  %v555_v1 = vstv %s4524_s13 }
  0xfa   :  { %s4530_s14 = sld [smem:[#allocation51_spill]]  ;;  %v571_v2 = vstv %s4525_s16 }
  0xfb   :  { %s3282_s2 = sld [smem:[#allocation2 + $0x60]]  ;;  %v587_v3 = vstv %s4526_s1 }
  0xfc   :  { %s3288_s19 = sld [smem:[#allocation2 + $0x7b]]  ;;  %v603_v4 = vstv %s4527_s6 }
  0xfd   :  { %s3294_s10 = sld [smem:[#allocation2 + $0x96]] }
  0xfe   :  { %4528 = sst [smem:[#allocation98_spill]] %s3276_s5 }
  0xff   :  { %v626_v5 = vstv %s4529_s15  ;;  %s4544_s29 = sld [smem:[#allocation69_spill]] }
 0x100   :  { %v642_v7 = vstv %s4530_s14  ;;  %s4545_s27 = sld [smem:[#allocation70_spill]] }
 0x101   :  { %4533 = sst [smem:[#allocation99_spill]] %s3282_s2 }
 0x102   :  { %s4543_s2 = sld [smem:[#allocation68_spill]] }
 0x103   :  { %4542 = sst [smem:[#allocation100_spill]] %s3294_s10 }
 0x104   :  { %s3300_s26 = sld [smem:[#allocation2 + $0x10]] }
 0x105   :  { %s4548_s16 = sld [smem:[#allocation71_spill]]  ;;  %v933_v33 = vstv %s4544_s29 }
 0x106   :  { %s4549_s1 = sld [smem:[#allocation72_spill]]  ;;  %v941_v35 = vstv %s4545_s27  ;;  %v3336_v37 = vmul.f32 %v933_v33, %v3013_v9 }
 0x107   :  { %s3306_s6 = sld [smem:[#allocation2 + $0x2b]]  ;;  %v3342_v41 = vmul.f32 %v941_v35, %v3013_v9 }
 0x108   :  { %s3312_s25 = sld [smem:[#allocation2 + $0x46]]  ;;  %v929_v28 = vstv %s4543_s2 }
 0x109   :  { %s3318_s24 = sld [smem:[#allocation2 + $0x61]]  ;;  %v3333_v44 = vmul.f32 %v929_v28, %v3013_v9 }
 0x10a   :  { %s3324_s5 = sld [smem:[#allocation2 + $0x7c]] }
 0x10b   :  { %v945_v38 = vstv %s4548_s16  ;;  %s3330_s2 = sld [smem:[#allocation2 + $0x97]] }
 0x10c   :  { %v949_v39 = vstv %s4549_s1  ;;  %s3344_s16 = sld [smem:[#allocation2 + $0x11]]  ;;  %v3347_v43 = vmul.f32 %v945_v38, %v3013_v9 }
 0x10d   :  { %v3350_v28 = vmul.f32 %v949_v39, %v3013_v9  ;;  %s4564_s14 = sld [smem:[#allocation86_spill]]  ;;  %v209_v9 = vpop.permute.xlu1 %208  ;;  %v310_v39 = vpop.permute.xlu0 %309 }
 0x10e   :  { %4554 = sst [smem:[#allocation68_spill]] %s3312_s25  ;;  %v211_v20 = vsel %vm210_vm0, %v207_v27, %v209_v9  ;;  %v212_v38 = vsel %vm210_vm0, %v209_v9, %v207_v27 }
 0x10f   :  { %s3354_s15 = sld [smem:[#allocation2 + $0x2c]]  ;;  %v215_v40 = vmul.f32 %v214_v14, %v211_v20  ;;  %v216_v42 = vmul.f32 %v214_v14, %v212_v38  ;;  %v231_v33 = vmul.f32 %v230_v15, %v211_v20  ;;  %v232_v21 = vmul.f32 %v230_v15, %v212_v38 }
 0x110   :  { %s4566_s10 = sld [smem:[#allocation88_spill]]  ;;  %v247_v34 = vmul.f32 %v246_v16, %v211_v20  ;;  %v248_v27 = vmul.f32 %v246_v16, %v212_v38  ;;  %v263_v9 = vmul.f32 %v262_v17, %v211_v20  ;;  %v264_v13 = vmul.f32 %v262_v17, %v212_v38 }
 0x111   :  { %s4567_s13 = sld [smem:[#allocation89_spill]]  ;;  %v219_v35 = vcombine.low %v215_v40, %v216_v42  ;;  %v235_v23 = vcombine.low %v231_v33, %v232_v21  ;;  %v279_v12 = vmul.f32 %v278_v18, %v211_v20  ;;  %v280_v14 = vmul.f32 %v278_v18, %v212_v38  ;;  %v312_v11 = vpop.permute.xlu1 %311 }
 0x112   :  { %4561 = sst [smem:[#allocation69_spill]] %s3344_s16  ;;  %v251_v15 = vcombine.low %v247_v34, %v248_v27  ;;  %v267_v10 = vcombine.low %v263_v9, %v264_v13  ;;  %v295_v8 = vmul.f32 %v294_v19, %v211_v20  ;;  %v296_v16 = vmul.f32 %v294_v19, %v212_v38  ;;  %v104_v38 = vpop.permute.xlu0 %103 }
 0x113   :  { %s3361_s28 = sld [smem:[#allocation2 + $0x47]]  ;;  %v3444_v17 = vrot.slane %v219_v35, %v2951_v6  ;;  %v3447_v21 = vrot.slane %v235_v23, %v2951_v6  ;;  %v283_v40 = vcombine.low %v279_v12, %v280_v14  ;;  %v314_v18 = vsel %vm313_vm1, %v310_v39, %v312_v11 }
 0x114   :  { %s4569_s7 = sld [smem:[#allocation90_spill]]  ;;  %v3452_v13 = vrot.slane %v251_v15, %v2951_v6  ;;  %v3455_v20 = vrot.slane %v267_v10, %v2951_v6  ;;  %v299_v19 = vcombine.low %v295_v8, %v296_v16  ;;  %v315_v42 = vsel %vm313_vm1, %v312_v11, %v310_v39 }
 0x115   :  { %4565 = sst [smem:[#allocation70_spill]] %s3354_s15  ;;  %v3460_v23 = vrot.slane %v283_v40, %v2951_v6  ;;  %v318_v12 = vmul.f32 %v317_v25, %v314_v18  ;;  %v319_v33 = vmul.f32 %v317_v25, %v315_v42  ;;  %v334_v34 = vmul.f32 %v333_v26, %v314_v18 }
 0x116   :  { %s4570_s3 = sld [smem:[#allocation91_spill]]  ;;  %v3470_v10 = vrot.slane %v299_v19, %v2951_v6  ;;  %v335_v8 = vmul.f32 %v333_v26, %v315_v42  ;;  %v350_v11 = vmul.f32 %v349_v29, %v314_v18  ;;  %v351_v35 = vmul.f32 %v349_v29, %v315_v42 }
 0x117   :  { %s3367_s4 = sld [smem:[#allocation2 + $0x62]]  ;;  %v322_v39 = vcombine.low %v318_v12, %v319_v33  ;;  %v366_v27 = vmul.f32 %v365_v30, %v314_v18  ;;  %v367_v25 = vmul.f32 %v365_v30, %v315_v42  ;;  %v382_v9 = vmul.f32 %v381_v31, %v314_v18 }
 0x118   :  { %s4575_s23 = sld [smem:[#allocation95_spill]]  ;;  %v338_v14 = vcombine.low %v334_v34, %v335_v8  ;;  %v354_v15 = vcombine.low %v350_v11, %v351_v35  ;;  %v383_v16 = vmul.f32 %v381_v31, %v315_v42  ;;  %v398_v26 = vmul.f32 %v397_v32, %v314_v18 }
 0x119   :  { %4568 = sst [smem:[#allocation71_spill]] %s3361_s28  ;;  %v329_v29 = vrot.slane %v322_v39, %v2951_v6  ;;  %v370_v40 = vcombine.low %v366_v27, %v367_v25  ;;  %v399_v19 = vmul.f32 %v397_v32, %v315_v42  ;;  %v108_v30 = vsel %vm107_vm2, %v3394_v24, %v104_v38 }
 0x11a   :  { %s4576_s9 = sld [smem:[#allocation96_spill]]  ;;  %v345_v12 = vrot.slane %v338_v14, %v2951_v6  ;;  %v361_v33 = vrot.slane %v354_v15, %v2951_v6  ;;  %v386_v31 = vcombine.low %v382_v9, %v383_v16  ;;  %v109_v18 = vsel %vm107_vm2, %v104_v38, %v3394_v24  ;;  %v415_v14 = vpop.permute.xlu1 %414  ;;  %v413_v15 = vpop.permute.xlu0 %412 }
 0x11b   :  { %s4577_s18 = sld [smem:[#allocation32_spill]]  ;;  %v377_v34 = vrot.slane %v370_v40, %v2951_v6  ;;  %v402_v32 = vcombine.low %v398_v26, %v399_v19  ;;  %v112_v42 = vmul.f32 %v111_v45, %v108_v30  ;;  %v113_v8 = vmul.f32 %v111_v45, %v109_v18 }
 0x11c   :  { %s3373_s30 = sld [smem:[#allocation2 + $0x7d]]  ;;  %v393_v11 = vrot.slane %v386_v31, %v2951_v6  ;;  %v128_v35 = vmul.f32 %v127_v46, %v108_v30  ;;  %v129_v39 = vmul.f32 %v127_v46, %v109_v18  ;;  %v144_v24 = vmul.f32 %v143_v47, %v108_v30 }
 0x11d   :  { %4573 = sst [smem:[#allocation72_spill]] %s3367_s4  ;;  %v409_v38 = vrot.slane %v402_v32, %v2951_v6  ;;  %v116_v27 = vcombine.low %v112_v42, %v113_v8  ;;  %v145_v25 = vmul.f32 %v143_v47, %v109_v18  ;;  %v160_v9 = vmul.f32 %v159_v48, %v108_v30 }
 0x11e   :  { %s4579_s0 = sld [smem:[#allocation34_spill]]  ;;  %v132_v45 = vcombine.low %v128_v35, %v129_v39  ;;  %v161_v16 = vmul.f32 %v159_v48, %v109_v18  ;;  %v176_v26 = vmul.f32 %v175_v49, %v108_v30  ;;  %v177_v40 = vmul.f32 %v175_v49, %v109_v18 }
 0x11f   :  { %s3379_s1 = sld [smem:[#allocation2 + $0x98]]  ;;  %v123_v46 = vrot.slane %v116_v27, %v2951_v6  ;;  %v148_v19 = vcombine.low %v144_v24, %v145_v25  ;;  %v192_v31 = vmul.f32 %v191_v50, %v108_v30  ;;  %v193_v32 = vmul.f32 %v191_v50, %v109_v18 }
 0x120   :  { %s4583_s4 = sld [smem:[#allocation37_spill]]  ;;  %v139_v47 = vrot.slane %v132_v45, %v2951_v6  ;;  %v164_v42 = vcombine.low %v160_v9, %v161_v16  ;;  %v180_v8 = vcombine.low %v176_v26, %v177_v40  ;;  %v417_v48 = vsel %vm416_vm3, %v413_v15, %v415_v14 }
 0x121   :  { %s4584_s8 = sld [smem:[#allocation97_spill]]  ;;  %v125_v49 = vadd.f32 %v123_v46, %v3262_v51  ;;  %v155_v35 = vrot.slane %v148_v19, %v2951_v6  ;;  %v196_v39 = vcombine.low %v192_v31, %v193_v32  ;;  %v418_v30 = vsel %vm416_vm3, %v415_v14, %v413_v15  ;;  %v516_v32 = vpop.permute.xlu0 %515 }
 0x122   :  { %s4586_s11 = sld [smem:[#allocation99_spill]]  ;;  %v141_v50 = vadd.f32 %v139_v47, %v3264_v52  ;;  %v171_v18 = vrot.slane %v164_v42, %v2951_v6  ;;  %v187_v24 = vrot.slane %v180_v8, %v2951_v6  ;;  %v421_v27 = vmul.f32 %v420_v57, %v417_v48 }
 0x123   :  { %s4587_s20 = sld [smem:[#allocation100_spill]]  ;;  %v157_v25 = vadd.f32 %v155_v35, %v3268_v53  ;;  %v203_v9 = vrot.slane %v196_v39, %v2951_v6  ;;  %v228_v51 = vadd.f32 %v3444_v17, %v125_v49  ;;  %v422_v45 = vmul.f32 %v420_v57, %v418_v30 }
 0x124   :  { %s4588_s22 = sld [smem:[#allocation70_spill]]  ;;  %v173_v14 = vadd.f32 %v171_v18, %v3270_v54  ;;  %v189_v52 = vadd.f32 %v187_v24, %v3272_v55  ;;  %v244_v15 = vadd.f32 %v3447_v21, %v141_v50  ;;  %v437_v16 = vmul.f32 %v436_v58, %v417_v48 }
 0x125   :  { %4582 = sst [smem:[#allocation86_spill]] %s3379_s1  ;;  %v205_v26 = vadd.f32 %v203_v9, %v3274_v56  ;;  %v260_v53 = vadd.f32 %v3452_v13, %v157_v25  ;;  %v331_v40 = vadd.f32 %v329_v29, %v228_v51  ;;  %v425_v46 = vcombine.low %v421_v27, %v422_v45 }
 0x126   :  { %s4589_s17 = sld [smem:[#allocation71_spill]]  ;;  %v276_v17 = vadd.f32 %v3455_v20, %v173_v14  ;;  %v292_v57 = vadd.f32 %v3460_v23, %v189_v52  ;;  %v347_v19 = vadd.f32 %v345_v12, %v244_v15  ;;  %v438_v54 = vmul.f32 %v436_v58, %v418_v30  ;;  %v518_v12 = vpop.permute.xlu1 %517 }
 0x127   :  { %s4590_s15 = sld [smem:[#allocation72_spill]]  ;;  %v308_v55 = vadd.f32 %v3470_v10, %v205_v26  ;;  %v363_v21 = vadd.f32 %v361_v33, %v260_v53  ;;  %v432_v31 = vrot.slane %v425_v46, %v2951_v6  ;;  %v453_v56 = vmul.f32 %v452_v59, %v417_v48 }
 0x128   :  { %v379_v13 = vadd.f32 %v377_v34, %v276_v17  ;;  %v395_v29 = vadd.f32 %v393_v11, %v292_v57  ;;  %v441_v20 = vcombine.low %v437_v16, %v438_v54  ;;  %v454_v23 = vmul.f32 %v452_v59, %v418_v30  ;;  %s4623_s1 = sld [smem:[#allocation52_spill]] }
 0x129   :  { %v411_v58 = vadd.f32 %v409_v38, %v308_v55  ;;  %v434_v10 = vadd.f32 %v432_v31, %v331_v40  ;;  %v469_v33 = vmul.f32 %v468_v60, %v417_v48  ;;  %v470_v47 = vmul.f32 %v468_v60, %v418_v30  ;;  %v619_v40 = vpop.permute.xlu0 %618  ;;  %s4624_s27 = sld [smem:[#allocation53_spill]] }
 0x12a   :  { %v448_v34 = vrot.slane %v441_v20, %v2951_v6  ;;  %v457_v42 = vcombine.low %v453_v56, %v454_v23  ;;  %v485_v11 = vmul.f32 %v484_v61, %v417_v48  ;;  %v486_v59 = vmul.f32 %v484_v61, %v418_v30  ;;  %v621_v53 = vpop.permute.xlu1 %620  ;;  %s4625_s28 = sld [smem:[#allocation54_spill]] }
 0x12b   :  { %v473_v8 = vcombine.low %v469_v33, %v470_v47  ;;  %v501_v49 = vmul.f32 %v500_v62, %v417_v48  ;;  %v502_v38 = vmul.f32 %v500_v62, %v418_v30  ;;  %v520_v35 = vsel %vm519_vm4, %v516_v32, %v518_v12  ;;  %s4627_s29 = sld [smem:[#allocation55_spill]] }
 0x12c   :  { %v450_v60 = vadd.f32 %v448_v34, %v347_v19  ;;  %v464_v39 = vrot.slane %v457_v42, %v2951_v6  ;;  %v489_v50 = vcombine.low %v485_v11, %v486_v59  ;;  %v521_v18 = vsel %vm519_vm4, %v518_v12, %v516_v32  ;;  %s4632_s21 = sld [smem:[#allocation56_spill]] }
 0x12d   :  { %v480_v61 = vrot.slane %v473_v8, %v2951_v6  ;;  %v505_v24 = vcombine.low %v501_v49, %v502_v38  ;;  %v524_v48 = vmul.f32 %v523_v63, %v520_v35  ;;  %v525_v62 = vmul.f32 %v523_v63, %v521_v18  ;;  %s4635_s25 = sld [smem:[#allocation57_spill]] }
 0x12e   :  { %v466_v30 = vadd.f32 %v464_v39, %v363_v21  ;;  %v496_v27 = vrot.slane %v489_v50, %v2951_v6  ;;  %v540_v25 = vmul.f32 %v539_v0, %v520_v35  ;;  %v541_v9 = vmul.f32 %v539_v0, %v521_v18  ;;  %v724_v50 = vpop.permute.xlu1 %723  ;;  %s4637_s16 = sld [smem:[#allocation58_spill]] }
 0x12f   :  { %v482_v51 = vadd.f32 %v480_v61, %v379_v13  ;;  %v512_v45 = vrot.slane %v505_v24, %v2951_v6  ;;  %v528_v14 = vcombine.low %v524_v48, %v525_v62  ;;  %v556_v52 = vmul.f32 %v555_v1, %v520_v35 }
 0x130   :  { %v498_v15 = vadd.f32 %v496_v27, %v395_v29  ;;  %v544_v16 = vcombine.low %v540_v25, %v541_v9  ;;  %v557_v63 = vmul.f32 %v555_v1, %v521_v18  ;;  %v572_v26 = vmul.f32 %v571_v2, %v520_v35 }
 0x131   :  { %v514_v0 = vadd.f32 %v512_v45, %v411_v58  ;;  %v535_v46 = vrot.slane %v528_v14, %v2951_v6  ;;  %v573_v17 = vmul.f32 %v571_v2, %v521_v18  ;;  %v588_v57 = vmul.f32 %v587_v3, %v520_v35 }
 0x132   :  { %v551_v19 = vrot.slane %v544_v16, %v2951_v6  ;;  %v560_v54 = vcombine.low %v556_v52, %v557_v63  ;;  %v589_v1 = vmul.f32 %v587_v3, %v521_v18  ;;  %v604_v55 = vmul.f32 %v603_v4, %v520_v35 }
 0x133   :  { %v537_v21 = vadd.f32 %v535_v46, %v434_v10  ;;  %v576_v31 = vcombine.low %v572_v26, %v573_v17  ;;  %v605_v56 = vmul.f32 %v603_v4, %v521_v18  ;;  %v623_v2 = vsel %vm622_vm5, %v619_v40, %v621_v53  ;;  %v722_v18 = vpop.permute.xlu0 %721 }
 0x134   :  { %v553_v13 = vadd.f32 %v551_v19, %v450_v60  ;;  %v567_v29 = vrot.slane %v560_v54, %v2951_v6  ;;  %v592_v20 = vcombine.low %v588_v57, %v589_v1  ;;  %v624_v3 = vsel %vm622_vm5, %v621_v53, %v619_v40 }
 0x135   :  { %v583_v23 = vrot.slane %v576_v31, %v2951_v6  ;;  %v608_v12 = vcombine.low %v604_v55, %v605_v56  ;;  %v627_v32 = vmul.f32 %v626_v5, %v623_v2  ;;  %v628_v4 = vmul.f32 %v626_v5, %v624_v3 }
 0x136   :  { %v569_v58 = vadd.f32 %v567_v29, %v466_v30  ;;  %v599_v10 = vrot.slane %v592_v20, %v2951_v6  ;;  %v643_v33 = vmul.f32 %v642_v7, %v623_v2  ;;  %v644_v47 = vmul.f32 %v642_v7, %v624_v3 }
 0x137   :  { %v585_v34 = vadd.f32 %v583_v23, %v482_v51  ;;  %v615_v42 = vrot.slane %v608_v12, %v2951_v6  ;;  %v631_v11 = vcombine.low %v627_v32, %v628_v4  ;;  %v4626_v59 = vstv %s4623_s1  ;;  %s4638_s1 = sld [smem:[#allocation59_spill]] }
 0x138   :  { %v659_v8 = vmul.f32 %v4626_v59, %v623_v2  ;;  %v601_v49 = vadd.f32 %v599_v10, %v498_v15  ;;  %v647_v38 = vcombine.low %v643_v33, %v644_v47  ;;  %v4628_v5 = vmov %v4626_v59  ;;  %v825_v59 = vpop.permute.xlu0 %824 }
 0x139   :  { %v660_v35 = vmul.f32 %v4628_v5, %v624_v3  ;;  %v4629_v60 = vstv %s4624_s27  ;;  %v617_v7 = vadd.f32 %v615_v42, %v514_v0  ;;  %v638_v61 = vrot.slane %v631_v11, %v2951_v6  ;;  %s4642_s27 = sld [smem:[#allocation60_spill]]  ;;  %v827_v11 = vpop.permute.xlu1 %826 }
 0x13a   :  { %v675_v39 = vmul.f32 %v4629_v60, %v623_v2  ;;  %v4630_v24 = vmov %v4629_v60  ;;  %v4631_v62 = vstv %s4625_s28  ;;  %v654_v27 = vrot.slane %v647_v38, %v2951_v6  ;;  %s4644_s28 = sld [smem:[#allocation61_spill]] }
 0x13b   :  { %v676_v48 = vmul.f32 %v4630_v24, %v624_v3  ;;  %v691_v30 = vmul.f32 %v4631_v62, %v623_v2  ;;  %v663_v25 = vcombine.low %v659_v8, %v660_v35  ;;  %v4633_v9 = vmov %v4631_v62 }
 0x13c   :  { %v692_v51 = vmul.f32 %v4633_v9, %v624_v3  ;;  %v4634_v45 = vstv %s4627_s29  ;;  %v640_v52 = vadd.f32 %v638_v61, %v537_v21  ;;  %v726_v26 = vsel %vm725_vm6, %v722_v18, %v724_v50  ;;  %s4650_s29 = sld [smem:[#allocation62_spill]] }
 0x13d   :  { %v707_v14 = vmul.f32 %v4634_v45, %v623_v2  ;;  %v679_v15 = vcombine.low %v675_v39, %v676_v48  ;;  %v4636_v16 = vmov %v4634_v45  ;;  %v656_v53 = vadd.f32 %v654_v27, %v553_v13 }
 0x13e   :  { %v708_v63 = vmul.f32 %v4636_v16, %v624_v3  ;;  %v670_v40 = vrot.slane %v663_v25, %v2951_v6  ;;  %v695_v0 = vcombine.low %v691_v30, %v692_v51  ;;  %v727_v46 = vsel %vm725_vm6, %v724_v50, %v722_v18 }
 0x13f   :  { %v686_v17 = vrot.slane %v679_v15, %v2951_v6  ;;  %v4639_v19 = vstv %s4632_s21  ;;  %v4641_v56 = vstv %s4635_s25  ;;  %v4645_v12 = vstv %s4637_s16  ;;  %s4653_s21 = sld [smem:[#allocation63_spill]] }
 0x140   :  { %v711_v57 = vcombine.low %v707_v14, %v708_v63  ;;  %v730_v54 = vmul.f32 %v4639_v19, %v726_v26  ;;  %v4640_v1 = vmov %v4639_v19  ;;  %v672_v21 = vadd.f32 %v670_v40, %v569_v58  ;;  %s4655_s25 = sld [smem:[#allocation64_spill]] }
 0x141   :  { %v731_v55 = vmul.f32 %v4640_v1, %v727_v46  ;;  %v702_v31 = vrot.slane %v695_v0, %v2951_v6  ;;  %v746_v2 = vmul.f32 %v4641_v56, %v726_v26  ;;  %v4643_v13 = vmov %v4641_v56  ;;  %s4656_s16 = sld [smem:[#allocation65_spill]] }
 0x142   :  { %v747_v29 = vmul.f32 %v4643_v13, %v727_v46  ;;  %v688_v20 = vadd.f32 %v686_v17, %v585_v34  ;;  %v718_v3 = vrot.slane %v711_v57, %v2951_v6  ;;  %v762_v32 = vmul.f32 %v4645_v12, %v726_v26 }
 0x143   :  { %v734_v23 = vcombine.low %v730_v54, %v731_v55  ;;  %v704_v4 = vadd.f32 %v702_v31, %v601_v49  ;;  %v4646_v58 = vmov %v4645_v12  ;;  %v4647_v47 = vstv %s4638_s1  ;;  %s4660_s1 = sld [smem:[#allocation66_spill]]  ;;  %v964_v12 = vpop.permute.xlu0 %963 }
 0x144   :  { %v750_v10 = vcombine.low %v746_v2, %v747_v29  ;;  %v763_v33 = vmul.f32 %v4646_v58, %v727_v46  ;;  %v778_v42 = vmul.f32 %v4647_v47, %v726_v26  ;;  %v720_v8 = vadd.f32 %v718_v3, %v617_v7 }
 0x145   :  { %v741_v38 = vrot.slane %v734_v23, %v2951_v6  ;;  %v4648_v34 = vmov %v4647_v47  ;;  %v4649_v35 = vstv %s4642_s27  ;;  %v4652_v61 = vstv %s4644_s28  ;;  %s4662_s27 = sld [smem:[#allocation67_spill]]  ;;  %v966_v23 = vpop.permute.xlu1 %965 }
 0x146   :  { %v779_v5 = vmul.f32 %v4648_v34, %v727_v46  ;;  %v794_v60 = vmul.f32 %v4649_v35, %v726_v26  ;;  %v757_v39 = vrot.slane %v750_v10, %v2951_v6  ;;  %v766_v49 = vcombine.low %v762_v32, %v763_v33  ;;  %s4668_s28 = sld [smem:[#allocation73_spill]] }
 0x147   :  { %v4651_v50 = vmov %v4649_v35  ;;  %v810_v24 = vmul.f32 %v4652_v61, %v726_v26  ;;  %v743_v48 = vadd.f32 %v741_v38, %v640_v52  ;;  %v4654_v7 = vmov %v4652_v61 }
 0x148   :  { %v795_v18 = vmul.f32 %v4651_v50, %v727_v46  ;;  %v782_v62 = vcombine.low %v778_v42, %v779_v5  ;;  %v811_v30 = vmul.f32 %v4654_v7, %v727_v46  ;;  %v829_v27 = vsel %vm828_vm7, %v825_v59, %v827_v11 }
 0x149   :  { %v759_v25 = vadd.f32 %v757_v39, %v656_v53  ;;  %v773_v9 = vrot.slane %v766_v49, %v2951_v6  ;;  %v830_v45 = vsel %vm828_vm7, %v827_v11, %v825_v59  ;;  %v4657_v52 = vstv %s4650_s29  ;;  %s4672_s29 = sld [smem:[#allocation74_spill]] }
 0x14a   :  { %v798_v51 = vcombine.low %v794_v60, %v795_v18  ;;  %v789_v14 = vrot.slane %v782_v62, %v2951_v6  ;;  %v814_v15 = vcombine.low %v810_v24, %v811_v30  ;;  %v833_v16 = vmul.f32 %v4657_v52, %v829_v27 }
 0x14b   :  { %v4658_v63 = vmov %v4657_v52  ;;  %v775_v40 = vadd.f32 %v773_v9, %v672_v21  ;;  %v4659_v53 = vstv %s4653_s21  ;;  %v4663_v55 = vstv %s4655_s25  ;;  %s4673_s21 = sld [smem:[#allocation75_spill]] }
 0x14c   :  { %v834_v26 = vmul.f32 %v4658_v63, %v830_v45  ;;  %v805_v0 = vrot.slane %v798_v51, %v2951_v6  ;;  %v849_v46 = vmul.f32 %v4659_v53, %v829_v27  ;;  %v4661_v17 = vmov %v4659_v53  ;;  %s4676_s25 = sld [smem:[#allocation76_spill]] }
 0x14d   :  { %v850_v57 = vmul.f32 %v4661_v17, %v830_v45  ;;  %v791_v19 = vadd.f32 %v789_v14, %v688_v20  ;;  %v821_v54 = vrot.slane %v814_v15, %v2951_v6  ;;  %v865_v31 = vmul.f32 %v4663_v55, %v829_v27 }
 0x14e   :  { %v837_v1 = vcombine.low %v833_v16, %v834_v26  ;;  %v807_v56 = vadd.f32 %v805_v0, %v704_v4  ;;  %v4664_v21 = vmov %v4663_v55  ;;  %v4665_v29 = vstv %s4656_s16  ;;  %s4679_s16 = sld [smem:[#allocation77_spill]] }
 0x14f   :  { %v853_v2 = vcombine.low %v849_v46, %v850_v57  ;;  %v866_v13 = vmul.f32 %v4664_v21, %v830_v45  ;;  %v881_v3 = vmul.f32 %v4665_v29, %v829_v27  ;;  %v823_v32 = vadd.f32 %v821_v54, %v720_v8  ;;  %v1068_v21 = vpop.permute.xlu1 %1067 }
 0x150   :  { %v844_v10 = vrot.slane %v837_v1, %v2951_v6  ;;  %v4666_v20 = vmov %v4665_v29  ;;  %v4667_v33 = vstv %s4660_s1  ;;  %v4670_v38 = vstv %s4662_s27  ;;  %s4681_s1 = sld [smem:[#allocation78_spill]] }
 0x151   :  { %v882_v58 = vmul.f32 %v4666_v20, %v830_v45  ;;  %v897_v47 = vmul.f32 %v4667_v33, %v829_v27  ;;  %v860_v42 = vrot.slane %v853_v2, %v2951_v6  ;;  %v869_v11 = vcombine.low %v865_v31, %v866_v13  ;;  %v1066_v13 = vpop.permute.xlu0 %1065  ;;  %s4685_s27 = sld [smem:[#allocation79_spill]] }
 0x152   :  { %v4669_v4 = vmov %v4667_v33  ;;  %v913_v34 = vmul.f32 %v4670_v38, %v829_v27  ;;  %v846_v5 = vadd.f32 %v844_v10, %v743_v48  ;;  %v4671_v60 = vmov %v4670_v38 }
 0x153   :  { %v898_v59 = vmul.f32 %v4669_v4, %v830_v45  ;;  %v885_v35 = vcombine.low %v881_v3, %v882_v58  ;;  %v914_v39 = vmul.f32 %v4671_v60, %v830_v45  ;;  %v967_v8 = vsel %vm107_vm2, %v964_v12, %v966_v23 }
 0x154   :  { %v862_v49 = vadd.f32 %v860_v42, %v759_v25  ;;  %v876_v50 = vrot.slane %v869_v11, %v2951_v6  ;;  %v968_v61 = vsel %vm107_vm2, %v966_v23, %v964_v12  ;;  %v931_v48 = vadd.f32 %v3333_v44, %v846_v5 }
 0x155   :  { %v901_v18 = vcombine.low %v897_v47, %v898_v59  ;;  %v892_v24 = vrot.slane %v885_v35, %v2951_v6  ;;  %v917_v62 = vcombine.low %v913_v34, %v914_v39  ;;  %v4674_v7 = vstv %s4668_s28  ;;  %s4687_s28 = sld [smem:[#allocation80_spill]] }
 0x156   :  { %v971_v30 = vmul.f32 %v4674_v7, %v967_v8  ;;  %v878_v27 = vadd.f32 %v876_v50, %v775_v40  ;;  %v935_v25 = vadd.f32 %v3336_v37, %v862_v49  ;;  %v4675_v51 = vmov %v4674_v7 }
 0x157   :  { %v908_v9 = vrot.slane %v901_v18, %v2951_v6  ;;  %v972_v45 = vmul.f32 %v4675_v51, %v968_v61  ;;  %v894_v14 = vadd.f32 %v892_v24, %v791_v19  ;;  %v924_v15 = vrot.slane %v917_v62, %v2951_v6 }
 0x158   :  { %v4677_v52 = vstv %s4672_s29  ;;  %v939_v0 = vadd.f32 %v3339_v36, %v878_v27  ;;  %v4680_v53 = vstv %s4673_s21  ;;  %v4683_v31 = vstv %s4676_s25  ;;  %s4690_s29 = sld [smem:[#allocation81_spill]] }
 0x159   :  { %v987_v16 = vmul.f32 %v4677_v52, %v967_v8  ;;  %v4678_v63 = vmov %v4677_v52  ;;  %v910_v44 = vadd.f32 %v908_v9, %v807_v56  ;;  %v975_v40 = vcombine.low %v971_v30, %v972_v45  ;;  %s4692_s21 = sld [smem:[#allocation82_spill]] }
 0x15a   :  { %v988_v26 = vmul.f32 %v4678_v63, %v968_v61  ;;  %v1003_v46 = vmul.f32 %v4680_v53, %v967_v8  ;;  %v926_v17 = vadd.f32 %v924_v15, %v823_v32  ;;  %v943_v37 = vadd.f32 %v3342_v41, %v894_v14  ;;  %s4694_s25 = sld [smem:[#allocation83_spill]] }
 0x15b   :  { %v4682_v19 = vmov %v4680_v53  ;;  %v947_v1 = vadd.f32 %v3347_v43, %v910_v44  ;;  %v982_v55 = vrot.slane %v975_v40, %v2951_v6  ;;  %v1019_v56 = vmul.f32 %v4683_v31, %v967_v8  ;;  %v1168_v40 = vpop.permute.xlu0 %1167 }
 0x15c   :  { %v991_v57 = vcombine.low %v987_v16, %v988_v26  ;;  %v1004_v54 = vmul.f32 %v4682_v19, %v968_v61  ;;  %v4684_v36 = vmov %v4683_v31  ;;  %v951_v29 = vadd.f32 %v3350_v28, %v926_v17 }
 0x15d   :  { %v1020_v2 = vmul.f32 %v4684_v36, %v968_v61  ;;  %v4686_v23 = vstv %s4679_s16  ;;  %v984_v43 = vadd.f32 %v982_v55, %v931_v48  ;;  %v4689_v58 = vstv %s4681_s1  ;;  %s4699_s16 = sld [smem:[#allocation84_spill]] }
 0x15e   :  { %v998_v41 = vrot.slane %v991_v57, %v2951_v6  ;;  %v1007_v3 = vcombine.low %v1003_v46, %v1004_v54  ;;  %v1035_v12 = vmul.f32 %v4686_v23, %v967_v8  ;;  %v4688_v10 = vmov %v4686_v23  ;;  %s4705_s1 = sld [smem:[#allocation85_spill]] }
 0x15f   :  { %v1023_v32 = vcombine.low %v1019_v56, %v1020_v2  ;;  %v1036_v20 = vmul.f32 %v4688_v10, %v968_v61  ;;  %v1051_v33 = vmul.f32 %v4689_v58, %v967_v8  ;;  %v4691_v11 = vmov %v4689_v58 }
 0x160   :  { %v1000_v47 = vadd.f32 %v998_v41, %v935_v25  ;;  %v1014_v42 = vrot.slane %v1007_v3, %v2951_v6  ;;  %v1052_v28 = vmul.f32 %v4691_v11, %v968_v61  ;;  %v1069_v4 = vsel %vm210_vm0, %v1066_v13, %v1068_v21 }
 0x161   :  { %v1030_v59 = vrot.slane %v1023_v32, %v2951_v6  ;;  %v1039_v38 = vcombine.low %v1035_v12, %v1036_v20  ;;  %v1070_v34 = vsel %vm210_vm0, %v1068_v21, %v1066_v13  ;;  %v4693_v5 = vstv %s4685_s27  ;;  %s4708_s27 = sld [smem:[#allocation87_spill]] }
 0x162   :  { %v1073_v35 = vmul.f32 %v4693_v5, %v1069_v4  ;;  %v1016_v60 = vadd.f32 %v1014_v42, %v939_v0  ;;  %v1055_v39 = vcombine.low %v1051_v33, %v1052_v28  ;;  %v4695_v8 = vmov %v4693_v5  ;;  %v1170_v0 = vpop.permute.xlu1 %1169 }
 0x163   :  { %v1074_v49 = vmul.f32 %v4695_v8, %v1070_v34  ;;  %v4696_v50 = vstv %s4687_s28  ;;  %v1032_v61 = vadd.f32 %v1030_v59, %v943_v37  ;;  %v1046_v24 = vrot.slane %v1039_v38, %v2951_v6  ;;  %s4034_s28 = sld [smem:[#allocation2 + $0x4a]] }
 0x164   :  { %v1089_v18 = vmul.f32 %v4696_v50, %v1069_v4  ;;  %v4697_v62 = vmov %v4696_v50  ;;  %v4698_v7 = vstv %s4690_s29  ;;  %v1062_v27 = vrot.slane %v1055_v39, %v2951_v6  ;;  %s4038_s29 = sld [smem:[#allocation2 + $0x65]] }
 0x165   :  { %v1090_v48 = vmul.f32 %v4697_v62, %v1070_v34  ;;  %v1105_v30 = vmul.f32 %v4698_v7, %v1069_v4  ;;  %v1077_v9 = vcombine.low %v1073_v35, %v1074_v49  ;;  %v4700_v25 = vmov %v4698_v7  ;;  %v1270_v62 = vpop.permute.xlu0 %1269 }
 0x166   :  { %v1106_v51 = vmul.f32 %v4700_v25, %v1070_v34  ;;  %v4701_v45 = vstv %s4692_s21  ;;  %v1048_v15 = vadd.f32 %v1046_v24, %v947_v1  ;;  %v4703_v26 = vstv %s4694_s25  ;;  %v1272_v24 = vpop.permute.xlu1 %1271  ;;  %s4040_s21 = sld [smem:[#allocation2 + $0x80]] }
 0x167   :  { %v1121_v14 = vmul.f32 %v4701_v45, %v1069_v4  ;;  %v1093_v52 = vcombine.low %v1089_v18, %v1090_v48  ;;  %v4702_v16 = vmov %v4701_v45  ;;  %v1137_v44 = vmul.f32 %v4703_v26, %v1069_v4  ;;  %s4048_s25 = sld [smem:[#allocation2 + $0x9b]] }
 0x168   :  { %v1122_v63 = vmul.f32 %v4702_v16, %v1070_v34  ;;  %v1064_v53 = vadd.f32 %v1062_v27, %v951_v29  ;;  %v1084_v46 = vrot.slane %v1077_v9, %v2951_v6  ;;  %v1109_v17 = vcombine.low %v1105_v30, %v1106_v51 }
 0x169   :  { %v4704_v37 = vmov %v4703_v26  ;;  %v1100_v19 = vrot.slane %v1093_v52, %v2951_v6  ;;  %v4706_v55 = vstv %s4699_s16  ;;  %v1171_v13 = vsel %vm313_vm1, %v1168_v40, %v1170_v0  ;;  %s4050_s16 = sld [smem:[#allocation2 + $0x15]] }
 0x16a   :  { %v1138_v57 = vmul.f32 %v4704_v37, %v1070_v34  ;;  %v1125_v54 = vcombine.low %v1121_v14, %v1122_v63  ;;  %v1153_v1 = vmul.f32 %v4706_v55, %v1069_v4  ;;  %v4707_v31 = vmov %v4706_v55 }
 0x16b   :  { %v1154_v56 = vmul.f32 %v4707_v31, %v1070_v34  ;;  %v1086_v36 = vadd.f32 %v1084_v46, %v984_v43  ;;  %v1116_v2 = vrot.slane %v1109_v17, %v2951_v6  ;;  %v1102_v29 = vadd.f32 %v1100_v19, %v1000_v47 }
 0x16c   :  { %v1141_v21 = vcombine.low %v1137_v44, %v1138_v57  ;;  %v1132_v41 = vrot.slane %v1125_v54, %v2951_v6  ;;  %v1172_v23 = vsel %vm313_vm1, %v1170_v0, %v1168_v40  ;;  %v4709_v32 = vstv %s4705_s1  ;;  %s4058_s1 = sld [smem:[#allocation2 + $0x30]] }
 0x16d   :  { %v1157_v3 = vcombine.low %v1153_v1, %v1154_v56  ;;  %v1118_v12 = vadd.f32 %v1116_v2, %v1016_v60  ;;  %v1175_v10 = vmul.f32 %v4709_v32, %v1171_v13  ;;  %v4710_v20 = vmov %v4709_v32 }
 0x16e   :  { %v1148_v43 = vrot.slane %v1141_v21, %v2951_v6  ;;  %v1176_v58 = vmul.f32 %v4710_v20, %v1172_v23  ;;  %v1134_v33 = vadd.f32 %v1132_v41, %v1032_v61  ;;  %v4711_v47 = vstv %s4564_s14  ;;  %s4721_s14 = sld [smem:[#allocation92_spill]] }
 0x16f   :  { %v1164_v42 = vrot.slane %v1157_v3, %v2951_v6  ;;  %v1191_v11 = vmul.f32 %v4711_v47, %v1171_v13  ;;  %v4712_v28 = vmov %v4711_v47  ;;  %v4713_v34 = vstv %s4708_s27  ;;  %v1374_v47 = vpop.permute.xlu1 %1373  ;;  %s4062_s27 = sld [smem:[#allocation2 + $0x4b]] }
 0x170   :  { %v1192_v4 = vmul.f32 %v4712_v28, %v1172_v23  ;;  %v1150_v59 = vadd.f32 %v1148_v43, %v1048_v15  ;;  %v1179_v38 = vcombine.low %v1175_v10, %v1176_v58  ;;  %v1207_v5 = vmul.f32 %v4713_v34, %v1171_v13 }
 0x171   :  { %v4714_v35 = vmov %v4713_v34  ;;  %v1166_v39 = vadd.f32 %v1164_v42, %v1064_v53  ;;  %v4715_v49 = vstv %s4566_s10  ;;  %v4717_v30 = vstv %s3181_s12  ;;  %s4722_s12 = sld [smem:[#allocation93_spill]] }
 0x172   :  { %v1208_v60 = vmul.f32 %v4714_v35, %v1172_v23  ;;  %v1195_v8 = vcombine.low %v1191_v11, %v1192_v4  ;;  %v1223_v50 = vmul.f32 %v4715_v49, %v1171_v13  ;;  %v4716_v18 = vmov %v4715_v49  ;;  %s4725_s10 = sld [smem:[#allocation94_spill]]  ;;  %v1372_v11 = vpop.permute.xlu0 %1371 }
 0x173   :  { %v1224_v61 = vmul.f32 %v4716_v18, %v1172_v23  ;;  %v1186_v48 = vrot.slane %v1179_v38, %v2951_v6  ;;  %v1239_v27 = vmul.f32 %v4717_v30, %v1171_v13  ;;  %v4718_v9 = vmov %v4717_v30 }
 0x174   :  { %v1211_v7 = vcombine.low %v1207_v5, %v1208_v60  ;;  %v1240_v25 = vmul.f32 %v4718_v9, %v1172_v23  ;;  %v1202_v51 = vrot.slane %v1195_v8, %v2951_v6  ;;  %v4719_v14 = vstv %s4567_s13  ;;  %s3994_s13 = sld [smem:[#allocation2 + $0x49]] }
 0x175   :  { %v1227_v45 = vcombine.low %v1223_v50, %v1224_v61  ;;  %v1255_v15 = vmul.f32 %v4719_v14, %v1171_v13  ;;  %v4720_v52 = vmov %v4719_v14  ;;  %v1188_v63 = vadd.f32 %v1186_v48, %v1086_v36 }
 0x176   :  { %v1256_v16 = vmul.f32 %v4720_v52, %v1172_v23  ;;  %v1218_v26 = vrot.slane %v1211_v7, %v2951_v6  ;;  %v1243_v44 = vcombine.low %v1239_v27, %v1240_v25  ;;  %v1273_v0 = vsel %vm416_vm3, %v1270_v62, %v1272_v24 }
 0x177   :  { %v1204_v40 = vadd.f32 %v1202_v51, %v1102_v29  ;;  %v1234_v53 = vrot.slane %v1227_v45, %v2951_v6  ;;  %v1274_v17 = vsel %vm416_vm3, %v1272_v24, %v1270_v62  ;;  %v4723_v19 = vstv %s4569_s7  ;;  %s4742_s7 = sld [smem:[#allocation36_spill]] }
 0x178   :  { %v1259_v46 = vcombine.low %v1255_v15, %v1256_v16  ;;  %v1220_v37 = vadd.f32 %v1218_v26, %v1118_v12  ;;  %v1250_v57 = vrot.slane %v1243_v44, %v2951_v6  ;;  %v1277_v54 = vmul.f32 %v4723_v19, %v1273_v0 }
 0x179   :  { %v4724_v55 = vmov %v4723_v19  ;;  %v1236_v31 = vadd.f32 %v1234_v53, %v1134_v33  ;;  %v4726_v36 = vstv %s4570_s3  ;;  %v4728_v3 = vstv %s4721_s14  ;;  %s4736_s3 = sld [smem:[#allocation33_spill]] }
 0x17a   :  { %v1278_v1 = vmul.f32 %v4724_v55, %v1274_v17  ;;  %v1266_v56 = vrot.slane %v1259_v46, %v2951_v6  ;;  %v1293_v2 = vmul.f32 %v4726_v36, %v1273_v0  ;;  %v4727_v21 = vmov %v4726_v36  ;;  %v1476_v36 = vpop.permute.xlu1 %1475  ;;  %s4066_s14 = sld [smem:[#allocation2 + $0x66]] }
 0x17b   :  { %v1294_v13 = vmul.f32 %v4727_v21, %v1274_v17  ;;  %v1252_v29 = vadd.f32 %v1250_v57, %v1150_v59  ;;  %v1309_v23 = vmul.f32 %v4728_v3, %v1273_v0  ;;  %v4729_v12 = vmov %v4728_v3 }
 0x17c   :  { %v1281_v41 = vcombine.low %v1277_v54, %v1278_v1  ;;  %v1310_v43 = vmul.f32 %v4729_v12, %v1274_v17  ;;  %v1268_v32 = vadd.f32 %v1266_v56, %v1166_v39  ;;  %v4730_v20 = vstv %s4722_s12  ;;  %s4073_s12 = sld [smem:[#allocation2 + $0x81]] }
 0x17d   :  { %v1297_v10 = vcombine.low %v1293_v2, %v1294_v13  ;;  %v1325_v58 = vmul.f32 %v4730_v20, %v1273_v0  ;;  %v4731_v33 = vmov %v4730_v20  ;;  %v4732_v38 = vstv %s4725_s10  ;;  %v1474_v2 = vpop.permute.xlu0 %1473  ;;  %s4075_s10 = sld [smem:[#allocation2 + $0x9c]] }
 0x17e   :  { %v1326_v42 = vmul.f32 %v4731_v33, %v1274_v17  ;;  %v1288_v28 = vrot.slane %v1281_v41, %v2951_v6  ;;  %v1313_v4 = vcombine.low %v1309_v23, %v1310_v43  ;;  %v1341_v59 = vmul.f32 %v4732_v38, %v1273_v0 }
 0x17f   :  { %v4733_v34 = vmov %v4732_v38  ;;  %v1304_v35 = vrot.slane %v1297_v10, %v2951_v6  ;;  %v4734_v39 = vstv %s4575_s23  ;;  %v1375_v62 = vsel %vm519_vm4, %v1372_v11, %v1374_v47  ;;  %s4739_s23 = sld [smem:[#allocation35_spill]] }
 0x180   :  { %v1342_v5 = vmul.f32 %v4733_v34, %v1274_v17  ;;  %v1329_v60 = vcombine.low %v1325_v58, %v1326_v42  ;;  %v1357_v8 = vmul.f32 %v4734_v39, %v1273_v0  ;;  %v4735_v49 = vmov %v4734_v39 }
 0x181   :  { %v1358_v50 = vmul.f32 %v4735_v49, %v1274_v17  ;;  %v1290_v18 = vadd.f32 %v1288_v28, %v1188_v63  ;;  %v1320_v61 = vrot.slane %v1313_v4, %v2951_v6  ;;  %v1306_v48 = vadd.f32 %v1304_v35, %v1204_v40 }
 0x182   :  { %v1345_v24 = vcombine.low %v1341_v59, %v1342_v5  ;;  %v1336_v7 = vrot.slane %v1329_v60, %v2951_v6  ;;  %v1376_v27 = vsel %vm519_vm4, %v1374_v47, %v1372_v11  ;;  %v4737_v51 = vstv %s4576_s9  ;;  %s3981_s9 = sld [smem:[#allocation2 + $0x99]] }
 0x183   :  { %v1361_v30 = vcombine.low %v1357_v8, %v1358_v50  ;;  %v1322_v9 = vadd.f32 %v1320_v61, %v1220_v37  ;;  %v1379_v45 = vmul.f32 %v4737_v51, %v1375_v62  ;;  %v4738_v14 = vmov %v4737_v51 }
 0x184   :  { %v1352_v25 = vrot.slane %v1345_v24, %v2951_v6  ;;  %v1380_v15 = vmul.f32 %v4738_v14, %v1376_v27  ;;  %v1338_v52 = vadd.f32 %v1336_v7, %v1236_v31  ;;  %v4740_v63 = vstv %s4577_s18  ;;  %s4751_s18 = sld [smem:[#allocation98_spill]] }
 0x185   :  { %v1368_v16 = vrot.slane %v1361_v30, %v2951_v6  ;;  %v1395_v26 = vmul.f32 %v4740_v63, %v1375_v62  ;;  %v4741_v44 = vmov %v4740_v63  ;;  %v4743_v46 = vstv %s4736_s3  ;;  %v1578_v63 = vpop.permute.xlu1 %1577  ;;  %s4079_s3 = sld [smem:[#allocation2 + $0x16]] }
 0x186   :  { %v1396_v0 = vmul.f32 %v4741_v44, %v1376_v27  ;;  %v1354_v40 = vadd.f32 %v1352_v25, %v1252_v29  ;;  %v1383_v53 = vcombine.low %v1379_v45, %v1380_v15  ;;  %v1411_v17 = vmul.f32 %v4743_v46, %v1375_v62 }
 0x187   :  { %v4744_v37 = vmov %v4743_v46  ;;  %v1370_v19 = vadd.f32 %v1368_v16, %v1268_v32  ;;  %v4745_v55 = vstv %s4579_s0  ;;  %v4747_v41 = vstv %s4739_s23  ;;  %s4776_s0 = sld [smem:[#allocation69_spill]] }
 0x188   :  { %v1412_v57 = vmul.f32 %v4744_v37, %v1376_v27  ;;  %v1399_v54 = vcombine.low %v1395_v26, %v1396_v0  ;;  %v1427_v1 = vmul.f32 %v4745_v55, %v1375_v62  ;;  %v4746_v31 = vmov %v4745_v55  ;;  %v1576_v26 = vpop.permute.xlu0 %1575  ;;  %s4084_s23 = sld [smem:[#allocation2 + $0x31]] }
 0x189   :  { %v1428_v56 = vmul.f32 %v4746_v31, %v1376_v27  ;;  %v1390_v21 = vrot.slane %v1383_v53, %v2951_v6  ;;  %v1443_v29 = vmul.f32 %v4747_v41, %v1375_v62  ;;  %v4748_v3 = vmov %v4747_v41 }
 0x18a   :  { %v1415_v13 = vcombine.low %v1411_v17, %v1412_v57  ;;  %v1444_v23 = vmul.f32 %v4748_v3, %v1376_v27  ;;  %v1406_v12 = vrot.slane %v1399_v54, %v2951_v6  ;;  %v4749_v32 = vstv %s4742_s7  ;;  %s4089_s7 = sld [smem:[#allocation2 + $0x4c]] }
 0x18b   :  { %v1431_v43 = vcombine.low %v1427_v1, %v1428_v56  ;;  %v1459_v10 = vmul.f32 %v4749_v32, %v1375_v62  ;;  %v4750_v20 = vmov %v4749_v32  ;;  %v1392_v33 = vadd.f32 %v1390_v21, %v1290_v18 }
 0x18c   :  { %v1460_v58 = vmul.f32 %v4750_v20, %v1376_v27  ;;  %v1422_v42 = vrot.slane %v1415_v13, %v2951_v6  ;;  %v1447_v47 = vcombine.low %v1443_v29, %v1444_v23  ;;  %v1477_v11 = vsel %vm622_vm5, %v1474_v2, %v1476_v36 }
 0x18d   :  { %v1408_v28 = vadd.f32 %v1406_v12, %v1306_v48  ;;  %v1438_v4 = vrot.slane %v1431_v43, %v2951_v6  ;;  %v1478_v59 = vsel %vm622_vm5, %v1476_v36, %v1474_v2  ;;  %v4752_v35 = vstv %s4583_s4  ;;  %s4764_s4 = sld [smem:[#allocation68_spill]] }
 0x18e   :  { %v1463_v38 = vcombine.low %v1459_v10, %v1460_v58  ;;  %v1424_v34 = vadd.f32 %v1422_v42, %v1322_v9  ;;  %v1454_v5 = vrot.slane %v1447_v47, %v2951_v6  ;;  %v1481_v60 = vmul.f32 %v4752_v35, %v1477_v11 }
 0x18f   :  { %v4753_v39 = vmov %v4752_v35  ;;  %v1440_v49 = vadd.f32 %v1438_v4, %v1338_v52  ;;  %v4754_v18 = vstv %s4584_s8  ;;  %v4756_v30 = vstv %s4751_s18  ;;  %s3944_s8 = sld [smem:[#allocation2 + $0x13]] }
 0x190   :  { %v1482_v8 = vmul.f32 %v4753_v39, %v1478_v59  ;;  %v1470_v50 = vrot.slane %v1463_v38, %v2951_v6  ;;  %v1497_v61 = vmul.f32 %v4754_v18, %v1477_v11  ;;  %v4755_v24 = vmov %v4754_v18  ;;  %v1680_v18 = vpop.permute.xlu1 %1679  ;;  %s4093_s18 = sld [smem:[#allocation2 + $0x67]] }
 0x191   :  { %v1498_v62 = vmul.f32 %v4755_v24, %v1478_v59  ;;  %v1456_v48 = vadd.f32 %v1454_v5, %v1354_v40  ;;  %v1513_v27 = vmul.f32 %v4756_v30, %v1477_v11  ;;  %v4757_v9 = vmov %v4756_v30 }
 0x192   :  { %v1485_v7 = vcombine.low %v1481_v60, %v1482_v8  ;;  %v1514_v25 = vmul.f32 %v4757_v9, %v1478_v59  ;;  %v1472_v51 = vadd.f32 %v1470_v50, %v1370_v19  ;;  %v4758_v14 = vstv %s4586_s11  ;;  %s3988_s11 = sld [smem:[#allocation2 + $0x2e]] }
 0x193   :  { %v1501_v45 = vcombine.low %v1497_v61, %v1498_v62  ;;  %v1529_v15 = vmul.f32 %v4758_v14, %v1477_v11  ;;  %v4759_v52 = vmov %v4758_v14  ;;  %v4760_v53 = vstv %s3288_s19  ;;  %v1678_v61 = vpop.permute.xlu0 %1677  ;;  %s3964_s19 = sld [smem:[#allocation2 + $0x48]] }
 0x194   :  { %v1530_v16 = vmul.f32 %v4759_v52, %v1478_v59  ;;  %v1492_v44 = vrot.slane %v1485_v7, %v2951_v6  ;;  %v1517_v0 = vcombine.low %v1513_v27, %v1514_v25  ;;  %v1545_v40 = vmul.f32 %v4760_v53, %v1477_v11 }
 0x195   :  { %v4761_v46 = vmov %v4760_v53  ;;  %v1508_v37 = vrot.slane %v1501_v45, %v2951_v6  ;;  %v4762_v19 = vstv %s4587_s20  ;;  %v1579_v2 = vsel %vm725_vm6, %v1576_v26, %v1578_v63  ;;  %s3957_s20 = sld [smem:[#allocation2 + $0x2d]] }
 0x196   :  { %v1546_v17 = vmul.f32 %v4761_v46, %v1478_v59  ;;  %v1533_v57 = vcombine.low %v1529_v15, %v1530_v16  ;;  %v1561_v54 = vmul.f32 %v4762_v19, %v1477_v11  ;;  %v4763_v55 = vmov %v4762_v19 }
 0x197   :  { %v1562_v1 = vmul.f32 %v4763_v55, %v1478_v59  ;;  %v1494_v31 = vadd.f32 %v1492_v44, %v1392_v33  ;;  %v1524_v56 = vrot.slane %v1517_v0, %v2951_v6  ;;  %v1510_v21 = vadd.f32 %v1508_v37, %v1408_v28 }
 0x198   :  { %v1549_v36 = vcombine.low %v1545_v40, %v1546_v17  ;;  %v1540_v13 = vrot.slane %v1533_v57, %v2951_v6  ;;  %v1580_v29 = vsel %vm725_vm6, %v1578_v63, %v1576_v26  ;;  %v4765_v12 = vstv %s3300_s26  ;;  %s4783_s26 = sld [smem:[#allocation86_spill]] }
 0x199   :  { %v1565_v41 = vcombine.low %v1561_v54, %v1562_v1  ;;  %v1526_v3 = vadd.f32 %v1524_v56, %v1424_v34  ;;  %v1583_v43 = vmul.f32 %v4765_v12, %v1579_v2  ;;  %v4766_v32 = vmov %v4765_v12 }
 0x19a   :  { %v1556_v23 = vrot.slane %v1549_v36, %v2951_v6  ;;  %v1584_v10 = vmul.f32 %v4766_v32, %v1580_v29  ;;  %v1542_v20 = vadd.f32 %v1540_v13, %v1440_v49  ;;  %v4767_v33 = vstv %s3306_s6  ;;  %s3950_s6 = sld [smem:[#allocation2 + $0x12]] }
 0x19b   :  { %v1572_v58 = vrot.slane %v1565_v41, %v2951_v6  ;;  %v1599_v42 = vmul.f32 %v4767_v33, %v1579_v2  ;;  %v4768_v47 = vmov %v4767_v33  ;;  %v4769_v38 = vstv %s4764_s4  ;;  %s4098_s4 = sld [smem:[#allocation2 + $0x82]] }
 0x19c   :  { %v1600_v11 = vmul.f32 %v4768_v47, %v1580_v29  ;;  %v1558_v28 = vadd.f32 %v1556_v23, %v1456_v48  ;;  %v1587_v4 = vcombine.low %v1583_v43, %v1584_v10  ;;  %v1615_v59 = vmul.f32 %v4769_v38, %v1579_v2 }
 0x19d   :  { %v4770_v34 = vmov %v4769_v38  ;;  %v1574_v35 = vadd.f32 %v1572_v58, %v1472_v51  ;;  %v4771_v39 = vstv %s3318_s24  ;;  %v4773_v48 = vstv %s3324_s5  ;;  %s3969_s5 = sld [smem:[#allocation2 + $0x63]] }
 0x19e   :  { %v1616_v5 = vmul.f32 %v4770_v34, %v1580_v29  ;;  %v1603_v60 = vcombine.low %v1599_v42, %v1600_v11  ;;  %v1631_v8 = vmul.f32 %v4771_v39, %v1579_v2  ;;  %v4772_v49 = vmov %v4771_v39  ;;  %s3974_s24 = sld [smem:[#allocation2 + $0x7e]] }
 0x19f   :  { %v1632_v50 = vmul.f32 %v4772_v49, %v1580_v29  ;;  %v1594_v24 = vrot.slane %v1587_v4, %v2951_v6  ;;  %v1647_v7 = vmul.f32 %v4773_v48, %v1579_v2  ;;  %v4774_v30 = vmov %v4773_v48 }
 0x1a0   :  { %v1619_v62 = vcombine.low %v1615_v59, %v1616_v5  ;;  %v1648_v27 = vmul.f32 %v4774_v30, %v1580_v29  ;;  %v1610_v9 = vrot.slane %v1603_v60, %v2951_v6  ;;  %v4775_v51 = vstv %s3330_s2  ;;  %s4021_s2 = sld [smem:[#allocation2 + $0x2f]] }
 0x1a1   :  { %v1635_v25 = vcombine.low %v1631_v8, %v1632_v50  ;;  %v1663_v45 = vmul.f32 %v4775_v51, %v1579_v2  ;;  %v4777_v14 = vmov %v4775_v51  ;;  %v1596_v52 = vadd.f32 %v1594_v24, %v1494_v31 }
 0x1a2   :  { %v1664_v15 = vmul.f32 %v4777_v14, %v1580_v29  ;;  %v1626_v16 = vrot.slane %v1619_v62, %v2951_v6  ;;  %v1651_v63 = vcombine.low %v1647_v7, %v1648_v27  ;;  %v1681_v26 = vsel %vm828_vm7, %v1678_v61, %v1680_v18  ;;  %v2836_v62 = vld [vmem:[#allocation8 + $0x8] sm:$0xf] }
 0x1a3   :  { %v1612_v44 = vadd.f32 %v1610_v9, %v1510_v21  ;;  %v1642_v0 = vrot.slane %v1635_v25, %v2951_v6  ;;  %v1682_v40 = vsel %vm828_vm7, %v1680_v18, %v1678_v61  ;;  %v4778_v37 = vstv %s4776_s0  ;;  %s4117_s0 = sld [smem:[#allocation2 + $0x4d]] }
 0x1a4   :  { %v1667_v53 = vcombine.low %v1663_v45, %v1664_v15  ;;  %v1628_v46 = vadd.f32 %v1626_v16, %v1526_v3  ;;  %v1658_v17 = vrot.slane %v1651_v63, %v2951_v6  ;;  %v1685_v57 = vmul.f32 %v4778_v37, %v1681_v26 }
 0x1a5   :  { %v4779_v19 = vmov %v4778_v37  ;;  %v1644_v55 = vadd.f32 %v1642_v0, %v1542_v20  ;;  %v4780_v31 = vstv %s4588_s22  ;;  %v4782_v41 = vstv %s4589_s17  ;;  %s4000_s22 = sld [smem:[#allocation2 + $0x64]] }
 0x1a6   :  { %v1686_v54 = vmul.f32 %v4779_v19, %v1682_v40  ;;  %v1674_v1 = vrot.slane %v1667_v53, %v2951_v6  ;;  %v1701_v56 = vmul.f32 %v4780_v31, %v1681_v26  ;;  %v4781_v36 = vmov %v4780_v31  ;;  %s4007_s17 = sld [smem:[#allocation2 + $0x7f]]  ;;  %v1816_v19 = vpop.permute.xlu0 %1815 }
 0x1a7   :  { %v1702_v2 = vmul.f32 %v4781_v36, %v1682_v40  ;;  %v1660_v21 = vadd.f32 %v1658_v17, %v1558_v28  ;;  %v1717_v29 = vmul.f32 %v4782_v41, %v1681_v26  ;;  %v4784_v3 = vmov %v4782_v41 }
 0x1a8   :  { %v1689_v13 = vcombine.low %v1685_v57, %v1686_v54  ;;  %v1718_v23 = vmul.f32 %v4784_v3, %v1682_v40  ;;  %v1676_v12 = vadd.f32 %v1674_v1, %v1574_v35  ;;  %v4785_v32 = vstv %s4590_s15  ;;  %s4014_s15 = sld [smem:[#allocation2 + $0x9a]] }
 0x1a9   :  { %v1705_v43 = vcombine.low %v1701_v56, %v1702_v2  ;;  %v1733_v10 = vmul.f32 %v4785_v32, %v1681_v26  ;;  %v4786_v20 = vmov %v4785_v32  ;;  %v4787_v47 = vstv %s3373_s30  ;;  %s4018_s30 = sld [smem:[#allocation2 + $0x14]] }
 0x1aa   :  { %v1734_v58 = vmul.f32 %v4786_v20, %v1682_v40  ;;  %v1696_v33 = vrot.slane %v1689_v13, %v2951_v6  ;;  %v1721_v42 = vcombine.low %v1717_v29, %v1718_v23  ;;  %v1749_v11 = vmul.f32 %v4787_v47, %v1681_v26 }
 0x1ab   :  { %v4788_v28 = vmov %v4787_v47  ;;  %v1712_v38 = vrot.slane %v1705_v43, %v2951_v6  ;;  %v4789_v34 = vstv %s4783_s26  ;;  %v1781_v50 = vstv %s3950_s6  ;;  %s4104_s6 = sld [smem:[#allocation2 + $0x17]] }
 0x1ac   :  { %v1750_v4 = vmul.f32 %v4788_v28, %v1682_v40  ;;  %v1737_v59 = vcombine.low %v1733_v10, %v1734_v58  ;;  %v1765_v5 = vmul.f32 %v4789_v34, %v1681_v26  ;;  %v4790_v35 = vmov %v4789_v34  ;;  %s4145_s26 = sld [smem:[#allocation2 + $0x4e]] }
 0x1ad   :  { %v1766_v60 = vmul.f32 %v4790_v35, %v1682_v40  ;;  %v1698_v39 = vadd.f32 %v1696_v33, %v1596_v52  ;;  %v1728_v8 = vrot.slane %v1721_v42, %v2951_v6  ;;  %v1714_v18 = vadd.f32 %v1712_v38, %v1612_v44  ;;  %v1818_v40 = vpop.permute.xlu1 %1817 }
 0x1ae   :  { %v1753_v49 = vcombine.low %v1749_v11, %v1750_v4  ;;  %v1744_v61 = vrot.slane %v1737_v59, %v2951_v6  ;;  %v1782_v48 = vmul.f32 %v2836_v62, %v1781_v50  ;;  %v1785_v27 = vstv %s3957_s20  ;;  %s4114_s20 = sld [smem:[#allocation2 + $0x32]] }
 0x1af   :  { %v1769_v24 = vcombine.low %v1765_v5, %v1766_v60  ;;  %v1730_v7 = vadd.f32 %v1728_v8, %v1628_v46  ;;  %v1789_v9 = vstv %s3964_s19  ;;  %v1786_v45 = vmul.f32 %v2836_v62, %v1785_v27  ;;  %s4121_s19 = sld [smem:[#allocation2 + $0x68]] }
 0x1b0   :  { %v1760_v30 = vrot.slane %v1753_v49, %v2951_v6  ;;  %v1746_v25 = vadd.f32 %v1744_v61, %v1644_v55  ;;  %v1790_v14 = vmul.f32 %v2836_v62, %v1789_v9  ;;  %v1793_v52 = vstv %s3969_s5  ;;  %s4129_s5 = sld [smem:[#allocation2 + $0x83]] }
 0x1b1   :  { %v1776_v51 = vrot.slane %v1769_v24, %v2951_v6  ;;  %v1797_v16 = vstv %s3974_s24  ;;  %v1801_v63 = vstv %s3981_s9  ;;  %v1794_v44 = vmul.f32 %v2836_v62, %v1793_v52  ;;  %v1918_v24 = vpop.permute.xlu0 %1917  ;;  %s4131_s24 = sld [smem:[#allocation2 + $0x9e]] }
 0x1b2   :  { %v1762_v15 = vadd.f32 %v1760_v30, %v1660_v21  ;;  %v1798_v0 = vmul.f32 %v2836_v62, %v1797_v16  ;;  %v1802_v53 = vmul.f32 %v2836_v62, %v1801_v63  ;;  %v1822_v46 = vstv %s3944_s8  ;;  %s4102_s8 = sld [smem:[#allocation2 + $0x9d]] }
 0x1b3   :  { %v1778_v26 = vadd.f32 %v1776_v51, %v1676_v12  ;;  %v1838_v17 = vstv %s3988_s11  ;;  %v1854_v37 = vstv %s3994_s13  ;;  %v1870_v57 = vstv %s4000_s22  ;;  %s4135_s9 = sld [smem:[#allocation2 + $0x18]] }
 0x1b4   :  { %v1886_v54 = vstv %s4007_s17  ;;  %v1902_v55 = vstv %s4014_s15  ;;  %v1783_v1 = vadd.f32 %v1782_v48, %v1698_v39  ;;  %v1787_v31 = vadd.f32 %v1786_v45, %v1714_v18  ;;  %v1920_v18 = vpop.permute.xlu1 %1919  ;;  %s4140_s11 = sld [smem:[#allocation2 + $0x33]] }
 0x1b5   :  { %v1791_v56 = vadd.f32 %v1790_v14, %v1730_v7  ;;  %v1795_v36 = vadd.f32 %v1794_v44, %v1746_v25  ;;  %v1799_v2 = vadd.f32 %v1798_v0, %v1762_v15  ;;  %v1803_v21 = vadd.f32 %v1802_v53, %v1778_v26  ;;  %s4149_s13 = sld [smem:[#allocation2 + $0x69]] }
 0x1b6   :  { %v1819_v13 = vsel %vm107_vm2, %v1816_v19, %v1818_v40  ;;  %v1820_v41 = vsel %vm107_vm2, %v1818_v40, %v1816_v19  ;;  %v1924_v29 = vstv %s4018_s30  ;;  %v1940_v3 = vstv %s4021_s2  ;;  %s4154_s22 = sld [smem:[#allocation2 + $0x84]] }
 0x1b7   :  { %v1823_v23 = vmul.f32 %v1822_v46, %v1819_v13  ;;  %v1824_v12 = vmul.f32 %v1822_v46, %v1820_v41  ;;  %v1839_v43 = vmul.f32 %v1838_v17, %v1819_v13  ;;  %v1840_v32 = vmul.f32 %v1838_v17, %v1820_v41  ;;  %s4158_s17 = sld [smem:[#allocation2 + $0x9f]] }
 0x1b8   :  { %v1855_v10 = vmul.f32 %v1854_v37, %v1819_v13  ;;  %v1856_v20 = vmul.f32 %v1854_v37, %v1820_v41  ;;  %v1871_v58 = vmul.f32 %v1870_v57, %v1819_v13  ;;  %v1872_v33 = vmul.f32 %v1870_v57, %v1820_v41  ;;  %s4160_s15 = sld [smem:[#allocation2 + $0x19]] }
 0x1b9   :  { %v1827_v42 = vcombine.low %v1823_v23, %v1824_v12  ;;  %v1843_v47 = vcombine.low %v1839_v43, %v1840_v32  ;;  %v1887_v11 = vmul.f32 %v1886_v54, %v1819_v13  ;;  %v1888_v28 = vmul.f32 %v1886_v54, %v1820_v41  ;;  %v2020_v12 = vpop.permute.xlu0 %2019  ;;  %s4167_s30 = sld [smem:[#allocation2 + $0x34]] }
 0x1ba   :  { %v1859_v4 = vcombine.low %v1855_v10, %v1856_v20  ;;  %v1875_v38 = vcombine.low %v1871_v58, %v1872_v33  ;;  %v1903_v59 = vmul.f32 %v1902_v55, %v1819_v13  ;;  %v1904_v34 = vmul.f32 %v1902_v55, %v1820_v41  ;;  %s4172_s2 = sld [smem:[#allocation2 + $0x4f]] }
 0x1bb   :  { %v1834_v5 = vrot.slane %v1827_v42, %v2951_v6  ;;  %v1850_v35 = vrot.slane %v1843_v47, %v2951_v6  ;;  %v1891_v60 = vcombine.low %v1887_v11, %v1888_v28  ;;  %v1956_v39 = vstv %s4034_s28  ;;  %s4181_s28 = sld [smem:[#allocation2 + $0x6a]] }
 0x1bc   :  { %v1866_v8 = vrot.slane %v1859_v4, %v2951_v6  ;;  %v1882_v49 = vrot.slane %v1875_v38, %v2951_v6  ;;  %v1907_v50 = vcombine.low %v1903_v59, %v1904_v34  ;;  %v1972_v61 = vstv %s4038_s29  ;;  %s4189_s29 = sld [smem:[#allocation2 + $0x85]] }
 0x1bd   :  { %v1836_v62 = vadd.f32 %v1834_v5, %v1783_v1  ;;  %v1852_v48 = vadd.f32 %v1850_v35, %v1787_v31  ;;  %v1898_v7 = vrot.slane %v1891_v60, %v2951_v6  ;;  %v1988_v30 = vstv %s4040_s21  ;;  %s4197_s21 = sld [smem:[#allocation2 + $0xa0]] }
 0x1be   :  { %v1868_v27 = vadd.f32 %v1866_v8, %v1791_v56  ;;  %v1884_v9 = vadd.f32 %v1882_v49, %v1795_v36  ;;  %v1914_v25 = vrot.slane %v1907_v50, %v2951_v6  ;;  %v2004_v51 = vstv %s4048_s25  ;;  %s4201_s25 = sld [smem:[#allocation2 + $0x1a]] }
 0x1bf   :  { %v1900_v45 = vadd.f32 %v1898_v7, %v1799_v2  ;;  %v1921_v14 = vsel %vm210_vm0, %v1918_v24, %v1920_v18  ;;  %v1922_v15 = vsel %vm210_vm0, %v1920_v18, %v1918_v24  ;;  %v2026_v52 = vstv %s4050_s16  ;;  %s4203_s16 = sld [smem:[#allocation2 + $0x35]] }
 0x1c0   :  { %v1916_v16 = vadd.f32 %v1914_v25, %v1803_v21  ;;  %v1925_v63 = vmul.f32 %v1924_v29, %v1921_v14  ;;  %v1926_v26 = vmul.f32 %v1924_v29, %v1922_v15  ;;  %v1941_v44 = vmul.f32 %v1940_v3, %v1921_v14 }
 0x1c1   :  { %v1942_v0 = vmul.f32 %v1940_v3, %v1922_v15  ;;  %v1957_v53 = vmul.f32 %v1956_v39, %v1921_v14  ;;  %v1958_v40 = vmul.f32 %v1956_v39, %v1922_v15  ;;  %v1973_v46 = vmul.f32 %v1972_v61, %v1921_v14  ;;  %v2022_v3 = vpop.permute.xlu1 %2021 }
 0x1c2   :  { %v1929_v17 = vcombine.low %v1925_v63, %v1926_v26  ;;  %v1974_v37 = vmul.f32 %v1972_v61, %v1922_v15  ;;  %v1989_v57 = vmul.f32 %v1988_v30, %v1921_v14  ;;  %v1990_v19 = vmul.f32 %v1988_v30, %v1922_v15 }
 0x1c3   :  { %v1945_v54 = vcombine.low %v1941_v44, %v1942_v0  ;;  %v1961_v55 = vcombine.low %v1957_v53, %v1958_v40  ;;  %v2005_v1 = vmul.f32 %v2004_v51, %v1921_v14  ;;  %v2006_v31 = vmul.f32 %v2004_v51, %v1922_v15  ;;  %v2122_v53 = vpop.permute.xlu0 %2121 }
 0x1c4   :  { %v1936_v56 = vrot.slane %v1929_v17, %v2951_v6  ;;  %v1977_v36 = vcombine.low %v1973_v46, %v1974_v37  ;;  %v1993_v2 = vcombine.low %v1989_v57, %v1990_v19  ;;  %v2042_v21 = vstv %s4058_s1  ;;  %s4209_s1 = sld [smem:[#allocation2 + $0x50]] }
 0x1c5   :  { %v1952_v13 = vrot.slane %v1945_v54, %v2951_v6  ;;  %v1968_v41 = vrot.slane %v1961_v55, %v2951_v6  ;;  %v2009_v29 = vcombine.low %v2005_v1, %v2006_v31  ;;  %v2058_v23 = vstv %s4062_s27  ;;  %v2124_v44 = vpop.permute.xlu1 %2123  ;;  %s4218_s27 = sld [smem:[#allocation2 + $0x6b]] }
 0x1c6   :  { %v1938_v43 = vadd.f32 %v1936_v56, %v1836_v62  ;;  %v1984_v32 = vrot.slane %v1977_v36, %v2951_v6  ;;  %v2000_v10 = vrot.slane %v1993_v2, %v2951_v6  ;;  %v2074_v20 = vstv %s4066_s14  ;;  %s4228_s14 = sld [smem:[#allocation2 + $0x86]] }
 0x1c7   :  { %v1954_v58 = vadd.f32 %v1952_v13, %v1852_v48  ;;  %v1970_v33 = vadd.f32 %v1968_v41, %v1868_v27  ;;  %v2016_v42 = vrot.slane %v2009_v29, %v2951_v6  ;;  %v2090_v47 = vstv %s4073_s12  ;;  %s4236_s12 = sld [smem:[#allocation2 + $0xa1]] }
 0x1c8   :  { %v1986_v11 = vadd.f32 %v1984_v32, %v1884_v9  ;;  %v2002_v28 = vadd.f32 %v2000_v10, %v1900_v45  ;;  %v2106_v4 = vstv %s4075_s10  ;;  %v2023_v38 = vsel %vm313_vm1, %v2020_v12, %v2022_v3  ;;  %s2918_s10 = smov [#allocation9]  }
 0x1c9   :  { %v2018_v59 = vadd.f32 %v2016_v42, %v1916_v16  ;;  %v2024_v34 = vsel %vm313_vm1, %v2022_v3, %v2020_v12  ;;  %v2027_v5 = vmul.f32 %v2026_v52, %v2023_v38  ;;  %v2043_v35 = vmul.f32 %v2042_v21, %v2023_v38 }
 0x1ca   :  { %v2028_v60 = vmul.f32 %v2026_v52, %v2024_v34  ;;  %v2044_v39 = vmul.f32 %v2042_v21, %v2024_v34  ;;  %v2059_v8 = vmul.f32 %v2058_v23, %v2023_v38  ;;  %v2060_v49 = vmul.f32 %v2058_v23, %v2024_v34 }
 0x1cb   :  { %v2075_v50 = vmul.f32 %v2074_v20, %v2023_v38  ;;  %v2076_v18 = vmul.f32 %v2074_v20, %v2024_v34  ;;  %v2091_v61 = vmul.f32 %v2090_v47, %v2023_v38  ;;  %v2092_v24 = vmul.f32 %v2090_v47, %v2024_v34 }
 0x1cc   :  { %v2031_v62 = vcombine.low %v2027_v5, %v2028_v60  ;;  %v2047_v48 = vcombine.low %v2043_v35, %v2044_v39  ;;  %v2063_v7 = vcombine.low %v2059_v8, %v2060_v49  ;;  %v2107_v30 = vmul.f32 %v2106_v4, %v2023_v38  ;;  %v2226_v35 = vpop.permute.xlu1 %2225  ;;  %v2224_v39 = vpop.permute.xlu0 %2223 }
 0x1cd   :  { %v2079_v27 = vcombine.low %v2075_v50, %v2076_v18  ;;  %v2095_v9 = vcombine.low %v2091_v61, %v2092_v24  ;;  %v2108_v25 = vmul.f32 %v2106_v4, %v2024_v34  ;;  %v2128_v51 = vstv %s4079_s3  ;;  %s2646_s3 = sshll.u32 %s2918_s10, 4  ;;  %s2647_s3 = int_to_ptr.vmem [resolvable:$true] %s2646_s3 }
 0x1ce   :  { %v2038_v45 = vrot.slane %v2031_v62, %v2951_v6  ;;  %v2054_v14 = vrot.slane %v2047_v48, %v2951_v6  ;;  %v2070_v15 = vrot.slane %v2063_v7, %v2951_v6  ;;  %v2144_v52 = vstv %s4084_s23  ;;  %s2878_s23 = scalar_lea.vmem %s2647_s3, 384  ;;  %p2883_p11 = scmp.lt.s32.totalorder %s2647_s3, %s2647_s3 }
 0x1cf   :  { %v2086_v16 = vrot.slane %v2079_v27, %v2951_v6  ;;  %v2102_v63 = vrot.slane %v2095_v9, %v2951_v6  ;;  %v2111_v26 = vcombine.low %v2107_v30, %v2108_v25  ;;  %v2160_v0 = vstv %s4089_s7  ;;  %p2879_p10 = scmp.ne.s32.totalorder %s2647_s3, %s2878_s23  ;;  %p2884_p12 = scmp.lt.s32.totalorder %s2878_s23, %s2878_s23 }
 0x1d0   :  { %v2040_v40 = vadd.f32 %v2038_v45, %v1938_v43  ;;  %v2056_v46 = vadd.f32 %v2054_v14, %v1954_v58  ;;  %v2072_v17 = vadd.f32 %v2070_v15, %v1970_v33  ;;  %v2176_v37 = vstv %s4093_s18 }
 0x1d1   :  { %v2088_v57 = vadd.f32 %v2086_v16, %v1986_v11  ;;  %v2104_v19 = vadd.f32 %v2102_v63, %v2002_v28  ;;  %v2118_v54 = vrot.slane %v2111_v26, %v2951_v6  ;;  %v2192_v55 = vstv %s4098_s4  ;;  %p2885_p13 = por %p2884_p12, %p2883_p11 }
 0x1d2   :  { %v2208_v1 = vstv %s4102_s8  ;;  %v2125_v31 = vsel %vm416_vm3, %v2122_v53, %v2124_v44  ;;  %v2126_v56 = vsel %vm416_vm3, %v2124_v44, %v2122_v53  ;;  %v2230_v36 = vstv %s4104_s6 }
 0x1d3   :  { %v2120_v2 = vadd.f32 %v2118_v54, %v2018_v59  ;;  %v2129_v21 = vmul.f32 %v2128_v51, %v2125_v31  ;;  %v2130_v13 = vmul.f32 %v2128_v51, %v2126_v56  ;;  %v2145_v41 = vmul.f32 %v2144_v52, %v2125_v31  ;;  %p2886_p0 = pnand %p2885_p13, %p2879_p10 }
 0x1d4   :  { %v2146_v29 = vmul.f32 %v2144_v52, %v2126_v56  ;;  %v2161_v3 = vmul.f32 %v2160_v0, %v2125_v31  ;;  %v2162_v23 = vmul.f32 %v2160_v0, %v2126_v56  ;;  %v2177_v12 = vmul.f32 %v2176_v37, %v2125_v31 }
 0x1d5   :  { %v2133_v43 = vcombine.low %v2129_v21, %v2130_v13  ;;  %v2178_v32 = vmul.f32 %v2176_v37, %v2126_v56  ;;  %v2193_v10 = vmul.f32 %v2192_v55, %v2125_v31  ;;  %v2194_v20 = vmul.f32 %v2192_v55, %v2126_v56 }
 0x1d6   :  { %v2149_v58 = vcombine.low %v2145_v41, %v2146_v29  ;;  %v2165_v33 = vcombine.low %v2161_v3, %v2162_v23  ;;  %v2209_v42 = vmul.f32 %v2208_v1, %v2125_v31  ;;  %v2210_v47 = vmul.f32 %v2208_v1, %v2126_v56  ;;  %v2328_v41 = vpop.permute.xlu1 %2327  ;;  %v2326_v3 = vpop.permute.xlu0 %2325 }
 0x1d7   :  { %v2140_v11 = vrot.slane %v2133_v43, %v2951_v6  ;;  %v2181_v28 = vcombine.low %v2177_v12, %v2178_v32  ;;  %v2197_v4 = vcombine.low %v2193_v10, %v2194_v20  ;;  %v2246_v38 = vstv %s4114_s20 }
 0x1d8   :  { %v2156_v59 = vrot.slane %v2149_v58, %v2951_v6  ;;  %v2172_v34 = vrot.slane %v2165_v33, %v2951_v6  ;;  %v2213_v5 = vcombine.low %v2209_v42, %v2210_v47  ;;  %v2262_v60 = vstv %s4117_s0 }
 0x1d9   :  { %v2142_v8 = vadd.f32 %v2140_v11, %v2040_v40  ;;  %v2188_v49 = vrot.slane %v2181_v28, %v2951_v6  ;;  %v2204_v50 = vrot.slane %v2197_v4, %v2951_v6  ;;  %v2278_v18 = vstv %s4121_s19 }
 0x1da   :  { %v2158_v61 = vadd.f32 %v2156_v59, %v2056_v46  ;;  %v2174_v24 = vadd.f32 %v2172_v34, %v2072_v17  ;;  %v2220_v62 = vrot.slane %v2213_v5, %v2951_v6  ;;  %v2294_v48 = vstv %s4129_s5 }
 0x1db   :  { %v2190_v7 = vadd.f32 %v2188_v49, %v2088_v57  ;;  %v2206_v30 = vadd.f32 %v2204_v50, %v2104_v19  ;;  %v2310_v27 = vstv %s4131_s24  ;;  %v2227_v9 = vsel %vm519_vm4, %v2224_v39, %v2226_v35 }
 0x1dc   :  { %v2222_v25 = vadd.f32 %v2220_v62, %v2120_v2  ;;  %v2228_v51 = vsel %vm519_vm4, %v2226_v35, %v2224_v39  ;;  %v2231_v45 = vmul.f32 %v2230_v36, %v2227_v9  ;;  %v2247_v14 = vmul.f32 %v2246_v38, %v2227_v9 }
 0x1dd   :  { %v2232_v15 = vmul.f32 %v2230_v36, %v2228_v51  ;;  %v2248_v52 = vmul.f32 %v2246_v38, %v2228_v51  ;;  %v2263_v16 = vmul.f32 %v2262_v60, %v2227_v9  ;;  %v2264_v63 = vmul.f32 %v2262_v60, %v2228_v51 }
 0x1de   :  { %v2279_v26 = vmul.f32 %v2278_v18, %v2227_v9  ;;  %v2280_v44 = vmul.f32 %v2278_v18, %v2228_v51  ;;  %v2295_v0 = vmul.f32 %v2294_v48, %v2227_v9  ;;  %v2296_v53 = vmul.f32 %v2294_v48, %v2228_v51 }
 0x1df   :  { %v2235_v40 = vcombine.low %v2231_v45, %v2232_v15  ;;  %v2251_v46 = vcombine.low %v2247_v14, %v2248_v52  ;;  %v2267_v17 = vcombine.low %v2263_v16, %v2264_v63  ;;  %v2311_v37 = vmul.f32 %v2310_v27, %v2227_v9  ;;  %v2430_v9 = vpop.permute.xlu1 %2429 }
 0x1e0   :  { %v2283_v57 = vcombine.low %v2279_v26, %v2280_v44  ;;  %v2299_v19 = vcombine.low %v2295_v0, %v2296_v53  ;;  %v2312_v54 = vmul.f32 %v2310_v27, %v2228_v51  ;;  %v2332_v55 = vstv %s4135_s9  ;;  %v2428_v51 = vpop.permute.xlu0 %2427 }
 0x1e1   :  { %v2242_v1 = vrot.slane %v2235_v40, %v2951_v6  ;;  %v2258_v31 = vrot.slane %v2251_v46, %v2951_v6  ;;  %v2274_v56 = vrot.slane %v2267_v17, %v2951_v6  ;;  %v2348_v36 = vstv %s4140_s11 }
 0x1e2   :  { %v2290_v2 = vrot.slane %v2283_v57, %v2951_v6  ;;  %v2306_v21 = vrot.slane %v2299_v19, %v2951_v6  ;;  %v2315_v13 = vcombine.low %v2311_v37, %v2312_v54  ;;  %v2364_v29 = vstv %s4145_s26 }
 0x1e3   :  { %v4174_v23 = vadd.f32 %v2242_v1, %v2142_v8  ;;  %v4176_v12 = vadd.f32 %v2258_v31, %v2158_v61  ;;  %v4178_v43 = vadd.f32 %v2274_v56, %v2174_v24  ;;  %v2380_v32 = vstv %s4149_s13 }
 0x1e4   :  { %v4183_v10 = vadd.f32 %v2290_v2, %v2190_v7  ;;  %v4185_v20 = vadd.f32 %v2306_v21, %v2206_v30  ;;  %v2322_v58 = vrot.slane %v2315_v13, %v2951_v6  ;;  %v2396_v33 = vstv %s4154_s22 }
 0x1e5   :  { %v2412_v42 = vstv %s4158_s17  ;;  %v2329_v47 = vsel %vm622_vm5, %v2326_v3, %v2328_v41  ;;  %v2330_v11 = vsel %vm622_vm5, %v2328_v41, %v2326_v3  ;;  %v2434_v28 = vstv %s4160_s15 }
 0x1e6   :  { %v4199_v4 = vadd.f32 %v2322_v58, %v2222_v25  ;;  %v2333_v38 = vmul.f32 %v2332_v55, %v2329_v47  ;;  %v2334_v59 = vmul.f32 %v2332_v55, %v2330_v11  ;;  %v2349_v34 = vmul.f32 %v2348_v36, %v2329_v47 }
 0x1e7   :  { %v2350_v5 = vmul.f32 %v2348_v36, %v2330_v11  ;;  %v2365_v35 = vmul.f32 %v2364_v29, %v2329_v47  ;;  %v2366_v60 = vmul.f32 %v2364_v29, %v2330_v11  ;;  %v2381_v39 = vmul.f32 %v2380_v32, %v2329_v47 }
 0x1e8   :  { %v2337_v8 = vcombine.low %v2333_v38, %v2334_v59  ;;  %v2382_v49 = vmul.f32 %v2380_v32, %v2330_v11  ;;  %v2397_v50 = vmul.f32 %v2396_v33, %v2329_v47  ;;  %v2398_v18 = vmul.f32 %v2396_v33, %v2330_v11 }
 0x1e9   :  { %v2353_v61 = vcombine.low %v2349_v34, %v2350_v5  ;;  %v2369_v24 = vcombine.low %v2365_v35, %v2366_v60  ;;  %v2413_v62 = vmul.f32 %v2412_v42, %v2329_v47  ;;  %v2414_v48 = vmul.f32 %v2412_v42, %v2330_v11  ;;  %v2532_v42 = vpop.permute.xlu1 %2531  ;;  %v2530_v11 = vpop.permute.xlu0 %2529 }
 0x1ea   :  { %v4206_v7 = vrot.slane %v2337_v8, %v2951_v6  ;;  %v2385_v30 = vcombine.low %v2381_v39, %v2382_v49  ;;  %v2401_v27 = vcombine.low %v2397_v50, %v2398_v18  ;;  %v2450_v25 = vstv %s4167_s30 }
 0x1eb   :  { %v4212_v45 = vrot.slane %v2353_v61, %v2951_v6  ;;  %v4215_v14 = vrot.slane %v2369_v24, %v2951_v6  ;;  %v2417_v15 = vcombine.low %v2413_v62, %v2414_v48  ;;  %v2466_v52 = vstv %s4172_s2 }
 0x1ec   :  { %v4221_v16 = vrot.slane %v2385_v30, %v2951_v6  ;;  %v4224_v63 = vrot.slane %v2401_v27, %v2951_v6  ;;  %v2482_v26 = vstv %s4181_s28  ;;  %v2498_v44 = vstv %s4189_s29 }
 0x1ed   :  { %v2424_v0 = vrot.slane %v2417_v15, %v2951_v6  ;;  %v2514_v53 = vstv %s4197_s21  ;;  %v2431_v40 = vsel %vm725_vm6, %v2428_v51, %v2430_v9  ;;  %v2432_v46 = vsel %vm725_vm6, %v2430_v9, %v2428_v51 }
 0x1ee   :  { %v2435_v17 = vmul.f32 %v2434_v28, %v2431_v40  ;;  %v2436_v37 = vmul.f32 %v2434_v28, %v2432_v46  ;;  %v2451_v57 = vmul.f32 %v2450_v25, %v2431_v40  ;;  %v2452_v19 = vmul.f32 %v2450_v25, %v2432_v46 }
 0x1ef   :  { %v2467_v54 = vmul.f32 %v2466_v52, %v2431_v40  ;;  %v2468_v55 = vmul.f32 %v2466_v52, %v2432_v46  ;;  %v2483_v1 = vmul.f32 %v2482_v26, %v2431_v40  ;;  %v2484_v31 = vmul.f32 %v2482_v26, %v2432_v46 }
 0x1f0   :  { %v2439_v56 = vcombine.low %v2435_v17, %v2436_v37  ;;  %v2455_v36 = vcombine.low %v2451_v57, %v2452_v19  ;;  %v2499_v2 = vmul.f32 %v2498_v44, %v2431_v40  ;;  %v2500_v21 = vmul.f32 %v2498_v44, %v2432_v46 }
 0x1f1   :  { %v2471_v13 = vcombine.low %v2467_v54, %v2468_v55  ;;  %v2487_v41 = vcombine.low %v2483_v1, %v2484_v31  ;;  %v2515_v29 = vmul.f32 %v2514_v53, %v2431_v40  ;;  %v2516_v3 = vmul.f32 %v2514_v53, %v2432_v46 }
 0x1f2   :  { %v2446_v32 = vrot.slane %v2439_v56, %v2951_v6  ;;  %v2462_v58 = vrot.slane %v2455_v36, %v2951_v6  ;;  %v2503_v33 = vcombine.low %v2499_v2, %v2500_v21  ;;  %v2536_v47 = vstv %s4201_s25 }
 0x1f3   :  { %v2478_v28 = vrot.slane %v2471_v13, %v2951_v6  ;;  %v2494_v38 = vrot.slane %v2487_v41, %v2951_v6  ;;  %v2519_v59 = vcombine.low %v2515_v29, %v2516_v3  ;;  %v2552_v34 = vstv %s4203_s16 }
 0x1f4   :  { %v2510_v5 = vrot.slane %v2503_v33, %v2951_v6  ;;  %v2568_v35 = vstv %s4209_s1  ;;  %v2584_v60 = vstv %s4218_s27  ;;  %v2600_v39 = vstv %s4228_s14 }
 0x1f5   :  { %v2526_v8 = vrot.slane %v2519_v59, %v2951_v6  ;;  %v2616_v49 = vstv %s4236_s12  ;;  %v2533_v50 = vsel %vm828_vm7, %v2530_v11, %v2532_v42  ;;  %v2534_v18 = vsel %vm828_vm7, %v2532_v42, %v2530_v11 }
 0x1f6   :  { %v2537_v61 = vmul.f32 %v2536_v47, %v2533_v50  ;;  %v2538_v24 = vmul.f32 %v2536_v47, %v2534_v18  ;;  %v2553_v62 = vmul.f32 %v2552_v34, %v2533_v50  ;;  %v2554_v48 = vmul.f32 %v2552_v34, %v2534_v18 }
 0x1f7   :  { %v2569_v30 = vmul.f32 %v2568_v35, %v2533_v50  ;;  %v2570_v27 = vmul.f32 %v2568_v35, %v2534_v18  ;;  %v2585_v9 = vmul.f32 %v2584_v60, %v2533_v50  ;;  %v2586_v25 = vmul.f32 %v2584_v60, %v2534_v18 }
 0x1f8   :  { %v2541_v51 = vcombine.low %v2537_v61, %v2538_v24  ;;  %v2557_v15 = vcombine.low %v2553_v62, %v2554_v48  ;;  %v2601_v52 = vmul.f32 %v2600_v39, %v2533_v50  ;;  %v2602_v26 = vmul.f32 %v2600_v39, %v2534_v18 }
 0x1f9   :  { %v2573_v44 = vcombine.low %v2569_v30, %v2570_v27  ;;  %v2589_v53 = vcombine.low %v2585_v9, %v2586_v25  ;;  %v2617_v40 = vmul.f32 %v2616_v49, %v2533_v50  ;;  %v2618_v46 = vmul.f32 %v2616_v49, %v2534_v18 }
 0x1fa   :  { %v2605_v17 = vcombine.low %v2601_v52, %v2602_v26  ;;  %v2346_v22 = vadd.f32 %v4206_v7, %v4174_v23  ;;  %v2362_v37 = vadd.f32 %v4212_v45, %v4176_v12  ;;  %v2378_v57 = vadd.f32 %v4215_v14, %v4178_v43 }
 0x1fb   :  { %v2621_v19 = vcombine.low %v2617_v40, %v2618_v46  ;;  %v2394_v54 = vadd.f32 %v4221_v16, %v4183_v10  ;;  %v2410_v55 = vadd.f32 %v4224_v63, %v4185_v20  ;;  %v2426_v1 = vadd.f32 %v2424_v0, %v4199_v4 }
 0x1fc   :  { %v2448_v31 = vadd.f32 %v2446_v32, %v2346_v22  ;;  %v2464_v56 = vadd.f32 %v2462_v58, %v2362_v37  ;;  %v2480_v36 = vadd.f32 %v2478_v28, %v2378_v57  ;;  %v2548_v23 = vrot.slane %v2541_v51, %v2951_v6 }
 0x1fd   :  { %v2496_v7 = vadd.f32 %v2494_v38, %v2394_v54  ;;  %v2512_v2 = vadd.f32 %v2510_v5, %v2410_v55  ;;  %v2528_v12 = vadd.f32 %v2526_v8, %v2426_v1  ;;  %v2564_v45 = vrot.slane %v2557_v15, %v2951_v6 }
 0x1fe   :  { %v2550_v43 = vadd.f32 %v2548_v23, %v2448_v31  ;;  %v2580_v14 = vrot.slane %v2573_v44, %v2951_v6  ;;  %v2596_v10 = vrot.slane %v2589_v53, %v2951_v6  ;;  %v2612_v16 = vrot.slane %v2605_v17, %v2951_v6 }
 0x1ff   :  { %v2566_v20 = vadd.f32 %v2564_v45, %v2464_v56  ;;  %v2628_v4 = vrot.slane %v2621_v19, %v2951_v6 }
 0x200   :  { %v2582_v63 = vadd.f32 %v2580_v14, %v2480_v36  ;;  %v2598_v0 = vadd.f32 %v2596_v10, %v2496_v7  ;;  %v2614_v21 = vadd.f32 %v2612_v16, %v2512_v2  ;;  %2634 = vst [vmem:[#allocation9] sm:$0xf] %v2550_v43 }
 0x201   :  { %v2630_v13 = vadd.f32 %v2628_v4, %v2528_v12  ;;  %2635 = vst [vmem:[#allocation9 + $0x4] sm:$0xf] %v2566_v20 }
 0x202   :  { %2636 = vst [vmem:[#allocation9 + $0x8] sm:$0xf] %v2582_v63  ;;  %2637 = vst [vmem:[#allocation9 + $0xc] sm:$0xf] %v2598_v0 }
 0x203   :  { %2638 = vst [vmem:[#allocation9 + $0x10] sm:$0xf] %v2614_v21  ;;  %2639 = vst [vmem:[#allocation9 + $0x14] sm:$0xf] %v2630_v13 }
 0x204   :  { %2889 = shalt.err (!%p2886_p0)
}
 0x205   :  { %s4791_s4 = sld [smem:[#allocation101_spill]] }
 0x20b   :  { %2649 = dma.vmem_to_hbm [thread:$0]  %s2647_s3, 384, %s4791_s4, [#allocation4]  }
 0x20c   :  { %2904 = dma.done.wait [#allocation4], 384  }
 0x20d   :  { %2905 = vsyncadd [#allocation4], 4294966912 }
 0x20e   :  { %2653 = vsyncpa [#allocation3], 1 }
 0x20f   :  { %2654 = vsyncpa [#allocation4], 1 }
 0x210   :  { %2655 = vsyncpa [#allocation5], 1 }
 0x211   :  { %2656 = vsyncpa [#allocation6], 1 }

</bundles_post_ra>
